<compile_context>
chip_gen: v7x
topology: tpu7x:2x2x1
jax: 0.10.0
libtpu: 0.0.40
codegen_flags: <defaults>
</compile_context>

<pallas_src>
import jax
import jax.numpy as jnp
from jax import lax
from jax.experimental import pallas as pl
from jax.experimental.pallas import tpu as pltpu


# ------------- Pallas kernel: im2col GEMM (bias folded into B) --------------

def _conv_mm_kernel(a_ref, b_ref, o_ref):
    # a_ref: (TM, Kp) im2col patches (+ ones column for bias, + zero pad)
    # b_ref: (Kp, O)  reshaped conv weights (+ bias row, + zero pad)
    # o_ref: (TM, O)
    o_ref[...] = jnp.dot(
        a_ref[...], b_ref[...],
        preferred_element_type=jnp.float32,
        precision=lax.Precision.HIGHEST,      # f32 parity; compute is not the bottleneck
    ).astype(o_ref.dtype)


def _conv_matmul(a, b, *, tm=256):
    """a: (Mp, Kp) with Mp a multiple of tm; b: (Kp, O). Returns (Mp, O) f32."""
    Mp, Kp = a.shape
    _, O = b.shape
    grid_m = Mp // tm
    return pl.pallas_call(
        _conv_mm_kernel,
        out_shape=jax.ShapeDtypeStruct((Mp, O), jnp.float32),
        grid=(grid_m,),
        in_specs=[
            pl.BlockSpec((tm, Kp), lambda i: (i, 0)),   # A tile: full (small) K
            pl.BlockSpec((Kp, O), lambda i: (0, 0)),    # B resident: 32x1024 f32 = 128 KB
        ],
        out_specs=pl.BlockSpec((tm, O), lambda i: (i, 0)),
        compiler_params=pltpu.CompilerParams(
            dimension_semantics=("parallel",)),          # lets v7x's 2 TCs split M-blocks
    )(a, b)


# -------------- def_node forward (Conv2d 3->1024, k=3, pad=1) ---------------

def def_node_forward(x_nchw, weight, bias, *, tm=256):
    """x_nchw: (N, 3, H, W) f32; weight: (1024, 3, 3, 3); bias: (1024,).
    Returns NCHW (N, 1024, H, W), matching the PyTorch module."""
    N, C, H, W = x_nchw.shape
    O, _, KH, KW = weight.shape
    K = C * KH * KW                          # 27
    Kp = ((K + 1 + 7) // 8) * 8              # 32: room for the bias column + sublane align

    # --- im2col glue (plain JAX), built directly in final column order ------
    xp = jnp.pad(x_nchw, ((0, 0), (0, 0), (1, 1), (1, 1)))
    xp = jnp.transpose(xp, (0, 2, 3, 1))     # (N, H+2, W+2, C): one small transpose
    cols = [xp[:, ky:ky + H, kx:kx + W, :] for ky in range(KH) for kx in range(KW)]
    # (N, H, W, C, KH*KW); flattened column index = c*(KH*KW) + ky*KW + kx,
    # which matches weight.reshape(O, C*KH*KW).
    a = jnp.stack(cols, axis=-1).reshape(N * H * W, K)

    # --- fold bias + pad K to Kp, pad M to a multiple of tm -----------------
    M = N * H * W
    tm = min(tm, ((M + 7) // 8) * 8)         # don't over-tile tiny inputs
    Mp = pl.cdiv(M, tm) * tm
    a = jnp.concatenate(
        [a, jnp.ones((M, 1), a.dtype), jnp.zeros((M, Kp - K - 1), a.dtype)], axis=1)
    if Mp != M:
        a = jnp.pad(a, ((0, Mp - M), (0, 0)))

    w2 = weight.reshape(O, K).T              # (K, O)
    b = jnp.concatenate(
        [w2, bias.reshape(1, O), jnp.zeros((Kp - K - 1, O), w2.dtype)], axis=0)  # (Kp, O)

    # --- hot path: the GEMM that IS the convolution --------------------------
    out_flat = _conv_matmul(a, b, tm=tm)[:M]            # (M, O)
    out_nhwc = out_flat.reshape(N, H, W, O)

    # Module semantics are NCHW, so transpose back (XLA glue, outside kernel).
    # Perf note: consumers that accept NHWC should use `out_nhwc` directly —
    # keeping the 1024-channel axis on lanes avoids masked last-dim-16 stores.
    return jnp.transpose(out_nhwc, (0, 3, 1, 2))        # (N, O, H, W)


# ------------------------------------ main -----------------------------------

if __name__ == "__main__":
    key = jax.random.PRNGKey(0)
    k_x, k_w, k_b = jax.random.split(key, 3)

    N, C, H, W = 2, 3, 16, 16
    O, KH, KW = 1024, 3, 3

    x = jax.random.normal(k_x, (N, C, H, W), dtype=jnp.float32)
    # Deterministic PyTorch-style init: U(-bound, bound), bound = 1/sqrt(C*KH*KW)
    fan_in = C * KH * KW
    bound = 1.0 / (fan_in ** 0.5)
    weight = jax.random.uniform(k_w, (O, C, KH, KW), dtype=jnp.float32,
                                minval=-bound, maxval=bound)
    bias = jax.random.uniform(k_b, (O,), dtype=jnp.float32,
                              minval=-bound, maxval=bound)

    out = def_node_forward(x, weight, bias)
    out = jax.block_until_ready(out)
    assert out.shape == (N, O, H, W), out.shape

    # Cross-check against XLA's conv (both sides f32-HIGHEST -> tight tolerance).
    ref = lax.conv_general_dilated(
        x, weight, window_strides=(1, 1), padding="SAME",
        dimension_numbers=("NCHW", "OIHW", "NCHW"),
        precision=lax.Precision.HIGHEST,
    ) + bias.reshape(1, O, 1, 1)
    ref = jax.block_until_ready(ref)
    assert jnp.allclose(out, ref, atol=1e-3, rtol=1e-3), "mismatch vs lax conv"

    print("KERNEL_OK")
</pallas_src>

<mosaic_0001>
module attributes {stable_mosaic.version = 11 : i64} {
  func.func @_conv_mm_kernel(%arg0: i32, %arg1: memref<256x32xf32, #tpu.memory_space<vmem>>, %arg2: memref<32x1024xf32, #tpu.memory_space<vmem>>, %arg3: memref<256x1024xf32, #tpu.memory_space<vmem>>) attributes {dimension_semantics = [#tpu.dimension_semantics<parallel>], iteration_bounds = array<i64: 2>, scalar_prefetch = 0 : i64, scratch_operands = 0 : i64, tpu.core_type = #tpu.core_type<tc>, window_params = [{transform_indices = @transform_0, window_bounds = array<i64: 256, 32>}, {pipeline_mode = #tpu.pipeline_mode<synchronous>, transform_indices = @transform_1, window_bounds = array<i64: 32, 1024>}, {transform_indices = @transform_2, window_bounds = array<i64: 256, 1024>}]} {
    %c0 = arith.constant 0 : index
    %c0_0 = arith.constant 0 : index
    %0 = vector.load %arg1[%c0, %c0_0] : memref<256x32xf32, #tpu.memory_space<vmem>>, vector<256x32xf32>
    %c0_1 = arith.constant 0 : index
    %c0_2 = arith.constant 0 : index
    %1 = vector.load %arg2[%c0_1, %c0_2] : memref<32x1024xf32, #tpu.memory_space<vmem>>, vector<32x1024xf32>
    %cst = arith.constant dense<0.000000e+00> : vector<256x1024xf32>
    %2 = tpu.matmul %0, %1, %cst {dimension_numbers = #tpu.dot_dimension_numbers<[1], [0], [0], [1], [0, 0, 1, 1], [], []>, precision = #tpu.contract_precision<fp32>} : vector<256x32xf32>, vector<32x1024xf32>, vector<256x1024xf32> -> vector<256x1024xf32>
    %c0_3 = arith.constant 0 : index
    %c0_4 = arith.constant 0 : index
    %3 = vector.load %arg3[%c0_3, %c0_4] : memref<256x1024xf32, #tpu.memory_space<vmem>>, vector<256x1024xf32>
    tpu.vector_store %arg3[%c0_3, %c0_4], %2 {strides = array<i32>} : memref<256x1024xf32, #tpu.memory_space<vmem>>, vector<256x1024xf32>,
    return
  }
  func.func @transform_0(%arg0: i32) -> (i32, i32) {
    %c0_i32 = arith.constant 0 : i32
    %c0_i32_0 = arith.constant 0 : i32
    return %arg0, %c0_i32 : i32, i32
  }
  func.func @transform_1(%arg0: i32) -> (i32, i32) {
    %c0_i32 = arith.constant 0 : i32
    %c0_i32_0 = arith.constant 0 : i32
    %c0_i32_1 = arith.constant 0 : i32
    return %c0_i32, %c0_i32_0 : i32, i32
  }
  func.func @transform_2(%arg0: i32) -> (i32, i32) {
    %c0_i32 = arith.constant 0 : i32
    %c0_i32_0 = arith.constant 0 : i32
    return %arg0, %c0_i32 : i32, i32
  }
}

</mosaic_0001>

<bundles_post_ra>
// kernel: tpu_custom_call.1
= control target key start
LH: loop header
LB: loop body
LE: loop exit
PB: predicated region body
PF: predicated region fallthrough
CT: control target
= control target key end

     0   :  { %7 = vsyncpa [#allocation3], 0  ;;  %s13580_s0 = inlined_call_operand.vmem [shape: f32[512,32], index: 0, kind: input, shape index: {}]   ;;  %s13581_s1 = inlined_call_operand.hbm [shape: f32[32,1024], index: 1, kind: input, shape index: {}]   ;;  %s13582_s2 = inlined_call_operand.hbm [shape: f32[512,1024], index: 2, kind: output, shape index: {}]  }
   0x1   :  { %8 = vsyncpa [#allocation4], 0 }
   0x2   :  { %10 = vsyncpa [#allocation4 + $0x1], 0  ;;  %s10576_s9 = smov 0   ;;  %s10578_s10 = smov 0  }
   0x3   :  { %s10580_s11 = smov 0   ;;  %s10582_s12 = smov 0  }
   0x4 LB: > { %s10597_s13 = sadd.s32 4294967295, %s10552_s12   ;;  %s8914_s14 = sadd.s32 4294967294, %s10552_s12   ;;  %s10552_s12 = sphi %s10582_s12, %s14340_s12   ;;  %s10548_s11 = sphi %s10580_s11, %s14339_s11   ;;  %s10544_s10 = sphi %s10578_s10, %s14338_s10   ;;  %s10540_s9 = sphi %s10576_s9, %s14337_s9  }
   0x5   : > { %s10601_s15 = sadd.s32 1, %s10552_s12   ;;  %s70_s16 = sadd.s32 1, %s10548_s11 }
   0x6   : > { %s67_s17 = ssub.s32 %s10552_s12, %s10601_s15  ;;  %p80_p0 = scmp.ne.s32.totalorder %s10548_s11, %s10544_s10 }
   0x7   : > { %p68_p1 = scmp.eq.s32.totalorder %s67_s17, 0  ;;  %p81_p2 = scmp.eq.s32.totalorder %s10597_s13, 1 }
   0x8   : > { %p86_p3 = scmp.ne.s32.totalorder %s10544_s10, %s10540_s9  ;;  %p87_p4 = scmp.eq.s32.totalorder %s8914_s14, 1 }
   0x9   : > { %s10612_s18 = scalar_select %p68_p1, %s10548_s11, %s70_s16  }
   0xa   : > { %p10614_p5 = por %p81_p2, %p80_p0  ;;  %p10618_p6 = por %p87_p4, %p86_p3 }
   0xb   : > { %p8915_p7 = scmp.ge.s32.totalorder %s10552_s12, 1  ;;  %p94_p8 = scmp.lt.s32.totalorder %s10552_s12, 3 }
   0xc   : > { %s13936_s19 = scalar_select %p10614_p5, 1, 0 }
   0xd   : > { %s13937_s20 = scalar_select %p10618_p6, 1, 0 }
   0xe   : > { %p13583_p9 = scmp.eq.s32.totalorder %s10597_s13, 0  ;;  %p10625_p10 = pnand %p8915_p7, %p94_p8 }
   0xf   : > { %s10554_s22 = smov [#allocation2]   ;;  %s10458_s27 = scalar_lea.hbm %s13581_s1, 4096 }
  0x10   : > { %s13938_s21 = scalar_select %p10625_p10, 1, 0 }
  0x11   : > { %s106_s23 = sshll.u32 %s10554_s22, 4  ;;  %p10409_p11 = pneg %p10625_p10  ;;  %s107_s23 = int_to_ptr.vmem [resolvable:$true] %s106_s23 }
  0x12   : > { %p10459_p13 = scmp.ne.s32.totalorder %s13581_s1, %s10458_s27  ;;  %p10465_p3 = scmp.lt.u32.totalorder %s10458_s27, %s13581_s1 }
  0x13   : > { %p10633_p12 = pnand %p13583_p9, %p10409_p11 }
  0x15   : > { %p10460_p0 = pneg %p10633_p12 }
  0x17   : > { %p10461_p1 = pnand %p10460_p0, %p10459_p13 }
  0x19   : > { %p10462_p2 = pneg %p10461_p1 }
  0x1b   : > { %p10467_p4 = pnand %p10465_p3, %p10462_p2 }
  0x1d   : > { %10470 = shalt.err (!%p10467_p4)
}
  0x1e   : > { %s10471_s4 = scalar_lea.vmem %s107_s23, 4096  ;;  %p10479_p9 = scmp.lt.s32.totalorder %s107_s23, %s107_s23 }
  0x1f   : > { %p10472_p7 = scmp.ne.s32.totalorder %s107_s23, %s10471_s4  ;;  %p10480_p6 = scmp.lt.s32.totalorder %s10471_s4, %s10471_s4 }
  0x21   : > { %p10474_p8 = pnand %p10472_p7, %p10460_p0  ;;  %p10481_p5 = por %p10480_p6, %p10479_p9 }
  0x23   : > { %p10475_p11 = pneg %p10474_p8 }
  0x25   : > { %p10482_p10 = pnand %p10481_p5, %p10475_p11 }
  0x27   : > { %10485 = shalt.err (!%p10482_p10)
}
  0x28   : > { %s10555_s5 = smov 1024   ;;  %s10556_s6 = smov 64  }
  0x29   : > { %10412 = dma.hbm_to_vmem [thread:$0]  (!%p10633_p12), %s13581_s1, 4096, %s107_s23, [#allocation3], %s10555_s5, %s10555_s5, %s10556_s6  }
  0x2a   : > { %p13940_p13 = scmp.ne.s32.totalorder %s13938_s21, 0 }
  0x2c   : > { %131 = sbr.rel (%p13940_p13) target bundleno = 1838 (0x72e), region = 28 }
  0x33   : > { %p13941_p1 = scmp.eq.s32.totalorder %s10597_s13, 0 }
  0x35   : > { %10531 = dma.done.wait (%p13941_p1), [#allocation3], 4096   ;;  %p13942_p0 = pmov %p13941_p1 }
  0x36   : > { %s8921_s14 = sshll.u32 %s10597_s13, 5  ;;  %v13600_v0 = vmov 0.0   ;;  %v193_v1 = vld [vmem:[#allocation2 + $0x8] sm:$0xff]  ;;  %v195_v3 = vld [vmem:[#allocation2 + $0x18] sm:$0xff]  ;;  %v192_v8 = vld [vmem:[#allocation2] sm:$0xff]  ;;  %vm224_vm0 = vcmask 261120  }
  0x37   : > { %10533 = vsyncadd (%p13942_p0), [#allocation3], 4294963200  ;;  %393 = vmatprep.mubr.f32.mxu0 %v13600_v0  ;;  %2455 = vmatprep.mubr.f32.mxu1 %v13600_v0  ;;  %p154_p5 = scmp.lt.s32.totalorder %s8921_s14, 63  ;;  %v201_v2 = vld [vmem:[#allocation2 + $0x48] sm:$0xff]  ;;  %v321_v4 = vand.u32 4294901760, %v193_v1  ;;  %v203_v6 = vld [vmem:[#allocation2 + $0x58] sm:$0xff] }
  0x38   : > { %v325_v5 = vand.u32 4294901760, %v201_v2  ;;  %v2383_v7 = vand.u32 4294901760, %v195_v3  ;;  %v200_v9 = vld [vmem:[#allocation2 + $0x40] sm:$0xff]  ;;  %v2387_v10 = vand.u32 4294901760, %v203_v6  ;;  %v323_v11 = vand.u32 4294901760, %v192_v8  ;;  %v194_v13 = vld [vmem:[#allocation2 + $0x10] sm:$0xff] }
  0x39   : > { %s14342_s14 = smov (!%p154_p5, %s8921_s14), 63  ;;  %v327_v12 = vand.u32 4294901760, %v200_v9  ;;  %v202_v14 = vld [vmem:[#allocation2 + $0x50] sm:$0xff]  ;;  %v10662_v15 = vld [vmem:[#allocation2 + $0x88] sm:$0xff]  ;;  %v10668_v18 = vld [vmem:[#allocation2 + $0x98] sm:$0xff]  ;;  %v10684_v23 = vsub.f32 %v193_v1, %v321_v4  ;;  %v2385_v24 = vand.u32 4294901760, %v194_v13 }
  0x3a   : > { %s8922_s16 = sshll.u32 %s14342_s14, 3  ;;  %v10664_v16 = vpack.c.bf16 %v325_v5, %v321_v4  ;;  %v10666_v17 = vld [vmem:[#allocation2 + $0xc8] sm:$0xff]  ;;  %v10670_v19 = vld [vmem:[#allocation2 + $0xd8] sm:$0xff]  ;;  %v10672_v20 = vpack.c.bf16 %v2387_v10, %v2383_v7  ;;  %v10676_v22 = vld [vmem:[#allocation2 + $0x80] sm:$0xff]  ;;  %v2389_v25 = vand.u32 4294901760, %v202_v14  ;;  %v329_v26 = vand.u32 4294901760, %v10662_v15 }
  0x3b   : > { %v10674_v21 = vpack.c.bf16 %v327_v12, %v323_v11  ;;  %s10681_s22 = scalar_lea.vmem %s13580_s0, %s8922_s16  ;;  %v10687_v27 = vsub.f32 %v201_v2, %v325_v5  ;;  %v13602_v28 = vand.u32 4294901760, %v10666_v17  ;;  %v13599_v29 = vand.u32 4294901760, %v10668_v18  ;;  %v10694_v31 = vld [vmem:[#allocation2 + $0xc0] sm:$0xff]  ;;  %v10696_v32 = vld [vmem:[#allocation2 + $0x90] sm:$0xff]  ;;  %s150_s23 = sand.u32 1, %s10544_s10  }
  0x3c   : > { %8932 = vmatprep.subr.bf16.mxu0 %v10664_v16  ;;  %8980 = vmatprep.subr.bf16.mxu1 %v10672_v20  ;;  %v13598_v30 = vand.u32 4294901760, %v10670_v19  ;;  %v10698_v33 = vsub.f32 %v195_v3, %v2383_v7  ;;  %v10700_v34 = vpack.c.bf16 %v2389_v25, %v2385_v24  ;;  %v13597_v35 = vand.u32 4294901760, %v10676_v22  ;;  %v10703_v36 = vld [vmem:[#allocation2 + $0xd0] sm:$0xff]  ;;  %v160_v37 = vld [vmem:[%s10681_s22] sm:$0xff]  ;;  %v161_v5 = vld [vmem:[%s10681_s22 + $0x8] sm:$0xff]  ;;  %s8920_s24 = sshll.u32 %s150_s23, 11 }
  0x3d   : > { %13943 = vst [vmem:[#allocation8_spill] sm:$0xff] %v10674_v21  ;;  %8934 = vmatpush1.bf16.msra.mxu0 %v10674_v21  ;;  %v10706_v38 = vsub.f32 %v203_v6, %v2387_v10  ;;  %v10708_v39 = vsub.f32 %v192_v8, %v323_v11  ;;  %v10714_v40 = vpack.c.bf16 %v13602_v28, %v329_v26  ;;  %v13596_v44 = vand.u32 4294901760, %v10694_v31  ;;  %v162_v10 = vld [vmem:[%s10681_s22 + $0x10] sm:$0xff]  ;;  %v183_v21 = vld [vmem:[%s10681_s22 + $0xb8] sm:$0xff]  ;;  %s12528_s25 = scalar_lea.vmem [#allocation5], %s8920_s24  ;;  %s8930_s26 = sshll.u32 %s10597_s13, 15 }
  0x3e   : > { %13944 = vst [vmem:[#allocation9_spill] sm:$0xff] %v10700_v34  ;;  %v10720_v41 = vpack.c.bf16 %v13598_v30, %v13599_v29  ;;  %v10722_v42 = vsub.f32 %v200_v9, %v327_v12  ;;  %8982 = vmatpush1.bf16.msra.mxu1 %v10700_v34  ;;  %v10725_v43 = vsub.f32 %v194_v13, %v2385_v24  ;;  %v13595_v45 = vand.u32 4294901760, %v10696_v32  ;;  %v163_v24 = vld [vmem:[%s10681_s22 + $0x18] sm:$0xff]  ;;  %v182_v34 = vld [vmem:[%s10681_s22 + $0xb0] sm:$0xff]  ;;  %s8840_s27 = sshll.u32 %s12528_s25, 4  ;;  %s13529_s30 = scalar_lea.hbm %s13582_s2, %s8930_s26  ;;  %s13531_s27 = int_to_ptr.vmem [resolvable:$true] %s8840_s27 }
  0x3f   : > { %13945 = vst [vmem:[#allocation10_spill] sm:$0xff] %v10714_v40  ;;  %8936 = vmatprep.subr.bf16.mxu0 %v10714_v40  ;;  %v13594_v46 = vand.u32 4294901760, %v10703_v36  ;;  %v226_v47 = vsel %vm224_vm0, %v160_v37, 0  ;;  %v13593_v48 = vand.u32 4294901760, %v10684_v23  ;;  %v13592_v49 = vand.u32 4294901760, %v10687_v27  ;;  %s13539_s13 = scalar_lea.sflag [#allocation4], %s150_s23 }
  0x40   : > { %13946 = vst [vmem:[#allocation11_spill] sm:$0xff] %v10720_v41  ;;  %8984 = vmatprep.subr.bf16.mxu1 %v10720_v41  ;;  %v10739_v50 = vpack.c.bf16 %v13596_v44, %v13597_v35  ;;  %v10741_v51 = vand.u32 4294901760, %v226_v47  ;;  %v10743_v52 = vsub.f32 %v202_v14, %v2389_v25  ;;  %v13591_v57 = vand.u32 4294901760, %v10698_v33  ;;  %v176_v44 = vld [vmem:[%s10681_s22 + $0x80] sm:$0xff]  ;;  %s10486_s3 = scalar_lea.vmem %s13531_s27, 32768  ;;  %p14335_p9 = scmp.ne.s32.totalorder %s13936_s19, 0 }
  0x41   : > { %v10749_v53 = vpack.c.bf16 %v13594_v46, %v13595_v45  ;;  %v749_v54 = vsub.f32 %v10684_v23, %v13593_v48  ;;  %v761_v55 = vsub.f32 %v10687_v27, %v13592_v49  ;;  %v13590_v58 = vand.u32 4294901760, %v10706_v38  ;;  %v175_v49 = vld [vmem:[%s10681_s22 + $0x78] sm:$0xff]  ;;  %p10487_p6 = scmp.ne.s32.totalorder %s13531_s27, %s10486_s3  ;;  %s10558_s4 = smov [#allocation5]  }
  0x42   : > { %13947 = vst [vmem:[#allocation12_spill] sm:$0xff] %v10739_v50  ;;  %8938 = vmatpush1.bf16.msra.mxu0 %v10739_v50  ;;  %v10759_v56 = vsub.f32 %v226_v47, %v10741_v51  ;;  %v13589_v59 = vand.u32 4294901760, %v10708_v39  ;;  %v13587_v62 = vand.u32 4294901760, %v10722_v42  ;;  %v13586_v63 = vand.u32 4294901760, %v10725_v43  ;;  %s10490_s5 = sshll.u32 %s10558_s4, 4  ;;  %s10491_s5 = int_to_ptr.vmem [resolvable:$false] %s10490_s5 }
  0x43   : > { %13948 = vst [vmem:[#allocation13_spill] sm:$0xff] %v10749_v53  ;;  %8986 = vmatpush1.bf16.msra.mxu1 %v10749_v53  ;;  %v750_v60 = vand.u32 4294901760, %v749_v54  ;;  %v762_v61 = vand.u32 4294901760, %v761_v55  ;;  %v2811_v2 = vsub.f32 %v10698_v33, %v13591_v57  ;;  %v2823_v3 = vsub.f32 %v10706_v38, %v13590_v58  ;;  %v164_v55 = vld [vmem:[%s10681_s22 + $0x20] sm:$0xff]  ;;  %p10488_p10 = pnand %p10487_p6, %p14335_p9  ;;  %s10492_s6 = scalar_lea.vmem %s10491_s5, 65536 }
  0x44   : > { %13949 = vst [vmem:[#allocation14_spill] sm:$0xff] %v10759_v56  ;;  %v10768_v1 = vand.u32 4294901760, %v10759_v56  ;;  %v755_v4 = vsub.f32 %v10708_v39, %v13589_v59  ;;  %v767_v7 = vsub.f32 %v10722_v42, %v13587_v62  ;;  %v2817_v8 = vsub.f32 %v10725_v43, %v13586_v63  ;;  %p10493_p2 = scmp.lt.s32.totalorder %s13531_s27, %s10491_s5  ;;  %p10494_p3 = scmp.lt.s32.totalorder %s10492_s6, %s10486_s3 }
  0x45   : > { %v8939_v6 = vpack.c.bf16 %v762_v61, %v750_v60  ;;  %v13588_v9 = vand.u32 4294901760, %v10743_v52  ;;  %v2812_v12 = vand.u32 4294901760, %v2811_v2  ;;  %v2824_v13 = vand.u32 4294901760, %v2823_v3  ;;  %v165_v60 = vld [vmem:[%s10681_s22 + $0x28] sm:$0xff]  ;;  %p10489_p12 = pneg %p10488_p10 }
  0x46   : > { %13950 = vst [vmem:[#allocation15_spill] sm:$0xff] %v10768_v1  ;;  %v397_v11 = vsub.f32 %v10759_v56, %v10768_v1  ;;  %v756_v14 = vand.u32 4294901760, %v755_v4  ;;  %v768_v25 = vand.u32 4294901760, %v767_v7  ;;  %v2818_v37 = vand.u32 4294901760, %v2817_v8  ;;  %p10495_p4 = por %p10494_p3, %p10493_p2 }
  0x47   : > { %8940 = vmatprep.subr.bf16.mxu0 %v8939_v6  ;;  %v2829_v47 = vsub.f32 %v10743_v52, %v13588_v9  ;;  %v229_v54 = vsel %vm224_vm0, %v161_v5, 0  ;;  %v8987_v63 = vpack.c.bf16 %v2824_v13, %v2812_v12  ;;  %v232_v2 = vsel %vm224_vm0, %v162_v10, 0  ;;  %v166_v12 = vld [vmem:[%s10681_s22 + $0x30] sm:$0xff] }
  0x48   : > { %v10797_v61 = vand.u32 4294901760, %v397_v11  ;;  %v10799_v62 = vand.u32 4294901760, %v229_v54  ;;  %v8941_v3 = vpack.c.bf16 %v768_v25, %v756_v14  ;;  %v10802_v6 = vand.u32 4294901760, %v232_v2  ;;  %p10496_p7 = pnand %p10495_p4, %p10489_p12 }
  0x49   : > { %v2830_v4 = vand.u32 4294901760, %v2829_v47  ;;  %v235_v7 = vsel %vm224_vm0, %v163_v24, 0  ;;  %v238_v11 = vsel %vm224_vm0, %v164_v55, 0  ;;  %v241_v10 = vsel %vm224_vm0, %v165_v60, 0  ;;  %8988 = vmatprep.subr.bf16.mxu1 %v8987_v63 }
  0x4a   : > { %13951 = vst [vmem:[#allocation16_spill] sm:$0xff] %v10797_v61  ;;  %399 = vmatmul.mubr.f32.vlgmr.msra.gmra.mrb[0].mxu0 %v10797_v61  ;;  %2461 = vmatmul.mubr.f32.vlgmr.msra.gmra.mrb[0].mxu1 %v10797_v61  ;;  %v10808_v5 = vsub.f32 %v229_v54, %v10799_v62  ;;  %v10810_v8 = vand.u32 4294901760, %v235_v7  ;;  %v10816_v14 = vsub.f32 %v232_v2, %v10802_v6  ;;  %v10818_v24 = vand.u32 4294901760, %v238_v11  ;;  %v167_v54 = vld [vmem:[%s10681_s22 + $0x38] sm:$0xff] }
  0x4b   : > { %8942 = vmatpush1.bf16.msra.mxu0 %v8941_v3  ;;  %v8989_v13 = vpack.c.bf16 %v2830_v4, %v2818_v37  ;;  %404 = vmatprep.mubr.f32.mxu0 %v13600_v0  ;;  %v10832_v37 = vand.u32 4294901760, %v241_v10  ;;  %v244_v55 = vsel %vm224_vm0, %v166_v12, 0  ;;  %v168_v12 = vld [vmem:[%s10681_s22 + $0x40] sm:$0xff]  ;;  %v13973_v61 = vmov 0.0  }
  0x4c   : > { %13952 = vst [vmem:[#allocation17_spill] sm:$0xff] %v10808_v5  ;;  %13953 = vst [vmem:[#allocation18_spill] sm:$0xff] %v10816_v14  ;;  %2466 = vmatprep.mubr.f32.mxu1 %v13600_v0  ;;  %v10823_v25 = vand.u32 4294901760, %v10808_v5  ;;  %v10826_v47 = vsub.f32 %v235_v7, %v10810_v8  ;;  %v10830_v63 = vand.u32 4294901760, %v10816_v14  ;;  %v10841_v3 = vsub.f32 %v238_v11, %v10818_v24 }
  0x4d   : > { %8990 = vmatpush1.bf16.msra.mxu1 %v8989_v13  ;;  %v247_v7 = vsel %vm224_vm0, %v167_v54, 0  ;;  %v10848_v9 = vand.u32 4294901760, %v244_v55  ;;  %v10852_v59 = vsub.f32 %v241_v10, %v10832_v37  ;;  %v250_v10 = vsel %vm224_vm0, %v168_v12, 0 }
  0x4e   : > { %13954 = vst [vmem:[#allocation19_spill] sm:$0xff] %v10823_v25  ;;  %13955 = vst [vmem:[#allocation20_spill] sm:$0xff] %v10826_v47  ;;  %v408_v60 = vsub.f32 %v10808_v5, %v10823_v25  ;;  %v10838_v2 = vand.u32 4294901760, %v10826_v47  ;;  %v419_v4 = vsub.f32 %v10816_v14, %v10830_v63  ;;  %v10861_v54 = vand.u32 4294901760, %v10841_v3 }
  0x4f   : > { %13956 = vst [vmem:[#allocation21_spill] sm:$0xff] %v10830_v63  ;;  %13958 = vst [vmem:[#allocation23_spill] sm:$0xff] %v10841_v3  ;;  %v10869_v57 = vsub.f32 %v244_v55, %v10848_v9  ;;  %v10884_v12 = vand.u32 4294901760, %v250_v10  ;;  %v169_v55 = vld [vmem:[%s10681_s22 + $0x48] sm:$0xff] }
  0x50   : > { %13957 = vst [vmem:[#allocation22_spill] sm:$0xff] %v10838_v2  ;;  %v10846_v13 = vand.u32 4294901760, %v408_v60  ;;  %13960 = vst [vmem:[#allocation25_spill] sm:$0xff] %v10852_v59  ;;  %v10856_v11 = vand.u32 4294901760, %v419_v4  ;;  %v430_v58 = vsub.f32 %v10826_v47, %v10838_v2  ;;  %v10863_v60 = vand.u32 4294901760, %v247_v7  ;;  %v173_v47 = vld [vmem:[%s10681_s22 + $0x68] sm:$0xff] }
  0x51   : > { %13962 = vst [vmem:[#allocation27_spill] sm:$0xff] %v10861_v54  ;;  %13963 = vst [vmem:[#allocation28_spill] sm:$0xff] %v10869_v57  ;;  %v10872_v4 = vand.u32 4294901760, %v10852_v59  ;;  %v441_v46 = vsub.f32 %v10841_v3, %v10861_v54  ;;  %v10891_v35 = vand.u32 4294901760, %v10869_v57  ;;  %v253_v29 = vsel %vm224_vm0, %v169_v55, 0  ;;  %v179_v3 = vld [vmem:[%s10681_s22 + $0x98] sm:$0xff] }
  0x52   : > { %13959 = vst [vmem:[#allocation24_spill] sm:$0xff] %v10846_v13  ;;  %410 = vmatmul.mubr.f32.gmra.mrb[2].mxu0 %v10846_v13  ;;  %2472 = vmatmul.mubr.f32.gmra.mrb[2].mxu1 %v10846_v13  ;;  %13961 = vst [vmem:[#allocation26_spill] sm:$0xff] %v10856_v11  ;;  %v10877_v48 = vand.u32 4294901760, %v430_v58  ;;  %v10882_v45 = vsub.f32 %v247_v7, %v10863_v60  ;;  %v10894_v58 = vsel %vm224_vm0, %v175_v49, 0  ;;  %v13971_v13 = vand.u32 4294901760, %v10666_v17 }
  0x53   : > { %415 = vmatprep.mubr.f32.mxu0 %v13600_v0  ;;  %2477 = vmatprep.mubr.f32.mxu1 %v13600_v0  ;;  %13964 = vst [vmem:[#allocation29_spill] sm:$0xff] %v10872_v4  ;;  %13967 = vst [vmem:[#allocation32_spill] sm:$0xff] %v10891_v35  ;;  %v10899_v7 = vsub.f32 %v10662_v15, %v329_v26  ;;  %v452_v30 = vsub.f32 %v10852_v59, %v10872_v4  ;;  %v171_v15 = vld [vmem:[%s10681_s22 + $0x58] sm:$0xff]  ;;  %v10917_v26 = vsel %vm224_vm0, %v176_v44, 0 }
  0x54   : > { %13965 = vst [vmem:[#allocation30_spill] sm:$0xff] %v10877_v48  ;;  %13966 = vst [vmem:[#allocation31_spill] sm:$0xff] %v10882_v45  ;;  %v10909_v28 = vand.u32 4294901760, %v10882_v45  ;;  %v10912_v49 = vsub.f32 %v250_v10, %v10884_v12  ;;  %v10922_v55 = vsub.f32 %v10666_v17, %v13971_v13  ;;  %v13974_v10 = vand.u32 4294901760, %v10670_v19 }
  0x55   : > { %v13975_v44 = vand.u32 4294901760, %v10676_v22  ;;  %v463_v17 = vsub.f32 %v10869_v57, %v10891_v35  ;;  %v10960_v35 = vand.u32 4294901760, %v452_v30  ;;  %v11049_v5 = vsel %vm224_vm0, %v179_v3, 0 }
  0x56   : > { %421 = vmatmul.mubr.f32.gmra.mrb[4].mxu0 %v10856_v11  ;;  %2483 = vmatmul.mubr.f32.gmra.mrb[4].mxu1 %v10856_v11  ;;  %13969 = vst [vmem:[#allocation34_spill] sm:$0xff] %v10909_v28  ;;  %13970 = vst [vmem:[#allocation35_spill] sm:$0xff] %v10912_v49  ;;  %v170_v11 = vld [vmem:[%s10681_s22 + $0x50] sm:$0xff]  ;;  %v10934_v4 = vsub.f32 %v10670_v19, %v13974_v10  ;;  %v259_v19 = vsel %vm224_vm0, %v171_v15, 0  ;;  %v13629_v10 = vand.u32 4294901760, %v10899_v7  ;;  %v13980_v15 = vand.u32 4294901760, %v10703_v36 }
  0x57   : > { %426 = vmatprep.mubr.f32.mxu0 %v13600_v0  ;;  %2488 = vmatprep.mubr.f32.mxu1 %v13600_v0  ;;  %v10906_v0 = vand.u32 4294901760, %v441_v46  ;;  %v10939_v54 = vsub.f32 %v10676_v22, %v13975_v44  ;;  %v256_v2 = vsel %vm224_vm0, %v170_v11, 0  ;;  %v13977_v22 = vand.u32 4294901760, %v10696_v32  ;;  %13978 = vst [vmem:[#allocation36_spill] sm:$0xff] %v10960_v35 }
  0x58   : > { %v10965_v11 = vand.u32 4294901760, %v10912_v49  ;;  %v773_v30 = vsub.f32 %v10899_v7, %v13629_v10  ;;  %v265_v41 = vsel %vm224_vm0, %v173_v47, 0 }
  0x59   : > { %13968 = vst [vmem:[#allocation33_spill] sm:$0xff] %v10906_v0  ;;  %v10956_v44 = vsub.f32 %v10696_v32, %v13977_v22  ;;  %v172_v32 = vld [vmem:[%s10681_s22 + $0x60] sm:$0xff]  ;;  %v13632_v22 = vand.u32 4294901760, %v10922_v55 }
  0x5a   : > { %432 = vmatmul.mubr.f32.gmra.mrb[6].mxu0 %v10877_v48  ;;  %2494 = vmatmul.mubr.f32.gmra.mrb[6].mxu1 %v10877_v48  ;;  %v13972_v48 = vand.u32 4294901760, %v10668_v18  ;;  %13979 = vst [vmem:[#allocation37_spill] sm:$0xff] %v10965_v11  ;;  %v774_v25 = vand.u32 4294901760, %v773_v30  ;;  %v11003_v30 = vsel %vm224_vm0, %v172_v32, 0 }
  0x5b   : > { %437 = vmatprep.mubr.f32.mxu0 %v13973_v61  ;;  %2499 = vmatprep.mubr.f32.mxu1 %v13973_v61  ;;  %v785_v1 = vsub.f32 %v10922_v55, %v13632_v22  ;;  %v13654_v22 = vand.u32 4294901760, %v10939_v54 }
  0x5c   : > { %v10927_v46 = vsub.f32 %v10668_v18, %v13972_v48  ;;  %v10943_v18 = vand.u32 4294901760, %v253_v29  ;;  %v13976_v48 = vand.u32 4294901760, %v10694_v31 }
  0x5d   : > { %v779_v32 = vsub.f32 %v10939_v54, %v13654_v22 }
  0x5e   : > { %v10948_v13 = vsub.f32 %v10694_v31, %v13976_v48  ;;  %443 = vmatmul.mubr.f32.gmra.mrb[8].mxu0 %v10906_v0  ;;  %2505 = vmatmul.mubr.f32.gmra.mrb[8].mxu1 %v10906_v0  ;;  %v474_v31 = vsub.f32 %v10882_v45, %v10909_v28  ;;  %v10970_v48 = vsub.f32 %v10703_v36, %v13980_v15  ;;  %v13633_v0 = vand.u32 4294901760, %v10927_v46 }
  0x5f   : > { %448 = vmatprep.mubr.f32.mxu0 %v13973_v61  ;;  %2510 = vmatprep.mubr.f32.mxu1 %v13973_v61  ;;  %v10980_v28 = vand.u32 4294901760, %v463_v17  ;;  %v10983_v63 = vsub.f32 %v253_v29, %v10943_v18  ;;  %v10985_v36 = vand.u32 4294901760, %v256_v2  ;;  %v10987_v15 = vand.u32 4294901760, %v259_v19 }
  0x60   : > { %v2835_v10 = vsub.f32 %v10927_v46, %v13633_v0  ;;  %v10998_v29 = vand.u32 4294901760, %v474_v31  ;;  %v485_v17 = vsub.f32 %v10912_v49, %v10965_v11  ;;  %v177_v0 = vld [vmem:[%s10681_s22 + $0x88] sm:$0xff]  ;;  %v786_v45 = vand.u32 4294901760, %v785_v1 }
  0x61   : > { %13981 = vst [vmem:[#allocation38_spill] sm:$0xff] %v10980_v28  ;;  %13982 = vst [vmem:[#allocation39_spill] sm:$0xff] %v10983_v63  ;;  %v13984_v31 = vand.u32 4294901760, %v10934_v4  ;;  %v13655_v59 = vand.u32 4294901760, %v10948_v13  ;;  %v11014_v11 = vand.u32 4294901760, %v10983_v63  ;;  %v13660_v49 = vand.u32 4294901760, %v10956_v44 }
  0x62   : > { %454 = vmatmul.mubr.f32.gmra.mrb[10].mxu0 %v10960_v35  ;;  %2516 = vmatmul.mubr.f32.gmra.mrb[10].mxu1 %v10960_v35  ;;  %13983 = vst [vmem:[#allocation40_spill] sm:$0xff] %v10998_v29  ;;  %v2836_v35 = vand.u32 4294901760, %v2835_v10  ;;  %v178_v10 = vld [vmem:[%s10681_s22 + $0x90] sm:$0xff]  ;;  %v8943_v14 = vpack.c.bf16 %v786_v45, %v774_v25  ;;  %v11028_v50 = vsel %vm224_vm0, %v177_v0, 0  ;;  %v11033_v22 = vsub.f32 %v256_v2, %v10985_v36  ;;  %v180_v0 = vld [vmem:[%s10681_s22 + $0xa0] sm:$0xff] }
  0x63   : > { %459 = vmatprep.mubr.f32.mxu0 %v13973_v61  ;;  %2521 = vmatprep.mubr.f32.mxu1 %v13973_v61  ;;  %v2847_v57 = vsub.f32 %v10934_v4, %v13984_v31  ;;  %13985 = vst [vmem:[#allocation41_spill] sm:$0xff] %v11014_v11  ;;  %v791_v53 = vsub.f32 %v10948_v13, %v13655_v59  ;;  %v780_v1 = vand.u32 4294901760, %v779_v32  ;;  %v181_v59 = vld [vmem:[%s10681_s22 + $0xa8] sm:$0xff]  ;;  %v11046_v32 = vsel %vm224_vm0, %v178_v10, 0 }
  0x64   : > { %13986 = vst [vmem:[#allocation42_spill] sm:$0xff] %v11033_v22  ;;  %v2841_v45 = vsub.f32 %v10956_v44, %v13660_v49  ;;  %v11052_v49 = vsub.f32 %v259_v19, %v10987_v15  ;;  %8944 = vmatprep.subr.bf16.mxu0 %v8943_v14  ;;  %v11061_v3 = vsel %vm224_vm0, %v180_v0, 0  ;;  %v11064_v19 = vsel %vm224_vm0, %v181_v59, 0  ;;  %v185_v0 = vld [vmem:[%s10681_s22 + $0xc8] sm:$0xff] }
  0x65   : > { %v2848_v31 = vand.u32 4294901760, %v2847_v57  ;;  %v13987_v57 = vand.u32 4294901760, %v10970_v48  ;;  %v792_v2 = vand.u32 4294901760, %v791_v53  ;;  %v11068_v14 = vand.u32 4294901760, %v485_v17 }
  0x66   : > { %465 = vmatmul.mubr.f32.gmra.mrb[12].mxu0 %v10980_v28  ;;  %2527 = vmatmul.mubr.f32.gmra.mrb[12].mxu1 %v10980_v28  ;;  %13988 = vst [vmem:[#allocation43_spill] sm:$0xff] %v11052_v49  ;;  %v496_v47 = vsub.f32 %v10983_v63, %v11014_v11  ;;  %v11073_v10 = vand.u32 4294901760, %v11033_v22  ;;  %v11080_v59 = vsel %vm224_vm0, %v182_v34, 0  ;;  %v11083_v17 = vsel %vm224_vm0, %v183_v21, 0  ;;  %v190_v11 = vld [vmem:[%s10681_s22 + $0xf0] sm:$0xff] }
  0x67   : > { %v2853_v25 = vsub.f32 %v10970_v48, %v13987_v57  ;;  %470 = vmatprep.mubr.f32.mxu0 %v13973_v61  ;;  %2532 = vmatprep.mubr.f32.mxu1 %v13973_v61  ;;  %v8991_v28 = vpack.c.bf16 %v2848_v31, %v2836_v35  ;;  %v2842_v57 = vand.u32 4294901760, %v2841_v45  ;;  %v11058_v35 = vand.u32 4294901760, %v11003_v30  ;;  %13989 = vst [vmem:[#allocation44_spill] sm:$0xff] %v11068_v14  ;;  %v184_v31 = vld [vmem:[%s10681_s22 + $0xc0] sm:$0xff] }
  0x68   : > { %v8945_v53 = vpack.c.bf16 %v792_v2, %v780_v1  ;;  %13990 = vst [vmem:[#allocation45_spill] sm:$0xff] %v11073_v10  ;;  %v11085_v45 = vand.u32 4294901760, %v265_v41  ;;  %v11094_v34 = vand.u32 4294901760, %v496_v47  ;;  %v507_v21 = vsub.f32 %v11033_v22, %v11073_v10  ;;  %v189_v10 = vld [vmem:[%s10681_s22 + $0xe8] sm:$0xff] }
  0x69   : > { %v2854_v40 = vand.u32 4294901760, %v2853_v25  ;;  %8992 = vmatprep.subr.bf16.mxu1 %v8991_v28  ;;  %v174_v28 = vld [vmem:[%s10681_s22 + $0x70] sm:$0xff]  ;;  %v11099_v2 = vand.u32 4294901760, %v11052_v49  ;;  %v11109_v47 = vsel %vm224_vm0, %v185_v0, 0  ;;  %v11160_v56 = vsel %vm224_vm0, %v190_v11, 0 }
  0x6a   : > { %476 = vmatmul.mubr.f32.gmra.mrb[14].mxu0 %v10998_v29  ;;  %2538 = vmatmul.mubr.f32.gmra.mrb[14].mxu1 %v10998_v29  ;;  %v268_v25 = vsel %vm224_vm0, %v174_v28, 0  ;;  %13991 = vst [vmem:[#allocation46_spill] sm:$0xff] %v11094_v34  ;;  %v11112_v28 = vsub.f32 %v265_v41, %v11085_v45 }
  0x6b   : > { %v8993_v1 = vpack.c.bf16 %v2854_v40, %v2842_v57  ;;  %481 = vmatprep.mubr.f32.mxu0 %v13973_v61  ;;  %2543 = vmatprep.mubr.f32.mxu1 %v13973_v61  ;;  %v11089_v40 = vsel %vm224_vm0, %v184_v31, 0  ;;  %13992 = vst [vmem:[#allocation47_spill] sm:$0xff] %v11099_v2  ;;  %v11103_v57 = vsub.f32 %v11003_v30, %v11058_v35  ;;  %v187_v31 = vld [vmem:[%s10681_s22 + $0xd8] sm:$0xff]  ;;  %v11120_v30 = vand.u32 4294901760, %v507_v21 }
  0x6c   : > { %8946 = vmatpush1.bf16.msra.mxu0 %v8945_v53  ;;  %v186_v53 = vld [vmem:[%s10681_s22 + $0xd0] sm:$0xff]  ;;  %13994 = vst [vmem:[#allocation49_spill] sm:$0xff] %v11112_v28  ;;  %v518_v29 = vsub.f32 %v11052_v49, %v11099_v2  ;;  %v11135_v22 = vsel %vm224_vm0, %v187_v31, 0  ;;  %v191_v49 = vld [vmem:[%s10681_s22 + $0xf8] sm:$0xff]  ;;  %v11157_v31 = vsel %vm224_vm0, %v189_v10, 0 }
  0x6d   : > { %8994 = vmatpush1.bf16.msra.mxu1 %v8993_v1  ;;  %13993 = vst [vmem:[#allocation48_spill] sm:$0xff] %v11103_v57  ;;  %v11114_v1 = vand.u32 4294901760, %v268_v25  ;;  %13995 = vst [vmem:[#allocation50_spill] sm:$0xff] %v11120_v30  ;;  %v11125_v0 = vand.u32 4294901760, %v11103_v57  ;;  %v11128_v41 = vsel %vm224_vm0, %v186_v53, 0  ;;  %v11147_v53 = vand.u32 4294901760, %v10894_v58 }
  0x6e   : > { %487 = vmatmul.mubr.f32.gmra.mrb[16].mxu0 %v11068_v14  ;;  %2549 = vmatmul.mubr.f32.gmra.mrb[16].mxu1 %v11068_v14  ;;  %v188_v14 = vld [vmem:[%s10681_s22 + $0xe0] sm:$0xff]  ;;  %v11152_v63 = vand.u32 4294901760, %v518_v29 }
  0x6f   : > { %492 = vmatprep.mubr.f32.mxu0 %v13973_v61  ;;  %2554 = vmatprep.mubr.f32.mxu1 %v13973_v61  ;;  %13996 = vst [vmem:[#allocation51_spill] sm:$0xff] %v11125_v0  ;;  %v11138_v21 = vsel %vm224_vm0, %v188_v14, 0  ;;  %v11144_v2 = vsub.f32 %v268_v25, %v11114_v1  ;;  %v529_v14 = vsub.f32 %v11103_v57, %v11125_v0  ;;  %v11165_v25 = vsel %vm224_vm0, %v191_v49, 0 }
  0x70   : > { %13999 = vst [vmem:[#allocation54_spill] sm:$0xff] %v11152_v63  ;;  %v11169_v29 = vsub.f32 %v10894_v58, %v11147_v53  ;;  %v8947_v49 = vpack.c.bf16 %v10687_v27, %v10684_v23  ;;  %v8995_v58 = vpack.c.bf16 %v10706_v38, %v10698_v33 }
  0x71   : > { %13998 = vst [vmem:[#allocation53_spill] sm:$0xff] %v11144_v2  ;;  %v11176_v11 = vand.u32 4294901760, %v529_v14  ;;  %v11181_v0 = vand.u32 4294901760, %v11144_v2  ;;  %v11207_v14 = vand.u32 4294901760, %v11028_v50 }
  0x72   : > { %498 = vmatmul.mubr.f32.gmra.mrb[18].mxu0 %v11094_v34  ;;  %2560 = vmatmul.mubr.f32.gmra.mrb[18].mxu1 %v11094_v34  ;;  %v11141_v34 = vand.u32 4294901760, %v11112_v28  ;;  %14000 = vst [vmem:[#allocation55_spill] sm:$0xff] %v11169_v29 }
  0x73   : > { %503 = vmatprep.mubr.f32.mxu0 %v13973_v61  ;;  %2565 = vmatprep.mubr.f32.mxu1 %v13973_v61  ;;  %14001 = vst [vmem:[#allocation56_spill] sm:$0xff] %v11176_v11  ;;  %14002 = vst [vmem:[#allocation57_spill] sm:$0xff] %v11181_v0 }
  0x74   : > { %13997 = vst [vmem:[#allocation52_spill] sm:$0xff] %v11141_v34  ;;  %v540_v10 = vsub.f32 %v11112_v28, %v11141_v34  ;;  %8948 = vmatprep.subr.bf16.mxu0 %v8947_v49  ;;  %v551_v49 = vsub.f32 %v11144_v2, %v11181_v0  ;;  %8996 = vmatprep.subr.bf16.mxu1 %v8995_v58  ;;  %v11212_v34 = vand.u32 4294901760, %v11046_v32 }
  0x75   : > { %v11225_v0 = vsub.f32 %v11028_v50, %v11207_v14 }
  0x76   : > { %509 = vmatmul.mubr.f32.gmra.mrb[20].mxu0 %v11120_v30  ;;  %2571 = vmatmul.mubr.f32.gmra.mrb[20].mxu1 %v11120_v30  ;;  %v11172_v30 = vand.u32 4294901760, %v10917_v26  ;;  %v11198_v28 = vand.u32 4294901760, %v540_v10  ;;  %v11216_v10 = vand.u32 4294901760, %v551_v49  ;;  %v11231_v58 = vsub.f32 %v11046_v32, %v11212_v34 }
  0x77   : > { %514 = vmatprep.mubr.f32.mxu0 %v13973_v61  ;;  %2576 = vmatprep.mubr.f32.mxu1 %v13973_v61  ;;  %14008 = vst [vmem:[#allocation63_spill] sm:$0xff] %v11225_v0  ;;  %v11234_v49 = vand.u32 4294901760, %v11049_v5 }
  0x78   : > { %14004 = vst [vmem:[#allocation59_spill] sm:$0xff] %v11198_v28  ;;  %v11204_v57 = vsub.f32 %v10917_v26, %v11172_v30  ;;  %14006 = vst [vmem:[#allocation61_spill] sm:$0xff] %v11216_v10  ;;  %v11248_v32 = vand.u32 4294901760, %v11231_v58 }
  0x79   : > { %14009 = vst [vmem:[#allocation64_spill] sm:$0xff] %v11231_v58 }
  0x7a   : > { %520 = vmatmul.mubr.f32.gmra.mrb[22].mxu0 %v11152_v63  ;;  %2582 = vmatmul.mubr.f32.gmra.mrb[22].mxu1 %v11152_v63  ;;  %v11192_v63 = vand.u32 4294901760, %v11169_v29  ;;  %14005 = vst [vmem:[#allocation60_spill] sm:$0xff] %v11204_v57  ;;  %14012 = vst [vmem:[#allocation67_spill] sm:$0xff] %v11248_v32 }
  0x7b   : > { %525 = vmatprep.mubr.f32.mxu0 %v13973_v61  ;;  %2587 = vmatprep.mubr.f32.mxu1 %v13973_v61 }
  0x7c   : > { %14003 = vst [vmem:[#allocation58_spill] sm:$0xff] %v11192_v63  ;;  %v562_v26 = vsub.f32 %v11169_v29, %v11192_v63  ;;  %v11243_v63 = vand.u32 4294901760, %v11225_v0  ;;  %v11252_v29 = vsub.f32 %v11049_v5, %v11234_v49  ;;  %v595_v5 = vsub.f32 %v11231_v58, %v11248_v32 }
  0x7e   : > { %531 = vmatmul.mubr.f32.gmra.mrb[24].mxu0 %v11176_v11  ;;  %2593 = vmatmul.mubr.f32.gmra.mrb[24].mxu1 %v11176_v11  ;;  %v11221_v11 = vand.u32 4294901760, %v11204_v57  ;;  %14011 = vst [vmem:[#allocation66_spill] sm:$0xff] %v11243_v63  ;;  %14013 = vst [vmem:[#allocation68_spill] sm:$0xff] %v11252_v29 }
  0x7f   : > { %536 = vmatprep.mubr.f32.mxu0 %v13973_v61  ;;  %2598 = vmatprep.mubr.f32.mxu1 %v13973_v61 }
  0x80   : > { %14007 = vst [vmem:[#allocation62_spill] sm:$0xff] %v11221_v11  ;;  %v573_v50 = vsub.f32 %v11204_v57, %v11221_v11  ;;  %v584_v11 = vsub.f32 %v11225_v0, %v11243_v63  ;;  %v11268_v57 = vand.u32 4294901760, %v11252_v29 }
  0x82   : > { %542 = vmatmul.mubr.f32.gmra.mrb[26].mxu0 %v11198_v28  ;;  %2604 = vmatmul.mubr.f32.gmra.mrb[26].mxu1 %v11198_v28  ;;  %v11238_v28 = vand.u32 4294901760, %v562_v26  ;;  %v11255_v26 = vand.u32 4294901760, %v11061_v3  ;;  %14015 = vst [vmem:[#allocation70_spill] sm:$0xff] %v11268_v57  ;;  %v606_v32 = vsub.f32 %v11252_v29, %v11268_v57 }
  0x83   : > { %547 = vmatprep.mubr.f32.mxu0 %v13973_v61  ;;  %2609 = vmatprep.mubr.f32.mxu1 %v13973_v61 }
  0x84   : > { %14010 = vst [vmem:[#allocation65_spill] sm:$0xff] %v11238_v28  ;;  %v11272_v2 = vsub.f32 %v11061_v3, %v11255_v26  ;;  %v11310_v3 = vand.u32 4294901760, %v11083_v17 }
  0x86   : > { %553 = vmatmul.mubr.f32.gmra.mrb[28].mxu0 %v11216_v10  ;;  %2615 = vmatmul.mubr.f32.gmra.mrb[28].mxu1 %v11216_v10  ;;  %v11259_v10 = vand.u32 4294901760, %v573_v50  ;;  %14016 = vst [vmem:[#allocation71_spill] sm:$0xff] %v11272_v2  ;;  %v11275_v50 = vand.u32 4294901760, %v11064_v19  ;;  %v11301_v58 = vand.u32 4294901760, %v11272_v2  ;;  %14022 = vst [vmem:[#allocation77_spill] sm:$0xff] %v11310_v3  ;;  %v11329_v29 = vsub.f32 %v11083_v17, %v11310_v3 }
  0x87   : > { %558 = vmatprep.mubr.f32.mxu0 %v13973_v61  ;;  %2620 = vmatprep.mubr.f32.mxu1 %v13973_v61 }
  0x88   : > { %14014 = vst [vmem:[#allocation69_spill] sm:$0xff] %v11259_v10  ;;  %14020 = vst [vmem:[#allocation75_spill] sm:$0xff] %v11301_v58  ;;  %v11305_v63 = vsub.f32 %v11064_v19, %v11275_v50  ;;  %v11346_v17 = vand.u32 4294901760, %v11329_v29 }
  0x89   : > { %14026 = vst [vmem:[#allocation81_spill] sm:$0xff] %v11329_v29 }
  0x8a   : > { %564 = vmatmul.mubr.f32.gmra.mrb[30].mxu0 %v11238_v28  ;;  %2626 = vmatmul.mubr.f32.gmra.mrb[30].mxu1 %v11238_v28  ;;  %v11279_v28 = vand.u32 4294901760, %v584_v11  ;;  %v11296_v11 = vand.u32 4294901760, %v595_v5  ;;  %14021 = vst [vmem:[#allocation76_spill] sm:$0xff] %v11305_v63  ;;  %v11314_v5 = vand.u32 4294901760, %v606_v32  ;;  %v11319_v57 = vand.u32 4294901760, %v11305_v63  ;;  %14030 = vst [vmem:[#allocation85_spill] sm:$0xff] %v11346_v17 }
  0x8b   : > { %569 = vmatprep.mubr.f32.mxu0 %v13973_v61  ;;  %2631 = vmatprep.mubr.f32.mxu1 %v13973_v61 }
  0x8c   : > { %14017 = vst [vmem:[#allocation72_spill] sm:$0xff] %v11279_v28  ;;  %14019 = vst [vmem:[#allocation74_spill] sm:$0xff] %v11296_v11 }
  0x8d   : > { %14023 = vst [vmem:[#allocation78_spill] sm:$0xff] %v11314_v5  ;;  %14024 = vst [vmem:[#allocation79_spill] sm:$0xff] %v11319_v57 }
  0x8e   : > { %575 = vmatmul.mubr.f32.gmra.mrb[32].mxu0 %v11259_v10  ;;  %2637 = vmatmul.mubr.f32.gmra.mrb[32].mxu1 %v11259_v10  ;;  %v11292_v10 = vand.u32 4294901760, %v11080_v59 }
  0x8f   : > { %580 = vmatprep.mubr.f32.mxu0 %v13973_v61  ;;  %2642 = vmatprep.mubr.f32.mxu1 %v13973_v61 }
  0x90   : > { %14018 = vst [vmem:[#allocation73_spill] sm:$0xff] %v11292_v10  ;;  %v11323_v19 = vsub.f32 %v11080_v59, %v11292_v10 }
  0x92   : > { %586 = vmatmul.mubr.f32.gmra.mrb[34].mxu0 %v11279_v28  ;;  %2648 = vmatmul.mubr.f32.gmra.mrb[34].mxu1 %v11279_v28  ;;  %v617_v28 = vsub.f32 %v11272_v2, %v11301_v58  ;;  %14025 = vst [vmem:[#allocation80_spill] sm:$0xff] %v11323_v19  ;;  %v11338_v59 = vand.u32 4294901760, %v11323_v19  ;;  %v11341_v58 = vand.u32 4294901760, %v11089_v40  ;;  %v650_v2 = vsub.f32 %v11329_v29, %v11346_v17 }
  0x93   : > { %591 = vmatprep.mubr.f32.mxu0 %v13973_v61  ;;  %2653 = vmatprep.mubr.f32.mxu1 %v13973_v61  ;;  %v11395_v29 = vand.u32 4294901760, %v11135_v22 }
  0x94   : > { %v11333_v32 = vand.u32 4294901760, %v617_v28  ;;  %14028 = vst [vmem:[#allocation83_spill] sm:$0xff] %v11338_v59  ;;  %14029 = vst [vmem:[#allocation84_spill] sm:$0xff] %v11341_v58  ;;  %v11381_v17 = vand.u32 4294901760, %v650_v2  ;;  %v11400_v2 = vand.u32 4294901760, %v11138_v21 }
  0x95   : > { %14041 = vst [vmem:[#allocation96_spill] sm:$0xff] %v11395_v29 }
  0x96   : > { %597 = vmatmul.mubr.f32.gmra.mrb[36].mxu0 %v11296_v11  ;;  %2659 = vmatmul.mubr.f32.gmra.mrb[36].mxu1 %v11296_v11  ;;  %14027 = vst [vmem:[#allocation82_spill] sm:$0xff] %v11333_v32  ;;  %v628_v11 = vsub.f32 %v11305_v63, %v11319_v57  ;;  %v11356_v57 = vsub.f32 %v11089_v40, %v11341_v58  ;;  %v11359_v63 = vand.u32 4294901760, %v11109_v47  ;;  %14038 = vst [vmem:[#allocation93_spill] sm:$0xff] %v11381_v17 }
  0x97   : > { %602 = vmatprep.mubr.f32.mxu0 %v13973_v61  ;;  %2664 = vmatprep.mubr.f32.mxu1 %v13973_v61  ;;  %14042 = vst [vmem:[#allocation97_spill] sm:$0xff] %v11400_v2 }
  0x98   : > { %v11350_v28 = vand.u32 4294901760, %v628_v11  ;;  %14032 = vst [vmem:[#allocation87_spill] sm:$0xff] %v11356_v57  ;;  %14033 = vst [vmem:[#allocation88_spill] sm:$0xff] %v11359_v63  ;;  %v11374_v40 = vsub.f32 %v11109_v47, %v11359_v63 }
  0x9a   : > { %608 = vmatmul.mubr.f32.gmra.mrb[38].mxu0 %v11314_v5  ;;  %2670 = vmatmul.mubr.f32.gmra.mrb[38].mxu1 %v11314_v5  ;;  %14031 = vst [vmem:[#allocation86_spill] sm:$0xff] %v11350_v28  ;;  %v639_v5 = vsub.f32 %v11323_v19, %v11338_v59  ;;  %14036 = vst [vmem:[#allocation91_spill] sm:$0xff] %v11374_v40  ;;  %v11377_v59 = vand.u32 4294901760, %v11128_v41  ;;  %v11418_v19 = vand.u32 4294901760, %v11157_v31 }
  0x9b   : > { %613 = vmatprep.mubr.f32.mxu0 %v13973_v61  ;;  %2675 = vmatprep.mubr.f32.mxu1 %v13973_v61 }
  0x9c   : > { %v11367_v11 = vand.u32 4294901760, %v639_v5  ;;  %14037 = vst [vmem:[#allocation92_spill] sm:$0xff] %v11377_v59  ;;  %v11392_v47 = vsub.f32 %v11128_v41, %v11377_v59  ;;  %14046 = vst [vmem:[#allocation101_spill] sm:$0xff] %v11418_v19 }
  0x9e   : > { %619 = vmatmul.mubr.f32.gmra.mrb[40].mxu0 %v11333_v32  ;;  %2681 = vmatmul.mubr.f32.gmra.mrb[40].mxu1 %v11333_v32  ;;  %14034 = vst [vmem:[#allocation89_spill] sm:$0xff] %v11367_v11  ;;  %v11370_v32 = vand.u32 4294901760, %v11356_v57  ;;  %14040 = vst [vmem:[#allocation95_spill] sm:$0xff] %v11392_v47 }
  0x9f   : > { %624 = vmatprep.mubr.f32.mxu0 %v13973_v61  ;;  %2686 = vmatprep.mubr.f32.mxu1 %v13973_v61 }
  0xa0   : > { %14035 = vst [vmem:[#allocation90_spill] sm:$0xff] %v11370_v32  ;;  %v661_v5 = vsub.f32 %v11356_v57, %v11370_v32  ;;  %v11409_v32 = vand.u32 4294901760, %v11392_v47  ;;  %v11413_v57 = vsub.f32 %v11135_v22, %v11395_v29  ;;  %v11431_v22 = vsub.f32 %v11138_v21, %v11400_v2 }
  0xa1   : > { %v11449_v21 = vsub.f32 %v11157_v31, %v11418_v19 }
  0xa2   : > { %630 = vmatmul.mubr.f32.gmra.mrb[42].mxu0 %v11350_v28  ;;  %2692 = vmatmul.mubr.f32.gmra.mrb[42].mxu1 %v11350_v28  ;;  %v11388_v28 = vand.u32 4294901760, %v11374_v40  ;;  %14044 = vst [vmem:[#allocation99_spill] sm:$0xff] %v11409_v32  ;;  %14045 = vst [vmem:[#allocation100_spill] sm:$0xff] %v11413_v57 }
  0xa3   : > { %635 = vmatprep.mubr.f32.mxu0 %v13973_v61  ;;  %2697 = vmatprep.mubr.f32.mxu1 %v13973_v61  ;;  %14049 = vst [vmem:[#allocation104_spill] sm:$0xff] %v11431_v22  ;;  %14053 = vst [vmem:[#allocation108_spill] sm:$0xff] %v11449_v21 }
  0xa4   : > { %14039 = vst [vmem:[#allocation94_spill] sm:$0xff] %v11388_v28  ;;  %v672_v41 = vsub.f32 %v11374_v40, %v11388_v28  ;;  %v11427_v28 = vand.u32 4294901760, %v11413_v57  ;;  %v11436_v40 = vand.u32 4294901760, %v11160_v56 }
  0xa6   : > { %641 = vmatmul.mubr.f32.gmra.mrb[44].mxu0 %v11367_v11  ;;  %2703 = vmatmul.mubr.f32.gmra.mrb[44].mxu1 %v11367_v11  ;;  %v11404_v11 = vand.u32 4294901760, %v661_v5  ;;  %v11422_v5 = vand.u32 4294901760, %v672_v41  ;;  %14048 = vst [vmem:[#allocation103_spill] sm:$0xff] %v11427_v28  ;;  %14050 = vst [vmem:[#allocation105_spill] sm:$0xff] %v11436_v40  ;;  %v11467_v31 = vsub.f32 %v11160_v56, %v11436_v40 }
  0xa7   : > { %646 = vmatprep.mubr.f32.mxu0 %v13973_v61  ;;  %2708 = vmatprep.mubr.f32.mxu1 %v13973_v61 }
  0xa8   : > { %14043 = vst [vmem:[#allocation98_spill] sm:$0xff] %v11404_v11  ;;  %14047 = vst [vmem:[#allocation102_spill] sm:$0xff] %v11422_v5 }
  0xa9   : > { %14057 = vst [vmem:[#allocation112_spill] sm:$0xff] %v11467_v31 }
  0xaa   : > { %652 = vmatmul.mubr.f32.gmra.mrb[46].mxu0 %v11381_v17  ;;  %2714 = vmatmul.mubr.f32.gmra.mrb[46].mxu1 %v11381_v17  ;;  %v683_v17 = vsub.f32 %v11392_v47, %v11409_v32  ;;  %v11445_v32 = vand.u32 4294901760, %v11431_v22  ;;  %v11454_v47 = vand.u32 4294901760, %v11165_v25 }
  0xab   : > { %657 = vmatprep.mubr.f32.mxu0 %v13973_v61  ;;  %2719 = vmatprep.mubr.f32.mxu1 %v13973_v61 }
  0xac   : > { %v11440_v41 = vand.u32 4294901760, %v683_v17  ;;  %14052 = vst [vmem:[#allocation107_spill] sm:$0xff] %v11445_v32  ;;  %14054 = vst [vmem:[#allocation109_spill] sm:$0xff] %v11454_v47  ;;  %v11482_v56 = vsub.f32 %v11165_v25, %v11454_v47 }
  0xae   : > { %663 = vmatmul.mubr.f32.gmra.mrb[48].mxu0 %v11404_v11  ;;  %2725 = vmatmul.mubr.f32.gmra.mrb[48].mxu1 %v11404_v11  ;;  %14051 = vst [vmem:[#allocation106_spill] sm:$0xff] %v11440_v41  ;;  %v694_v11 = vsub.f32 %v11413_v57, %v11427_v28  ;;  %v11463_v28 = vand.u32 4294901760, %v11449_v21  ;;  %14060 = vst [vmem:[#allocation115_spill] sm:$0xff] %v11482_v56 }
  0xaf   : > { %668 = vmatprep.mubr.f32.mxu0 %v13973_v61  ;;  %2730 = vmatprep.mubr.f32.mxu1 %v13973_v61 }
  0xb0   : > { %v11458_v17 = vand.u32 4294901760, %v694_v11  ;;  %14056 = vst [vmem:[#allocation111_spill] sm:$0xff] %v11463_v28 }
  0xb2   : > { %674 = vmatmul.mubr.f32.gmra.mrb[50].mxu0 %v11422_v5  ;;  %2736 = vmatmul.mubr.f32.gmra.mrb[50].mxu1 %v11422_v5  ;;  %14055 = vst [vmem:[#allocation110_spill] sm:$0xff] %v11458_v17  ;;  %v705_v5 = vsub.f32 %v11431_v22, %v11445_v32  ;;  %v11478_v32 = vand.u32 4294901760, %v11467_v31 }
  0xb3   : > { %679 = vmatprep.mubr.f32.mxu0 %v13973_v61  ;;  %2741 = vmatprep.mubr.f32.mxu1 %v13973_v61 }
  0xb4   : > { %v11473_v11 = vand.u32 4294901760, %v705_v5  ;;  %14059 = vst [vmem:[#allocation114_spill] sm:$0xff] %v11478_v32 }
  0xb6   : > { %685 = vmatmul.mubr.f32.gmra.mrb[52].mxu0 %v11440_v41  ;;  %2747 = vmatmul.mubr.f32.gmra.mrb[52].mxu1 %v11440_v41  ;;  %14058 = vst [vmem:[#allocation113_spill] sm:$0xff] %v11473_v11  ;;  %v716_v41 = vsub.f32 %v11449_v21, %v11463_v28  ;;  %v11493_v28 = vand.u32 4294901760, %v11482_v56 }
  0xb7   : > { %690 = vmatprep.mubr.f32.mxu0 %v13973_v61  ;;  %2752 = vmatprep.mubr.f32.mxu1 %v13973_v61 }
  0xb8   : > { %v11488_v5 = vand.u32 4294901760, %v716_v41  ;;  %14062 = vst [vmem:[#allocation117_spill] sm:$0xff] %v11493_v28  ;;  %v738_v41 = vsub.f32 %v11482_v56, %v11493_v28 }
  0xba   : > { %696 = vmatmul.mubr.f32.gmra.mrb[54].mxu0 %v11458_v17  ;;  %2758 = vmatmul.mubr.f32.gmra.mrb[54].mxu1 %v11458_v17  ;;  %14061 = vst [vmem:[#allocation116_spill] sm:$0xff] %v11488_v5  ;;  %v727_v17 = vsub.f32 %v11467_v31, %v11478_v32 }
  0xbb   : > { %701 = vmatprep.mubr.f32.mxu0 %v13973_v61  ;;  %2763 = vmatprep.mubr.f32.mxu1 %v13973_v61 }
  0xbc   : > { %v11499_v25 = vand.u32 4294901760, %v727_v17  ;;  %v14065_v17 = vpack.c.bf16 %v10722_v42, %v10708_v39 }
  0xbe   : > { %707 = vmatmul.mubr.f32.gmra.mrb[56].mxu0 %v11473_v11  ;;  %2769 = vmatmul.mubr.f32.gmra.mrb[56].mxu1 %v11473_v11  ;;  %14063 = vst [vmem:[#allocation118_spill] sm:$0xff] %v11499_v25  ;;  %v11507_v11 = vand.u32 4294901760, %v738_v41  ;;  %v14066_v41 = vpack.c.bf16 %v10743_v52, %v10725_v43 }
  0xbf   : > { %712 = vmatprep.mubr.f32.mxu0 %v13973_v61  ;;  %2774 = vmatprep.mubr.f32.mxu1 %v13973_v61 }
  0xc0   : > { %14064 = vst [vmem:[#allocation119_spill] sm:$0xff] %v11507_v11 }
  0xc2   : > { %718 = vmatmul.mubr.f32.gmra.mrb[58].mxu0 %v11488_v5  ;;  %2780 = vmatmul.mubr.f32.gmra.mrb[58].mxu1 %v11488_v5  ;;  %v14075_v5 = vld [vmem:[#allocation11_spill] sm:$0xff] }
  0xc3   : > { %723 = vmatprep.mubr.f32.mxu0 %v13973_v61  ;;  %2785 = vmatprep.mubr.f32.mxu1 %v13973_v61 }
  0xc6   : > { %729 = vmatmul.mubr.f32.gmra.mrb[60].mxu0 %v11499_v25  ;;  %2791 = vmatmul.mubr.f32.gmra.mrb[60].mxu1 %v11499_v25  ;;  %v14068_v25 = vpack.c.bf16 %v10934_v4, %v10927_v46 }
  0xc7   : > { %734 = vmatprep.mubr.f32.mxu0 %v13973_v61  ;;  %2796 = vmatprep.mubr.f32.mxu1 %v13973_v61 }
  0xca   : > { %740 = vmatmul.mubr.f32.gmra.mrb[62].mxu0 %v11507_v11  ;;  %2802 = vmatmul.mubr.f32.gmra.mrb[62].mxu1 %v11507_v11  ;;  %v14067_v11 = vpack.c.bf16 %v10922_v55, %v10899_v7 }
  0xcb   : > { %850 = vmatprep.mubr.f32.mxu0 %v13973_v61  ;;  %2912 = vmatprep.mubr.f32.mxu1 %v13973_v61 }
  0xce   : > { %852 = vmatmul.mubr.f32.vlgmr.msra.gmra.mrb[0].mxu0 %v10741_v51  ;;  %2914 = vmatmul.mubr.f32.vlgmr.msra.gmra.mrb[0].mxu1 %v10741_v51 }
  0xcf   : > { %8950 = vmatpush1.bf16.msra.mxu0 %v14065_v17  ;;  %8998 = vmatpush1.bf16.msra.mxu1 %v14066_v41  ;;  %v14069_v17 = vpack.c.bf16 %v10948_v13, %v10939_v54  ;;  %v14070_v41 = vpack.c.bf16 %v10970_v48, %v10956_v44 }
  0xd0   : > { %857 = vmatprep.mubr.f32.mxu0 %v13973_v61  ;;  %2919 = vmatprep.mubr.f32.mxu1 %v13973_v61 }
  0xd1   : > { %8952 = vmatprep.subr.bf16.mxu0 %v14067_v11  ;;  %9000 = vmatprep.subr.bf16.mxu1 %v14068_v25  ;;  %v14071_v11 = vld [vmem:[#allocation14_spill] sm:$0xff]  ;;  %v14072_v25 = vld [vmem:[#allocation8_spill] sm:$0xff] }
  0xd2   : > { %859 = vmatmul.mubr.f32.gmra.mrb[2].mxu0 %v10799_v62  ;;  %2921 = vmatmul.mubr.f32.gmra.mrb[2].mxu1 %v10799_v62 }
  0xd3   : > { %864 = vmatprep.mubr.f32.mxu0 %v13973_v61  ;;  %2926 = vmatprep.mubr.f32.mxu1 %v13973_v61 }
  0xd4   : > { %8954 = vmatpush1.bf16.msra.mxu0 %v14069_v17  ;;  %9002 = vmatpush1.bf16.msra.mxu1 %v14070_v41  ;;  %v14073_v17 = vld [vmem:[#allocation9_spill] sm:$0xff]  ;;  %v14074_v41 = vld [vmem:[#allocation10_spill] sm:$0xff] }
  0xd5   : > { %8956 = vmatprep.subr.bf16.mxu0 %v10664_v16  ;;  %9004 = vmatprep.subr.bf16.mxu1 %v10672_v20 }
  0xd6   : > { %866 = vmatmul.mubr.f32.gmra.mrb[4].mxu0 %v10802_v6  ;;  %2928 = vmatmul.mubr.f32.gmra.mrb[4].mxu1 %v10802_v6 }
  0xd7   : > { %871 = vmatprep.mubr.f32.mxu0 %v13973_v61  ;;  %2933 = vmatprep.mubr.f32.mxu1 %v13973_v61 }
  0xda   : > { %873 = vmatmul.mubr.f32.gmra.mrb[6].mxu0 %v10810_v8  ;;  %2935 = vmatmul.mubr.f32.gmra.mrb[6].mxu1 %v10810_v8 }
  0xdb   : > { %878 = vmatprep.mubr.f32.mxu0 %v13973_v61  ;;  %2940 = vmatprep.mubr.f32.mxu1 %v13973_v61 }
  0xde   : > { %880 = vmatmul.mubr.f32.gmra.mrb[8].mxu0 %v10818_v24  ;;  %2942 = vmatmul.mubr.f32.gmra.mrb[8].mxu1 %v10818_v24 }
  0xdf   : > { %885 = vmatprep.mubr.f32.mxu0 %v13973_v61  ;;  %2947 = vmatprep.mubr.f32.mxu1 %v13973_v61 }
  0xe2   : > { %887 = vmatmul.mubr.f32.gmra.mrb[10].mxu0 %v10832_v37  ;;  %2949 = vmatmul.mubr.f32.gmra.mrb[10].mxu1 %v10832_v37 }
  0xe3   : > { %892 = vmatprep.mubr.f32.mxu0 %v13973_v61  ;;  %2954 = vmatprep.mubr.f32.mxu1 %v13973_v61 }
  0xe6   : > { %894 = vmatmul.mubr.f32.gmra.mrb[12].mxu0 %v10848_v9  ;;  %2956 = vmatmul.mubr.f32.gmra.mrb[12].mxu1 %v10848_v9 }
  0xe7   : > { %899 = vmatprep.mubr.f32.mxu0 %v13973_v61  ;;  %2961 = vmatprep.mubr.f32.mxu1 %v13973_v61 }
  0xea   : > { %901 = vmatmul.mubr.f32.gmra.mrb[14].mxu0 %v10863_v60  ;;  %2963 = vmatmul.mubr.f32.gmra.mrb[14].mxu1 %v10863_v60 }
  0xeb   : > { %906 = vmatprep.mubr.f32.mxu0 %v13973_v61  ;;  %2968 = vmatprep.mubr.f32.mxu1 %v13973_v61 }
  0xee   : > { %908 = vmatmul.mubr.f32.gmra.mrb[16].mxu0 %v10884_v12  ;;  %2970 = vmatmul.mubr.f32.gmra.mrb[16].mxu1 %v10884_v12 }
  0xef   : > { %913 = vmatprep.mubr.f32.mxu0 %v13973_v61  ;;  %2975 = vmatprep.mubr.f32.mxu1 %v13973_v61 }
  0xf2   : > { %915 = vmatmul.mubr.f32.gmra.mrb[18].mxu0 %v10943_v18  ;;  %2977 = vmatmul.mubr.f32.gmra.mrb[18].mxu1 %v10943_v18 }
  0xf3   : > { %920 = vmatprep.mubr.f32.mxu0 %v13973_v61  ;;  %2982 = vmatprep.mubr.f32.mxu1 %v13973_v61 }
  0xf6   : > { %922 = vmatmul.mubr.f32.gmra.mrb[20].mxu0 %v10985_v36  ;;  %2984 = vmatmul.mubr.f32.gmra.mrb[20].mxu1 %v10985_v36 }
  0xf7   : > { %927 = vmatprep.mubr.f32.mxu0 %v13973_v61  ;;  %2989 = vmatprep.mubr.f32.mxu1 %v13973_v61 }
  0xfa   : > { %929 = vmatmul.mubr.f32.gmra.mrb[22].mxu0 %v10987_v15  ;;  %2991 = vmatmul.mubr.f32.gmra.mrb[22].mxu1 %v10987_v15 }
  0xfb   : > { %934 = vmatprep.mubr.f32.mxu0 %v13973_v61  ;;  %2996 = vmatprep.mubr.f32.mxu1 %v13973_v61 }
  0xfe   : > { %936 = vmatmul.mubr.f32.gmra.mrb[24].mxu0 %v11058_v35  ;;  %2998 = vmatmul.mubr.f32.gmra.mrb[24].mxu1 %v11058_v35 }
  0xff   : > { %941 = vmatprep.mubr.f32.mxu0 %v13973_v61  ;;  %3003 = vmatprep.mubr.f32.mxu1 %v13973_v61 }
 0x102   : > { %943 = vmatmul.mubr.f32.gmra.mrb[26].mxu0 %v11085_v45  ;;  %3005 = vmatmul.mubr.f32.gmra.mrb[26].mxu1 %v11085_v45 }
 0x103   : > { %948 = vmatprep.mubr.f32.mxu0 %v13973_v61  ;;  %3010 = vmatprep.mubr.f32.mxu1 %v13973_v61 }
 0x106   : > { %950 = vmatmul.mubr.f32.gmra.mrb[28].mxu0 %v11114_v1  ;;  %3012 = vmatmul.mubr.f32.gmra.mrb[28].mxu1 %v11114_v1 }
 0x107   : > { %955 = vmatprep.mubr.f32.mxu0 %v13973_v61  ;;  %3017 = vmatprep.mubr.f32.mxu1 %v13973_v61 }
 0x10a   : > { %957 = vmatmul.mubr.f32.gmra.mrb[30].mxu0 %v11147_v53  ;;  %3019 = vmatmul.mubr.f32.gmra.mrb[30].mxu1 %v11147_v53 }
 0x10b   : > { %962 = vmatprep.mubr.f32.mxu0 %v13973_v61  ;;  %3024 = vmatprep.mubr.f32.mxu1 %v13973_v61 }
 0x10e   : > { %964 = vmatmul.mubr.f32.gmra.mrb[32].mxu0 %v11172_v30  ;;  %3026 = vmatmul.mubr.f32.gmra.mrb[32].mxu1 %v11172_v30 }
 0x10f   : > { %969 = vmatprep.mubr.f32.mxu0 %v13973_v61  ;;  %3031 = vmatprep.mubr.f32.mxu1 %v13973_v61 }
 0x112   : > { %971 = vmatmul.mubr.f32.gmra.mrb[34].mxu0 %v11207_v14  ;;  %3033 = vmatmul.mubr.f32.gmra.mrb[34].mxu1 %v11207_v14 }
 0x113   : > { %976 = vmatprep.mubr.f32.mxu0 %v13973_v61  ;;  %3038 = vmatprep.mubr.f32.mxu1 %v13973_v61 }
 0x116   : > { %978 = vmatmul.mubr.f32.gmra.mrb[36].mxu0 %v11212_v34  ;;  %3040 = vmatmul.mubr.f32.gmra.mrb[36].mxu1 %v11212_v34 }
 0x117   : > { %983 = vmatprep.mubr.f32.mxu0 %v13973_v61  ;;  %3045 = vmatprep.mubr.f32.mxu1 %v13973_v61 }
 0x11a   : > { %985 = vmatmul.mubr.f32.gmra.mrb[38].mxu0 %v11234_v49  ;;  %3047 = vmatmul.mubr.f32.gmra.mrb[38].mxu1 %v11234_v49 }
 0x11b   : > { %990 = vmatprep.mubr.f32.mxu0 %v13973_v61  ;;  %3052 = vmatprep.mubr.f32.mxu1 %v13973_v61 }
 0x11e   : > { %992 = vmatmul.mubr.f32.gmra.mrb[40].mxu0 %v11255_v26  ;;  %3054 = vmatmul.mubr.f32.gmra.mrb[40].mxu1 %v11255_v26 }
 0x11f   : > { %997 = vmatprep.mubr.f32.mxu0 %v13973_v61  ;;  %3059 = vmatprep.mubr.f32.mxu1 %v13973_v61 }
 0x122   : > { %999 = vmatmul.mubr.f32.gmra.mrb[42].mxu0 %v11275_v50  ;;  %3061 = vmatmul.mubr.f32.gmra.mrb[42].mxu1 %v11275_v50 }
 0x123   : > { %1004 = vmatprep.mubr.f32.mxu0 %v13973_v61  ;;  %3066 = vmatprep.mubr.f32.mxu1 %v13973_v61 }
 0x126   : > { %1006 = vmatmul.mubr.f32.gmra.mrb[44].mxu0 %v11292_v10  ;;  %3068 = vmatmul.mubr.f32.gmra.mrb[44].mxu1 %v11292_v10 }
 0x127   : > { %1011 = vmatprep.mubr.f32.mxu0 %v13973_v61  ;;  %3073 = vmatprep.mubr.f32.mxu1 %v13973_v61 }
 0x12a   : > { %1013 = vmatmul.mubr.f32.gmra.mrb[46].mxu0 %v11310_v3  ;;  %3075 = vmatmul.mubr.f32.gmra.mrb[46].mxu1 %v11310_v3 }
 0x12b   : > { %1018 = vmatprep.mubr.f32.mxu0 %v13973_v61  ;;  %3080 = vmatprep.mubr.f32.mxu1 %v13973_v61 }
 0x12e   : > { %1020 = vmatmul.mubr.f32.gmra.mrb[48].mxu0 %v11341_v58  ;;  %3082 = vmatmul.mubr.f32.gmra.mrb[48].mxu1 %v11341_v58  ;;  %v14082_v58 = vld [vmem:[#allocation13_spill] sm:$0xff] }
 0x12f   : > { %1025 = vmatprep.mubr.f32.mxu0 %v13973_v61  ;;  %3087 = vmatprep.mubr.f32.mxu1 %v13973_v61 }
 0x132   : > { %1027 = vmatmul.mubr.f32.gmra.mrb[50].mxu0 %v11359_v63  ;;  %3089 = vmatmul.mubr.f32.gmra.mrb[50].mxu1 %v11359_v63  ;;  %v14081_v63 = vld [vmem:[#allocation12_spill] sm:$0xff] }
 0x133   : > { %1032 = vmatprep.mubr.f32.mxu0 %v13973_v61  ;;  %3094 = vmatprep.mubr.f32.mxu1 %v13973_v61 }
 0x136   : > { %1034 = vmatmul.mubr.f32.gmra.mrb[52].mxu0 %v11377_v59  ;;  %3096 = vmatmul.mubr.f32.gmra.mrb[52].mxu1 %v11377_v59  ;;  %v14080_v59 = vld [vmem:[#allocation17_spill] sm:$0xff] }
 0x137   : > { %1039 = vmatprep.mubr.f32.mxu0 %v13973_v61  ;;  %3101 = vmatprep.mubr.f32.mxu1 %v13973_v61 }
 0x13a   : > { %1041 = vmatmul.mubr.f32.gmra.mrb[54].mxu0 %v11395_v29  ;;  %3103 = vmatmul.mubr.f32.gmra.mrb[54].mxu1 %v11395_v29 }
 0x13b   : > { %1046 = vmatprep.mubr.f32.mxu0 %v13973_v61  ;;  %3108 = vmatprep.mubr.f32.mxu1 %v13973_v61 }
 0x13e   : > { %1048 = vmatmul.mubr.f32.gmra.mrb[56].mxu0 %v11400_v2  ;;  %3110 = vmatmul.mubr.f32.gmra.mrb[56].mxu1 %v11400_v2  ;;  %v14078_v2 = vand.u32 4294901760, %v10698_v33  ;;  %v14085_v33 = vld [vmem:[#allocation23_spill] sm:$0xff] }
 0x13f   : > { %1053 = vmatprep.mubr.f32.mxu0 %v13973_v61  ;;  %3115 = vmatprep.mubr.f32.mxu1 %v13973_v61 }
 0x142   : > { %1055 = vmatmul.mubr.f32.gmra.mrb[58].mxu0 %v11418_v19  ;;  %3117 = vmatmul.mubr.f32.gmra.mrb[58].mxu1 %v11418_v19 }
 0x143   : > { %1060 = vmatprep.mubr.f32.mxu0 %v13973_v61  ;;  %3122 = vmatprep.mubr.f32.mxu1 %v13973_v61 }
 0x146   : > { %1062 = vmatmul.mubr.f32.gmra.mrb[60].mxu0 %v11436_v40  ;;  %3124 = vmatmul.mubr.f32.gmra.mrb[60].mxu1 %v11436_v40  ;;  %v14077_v40 = vand.u32 4294901760, %v10687_v27  ;;  %v14084_v27 = vld [vmem:[#allocation20_spill] sm:$0xff] }
 0x147   : > { %1067 = vmatprep.mubr.f32.mxu0 %v13973_v61  ;;  %3129 = vmatprep.mubr.f32.mxu1 %v13973_v61 }
 0x14a   : > { %1069 = vmatmul.mubr.f32.gmra.mrb[62].mxu0 %v11454_v47  ;;  %3131 = vmatmul.mubr.f32.gmra.mrb[62].mxu1 %v11454_v47  ;;  %v14076_v47 = vand.u32 4294901760, %v10684_v23  ;;  %v14083_v23 = vld [vmem:[#allocation18_spill] sm:$0xff] }
 0x14b   : > { %1155 = vmatprep.mubr.f32.mxu0 %v13973_v61  ;;  %3217 = vmatprep.mubr.f32.mxu1 %v13973_v61 }
 0x14c   : > { %v8963_v19 = vpack.c.bf16 %v14077_v40, %v14076_v47  ;;  %v14089_v40 = vld [vmem:[#allocation35_spill] sm:$0xff] }
 0x14d   : > { %v14090_v47 = vld [vmem:[#allocation39_spill] sm:$0xff] }
 0x14e   : > { %1158 = vmatmul.mubr.f32.vlgmr.msra.gmra.mrb[0].mxu0 %v14071_v11  ;;  %3220 = vmatmul.mubr.f32.vlgmr.msra.gmra.mrb[0].mxu1 %v14071_v11  ;;  %v14079_v11 = vand.u32 4294901760, %v10706_v38  ;;  %v14086_v38 = vld [vmem:[#allocation25_spill] sm:$0xff] }
 0x14f   : > { %8958 = vmatpush1.bf16.msra.mxu0 %v14072_v25  ;;  %9006 = vmatpush1.bf16.msra.mxu1 %v14073_v17 }
 0x150   : > { %1163 = vmatprep.mubr.f32.mxu0 %v13973_v61  ;;  %3225 = vmatprep.mubr.f32.mxu1 %v13973_v61  ;;  %v9011_v29 = vpack.c.bf16 %v14079_v11, %v14078_v2  ;;  %v14091_v2 = vld [vmem:[#allocation42_spill] sm:$0xff]  ;;  %v14092_v11 = vld [vmem:[#allocation43_spill] sm:$0xff] }
 0x151   : > { %8960 = vmatprep.subr.bf16.mxu0 %v14074_v41  ;;  %9008 = vmatprep.subr.bf16.mxu1 %v14075_v5 }
 0x152   : > { %1166 = vmatmul.mubr.f32.gmra.mrb[2].mxu0 %v14080_v59  ;;  %3228 = vmatmul.mubr.f32.gmra.mrb[2].mxu1 %v14080_v59 }
 0x153   : > { %1171 = vmatprep.mubr.f32.mxu0 %v13973_v61  ;;  %3233 = vmatprep.mubr.f32.mxu1 %v13973_v61 }
 0x154   : > { %8962 = vmatpush1.bf16.msra.mxu0 %v14081_v63  ;;  %9010 = vmatpush1.bf16.msra.mxu1 %v14082_v58 }
 0x155   : > { %8964 = vmatprep.subr.bf16.mxu0 %v8963_v19  ;;  %9012 = vmatprep.subr.bf16.mxu1 %v9011_v29  ;;  %v14087_v29 = vld [vmem:[#allocation28_spill] sm:$0xff]  ;;  %v14088_v19 = vld [vmem:[#allocation31_spill] sm:$0xff] }
 0x156   : > { %1174 = vmatmul.mubr.f32.gmra.mrb[4].mxu0 %v14083_v23  ;;  %3236 = vmatmul.mubr.f32.gmra.mrb[4].mxu1 %v14083_v23  ;;  %v14169_v23 = vld [vmem:[#allocation109_spill] sm:$0xff] }
 0x157   : > { %1179 = vmatprep.mubr.f32.mxu0 %v13973_v61  ;;  %3241 = vmatprep.mubr.f32.mxu1 %v13973_v61 }
 0x15a   : > { %1182 = vmatmul.mubr.f32.gmra.mrb[6].mxu0 %v14084_v27  ;;  %3244 = vmatmul.mubr.f32.gmra.mrb[6].mxu1 %v14084_v27  ;;  %v14168_v27 = vld [vmem:[#allocation105_spill] sm:$0xff] }
 0x15b   : > { %1187 = vmatprep.mubr.f32.mxu0 %v13973_v61  ;;  %3249 = vmatprep.mubr.f32.mxu1 %v13973_v61 }
 0x15e   : > { %1190 = vmatmul.mubr.f32.gmra.mrb[8].mxu0 %v14085_v33  ;;  %3252 = vmatmul.mubr.f32.gmra.mrb[8].mxu1 %v14085_v33  ;;  %v14167_v33 = vld [vmem:[#allocation101_spill] sm:$0xff] }
 0x15f   : > { %1195 = vmatprep.mubr.f32.mxu0 %v13973_v61  ;;  %3257 = vmatprep.mubr.f32.mxu1 %v13973_v61 }
 0x162   : > { %1198 = vmatmul.mubr.f32.gmra.mrb[10].mxu0 %v14086_v38  ;;  %3260 = vmatmul.mubr.f32.gmra.mrb[10].mxu1 %v14086_v38  ;;  %v14115_v38 = vld [vmem:[#allocation15_spill] sm:$0xff] }
 0x163   : > { %1203 = vmatprep.mubr.f32.mxu0 %v13973_v61  ;;  %3265 = vmatprep.mubr.f32.mxu1 %v13973_v61 }
 0x166   : > { %1206 = vmatmul.mubr.f32.gmra.mrb[12].mxu0 %v14087_v29  ;;  %3268 = vmatmul.mubr.f32.gmra.mrb[12].mxu1 %v14087_v29 }
 0x167   : > { %1211 = vmatprep.mubr.f32.mxu0 %v13973_v61  ;;  %3273 = vmatprep.mubr.f32.mxu1 %v13973_v61 }
 0x16a   : > { %1214 = vmatmul.mubr.f32.gmra.mrb[14].mxu0 %v14088_v19  ;;  %3276 = vmatmul.mubr.f32.gmra.mrb[14].mxu1 %v14088_v19  ;;  %v14114_v19 = vand.u32 4294901760, %v10934_v4  ;;  %v14119_v4 = vand.u32 4294901760, %v10970_v48  ;;  %v14127_v48 = vld [vmem:[#allocation37_spill] sm:$0xff] }
 0x16b   : > { %1219 = vmatprep.mubr.f32.mxu0 %v13973_v61  ;;  %3281 = vmatprep.mubr.f32.mxu1 %v13973_v61 }
 0x16e   : > { %1222 = vmatmul.mubr.f32.gmra.mrb[16].mxu0 %v14089_v40  ;;  %3284 = vmatmul.mubr.f32.gmra.mrb[16].mxu1 %v14089_v40 }
 0x16f   : > { %1227 = vmatprep.mubr.f32.mxu0 %v13973_v61  ;;  %3289 = vmatprep.mubr.f32.mxu1 %v13973_v61 }
 0x172   : > { %1230 = vmatmul.mubr.f32.gmra.mrb[18].mxu0 %v14090_v47  ;;  %3292 = vmatmul.mubr.f32.gmra.mrb[18].mxu1 %v14090_v47  ;;  %v14093_v47 = vld [vmem:[#allocation48_spill] sm:$0xff] }
 0x173   : > { %1235 = vmatprep.mubr.f32.mxu0 %v13973_v61  ;;  %3297 = vmatprep.mubr.f32.mxu1 %v13973_v61 }
 0x176   : > { %1238 = vmatmul.mubr.f32.gmra.mrb[20].mxu0 %v14091_v2  ;;  %3300 = vmatmul.mubr.f32.gmra.mrb[20].mxu1 %v14091_v2  ;;  %v14094_v2 = vld [vmem:[#allocation49_spill] sm:$0xff] }
 0x177   : > { %1243 = vmatprep.mubr.f32.mxu0 %v13973_v61  ;;  %3305 = vmatprep.mubr.f32.mxu1 %v13973_v61 }
 0x17a   : > { %1246 = vmatmul.mubr.f32.gmra.mrb[22].mxu0 %v14092_v11  ;;  %3308 = vmatmul.mubr.f32.gmra.mrb[22].mxu1 %v14092_v11  ;;  %v14095_v11 = vld [vmem:[#allocation53_spill] sm:$0xff] }
 0x17b   : > { %1251 = vmatprep.mubr.f32.mxu0 %v13973_v61  ;;  %3313 = vmatprep.mubr.f32.mxu1 %v13973_v61 }
 0x17e   : > { %1254 = vmatmul.mubr.f32.gmra.mrb[24].mxu0 %v14093_v47  ;;  %3316 = vmatmul.mubr.f32.gmra.mrb[24].mxu1 %v14093_v47  ;;  %v14096_v47 = vld [vmem:[#allocation55_spill] sm:$0xff] }
 0x17f   : > { %1259 = vmatprep.mubr.f32.mxu0 %v13973_v61  ;;  %3321 = vmatprep.mubr.f32.mxu1 %v13973_v61 }
 0x182   : > { %1262 = vmatmul.mubr.f32.gmra.mrb[26].mxu0 %v14094_v2  ;;  %3324 = vmatmul.mubr.f32.gmra.mrb[26].mxu1 %v14094_v2  ;;  %v14097_v2 = vld [vmem:[#allocation60_spill] sm:$0xff] }
 0x183   : > { %1267 = vmatprep.mubr.f32.mxu0 %v13973_v61  ;;  %3329 = vmatprep.mubr.f32.mxu1 %v13973_v61 }
 0x186   : > { %1270 = vmatmul.mubr.f32.gmra.mrb[28].mxu0 %v14095_v11  ;;  %3332 = vmatmul.mubr.f32.gmra.mrb[28].mxu1 %v14095_v11  ;;  %v14112_v11 = vand.u32 4294901760, %v10922_v55  ;;  %v14120_v55 = vld [vmem:[#allocation19_spill] sm:$0xff] }
 0x187   : > { %1275 = vmatprep.mubr.f32.mxu0 %v13973_v61  ;;  %3337 = vmatprep.mubr.f32.mxu1 %v13973_v61 }
 0x18a   : > { %1278 = vmatmul.mubr.f32.gmra.mrb[30].mxu0 %v14096_v47  ;;  %3340 = vmatmul.mubr.f32.gmra.mrb[30].mxu1 %v14096_v47  ;;  %v14098_v47 = vld [vmem:[#allocation64_spill] sm:$0xff] }
 0x18b   : > { %1283 = vmatprep.mubr.f32.mxu0 %v13973_v61  ;;  %3345 = vmatprep.mubr.f32.mxu1 %v13973_v61 }
 0x18e   : > { %1286 = vmatmul.mubr.f32.gmra.mrb[32].mxu0 %v14097_v2  ;;  %3348 = vmatmul.mubr.f32.gmra.mrb[32].mxu1 %v14097_v2  ;;  %v14099_v2 = vld [vmem:[#allocation68_spill] sm:$0xff] }
 0x18f   : > { %1291 = vmatprep.mubr.f32.mxu0 %v13973_v61  ;;  %3353 = vmatprep.mubr.f32.mxu1 %v13973_v61 }
 0x192   : > { %1294 = vmatmul.mubr.f32.gmra.mrb[34].mxu0 %v11225_v0  ;;  %3356 = vmatmul.mubr.f32.gmra.mrb[34].mxu1 %v11225_v0  ;;  %v14100_v0 = vld [vmem:[#allocation71_spill] sm:$0xff] }
 0x193   : > { %1299 = vmatprep.mubr.f32.mxu0 %v13973_v61  ;;  %3361 = vmatprep.mubr.f32.mxu1 %v13973_v61 }
 0x196   : > { %1302 = vmatmul.mubr.f32.gmra.mrb[36].mxu0 %v14098_v47  ;;  %3364 = vmatmul.mubr.f32.gmra.mrb[36].mxu1 %v14098_v47  ;;  %v14101_v47 = vld [vmem:[#allocation76_spill] sm:$0xff] }
 0x197   : > { %1307 = vmatprep.mubr.f32.mxu0 %v13973_v61  ;;  %3369 = vmatprep.mubr.f32.mxu1 %v13973_v61 }
 0x19a   : > { %1310 = vmatmul.mubr.f32.gmra.mrb[38].mxu0 %v14099_v2  ;;  %3372 = vmatmul.mubr.f32.gmra.mrb[38].mxu1 %v14099_v2  ;;  %v14102_v2 = vld [vmem:[#allocation80_spill] sm:$0xff] }
 0x19b   : > { %1315 = vmatprep.mubr.f32.mxu0 %v13973_v61  ;;  %3377 = vmatprep.mubr.f32.mxu1 %v13973_v61 }
 0x19e   : > { %1318 = vmatmul.mubr.f32.gmra.mrb[40].mxu0 %v14100_v0  ;;  %3380 = vmatmul.mubr.f32.gmra.mrb[40].mxu1 %v14100_v0  ;;  %v14103_v0 = vld [vmem:[#allocation81_spill] sm:$0xff] }
 0x19f   : > { %1323 = vmatprep.mubr.f32.mxu0 %v13973_v61  ;;  %3385 = vmatprep.mubr.f32.mxu1 %v13973_v61 }
 0x1a2   : > { %1326 = vmatmul.mubr.f32.gmra.mrb[42].mxu0 %v14101_v47  ;;  %3388 = vmatmul.mubr.f32.gmra.mrb[42].mxu1 %v14101_v47  ;;  %v14104_v47 = vld [vmem:[#allocation87_spill] sm:$0xff] }
 0x1a3   : > { %1331 = vmatprep.mubr.f32.mxu0 %v13973_v61  ;;  %3393 = vmatprep.mubr.f32.mxu1 %v13973_v61 }
 0x1a6   : > { %1334 = vmatmul.mubr.f32.gmra.mrb[44].mxu0 %v14102_v2  ;;  %3396 = vmatmul.mubr.f32.gmra.mrb[44].mxu1 %v14102_v2  ;;  %v14105_v2 = vld [vmem:[#allocation91_spill] sm:$0xff] }
 0x1a7   : > { %1339 = vmatprep.mubr.f32.mxu0 %v13973_v61  ;;  %3401 = vmatprep.mubr.f32.mxu1 %v13973_v61 }
 0x1aa   : > { %1342 = vmatmul.mubr.f32.gmra.mrb[46].mxu0 %v14103_v0  ;;  %3404 = vmatmul.mubr.f32.gmra.mrb[46].mxu1 %v14103_v0  ;;  %v14106_v0 = vld [vmem:[#allocation95_spill] sm:$0xff] }
 0x1ab   : > { %1347 = vmatprep.mubr.f32.mxu0 %v13973_v61  ;;  %3409 = vmatprep.mubr.f32.mxu1 %v13973_v61 }
 0x1ae   : > { %1350 = vmatmul.mubr.f32.gmra.mrb[48].mxu0 %v14104_v47  ;;  %3412 = vmatmul.mubr.f32.gmra.mrb[48].mxu1 %v14104_v47  ;;  %v14111_v47 = vand.u32 4294901760, %v10899_v7 }
 0x1af   : > { %1355 = vmatprep.mubr.f32.mxu0 %v13973_v61  ;;  %3417 = vmatprep.mubr.f32.mxu1 %v13973_v61 }
 0x1b0   : > { %v8967_v40 = vpack.c.bf16 %v14112_v11, %v14111_v47  ;;  %v14137_v47 = vld [vmem:[#allocation67_spill] sm:$0xff] }
 0x1b1   : > { %v14139_v11 = vld [vmem:[#allocation75_spill] sm:$0xff] }
 0x1b2   : > { %1358 = vmatmul.mubr.f32.gmra.mrb[50].mxu0 %v14105_v2  ;;  %3420 = vmatmul.mubr.f32.gmra.mrb[50].mxu1 %v14105_v2 }
 0x1b3   : > { %1363 = vmatprep.mubr.f32.mxu0 %v13973_v61  ;;  %3425 = vmatprep.mubr.f32.mxu1 %v13973_v61 }
 0x1b6   : > { %1366 = vmatmul.mubr.f32.gmra.mrb[52].mxu0 %v14106_v0  ;;  %3428 = vmatmul.mubr.f32.gmra.mrb[52].mxu1 %v14106_v0  ;;  %v14109_v0 = vand.u32 4294901760, %v10725_v43 }
 0x1b7   : > { %1371 = vmatprep.mubr.f32.mxu0 %v13973_v61  ;;  %3433 = vmatprep.mubr.f32.mxu1 %v13973_v61 }
 0x1ba   : > { %1374 = vmatmul.mubr.f32.gmra.mrb[54].mxu0 %v11413_v57  ;;  %3436 = vmatmul.mubr.f32.gmra.mrb[54].mxu1 %v11413_v57 }
 0x1bb   : > { %1379 = vmatprep.mubr.f32.mxu0 %v13973_v61  ;;  %3441 = vmatprep.mubr.f32.mxu1 %v13973_v61 }
 0x1be   : > { %1382 = vmatmul.mubr.f32.gmra.mrb[56].mxu0 %v11431_v22  ;;  %3444 = vmatmul.mubr.f32.gmra.mrb[56].mxu1 %v11431_v22  ;;  %v14108_v22 = vand.u32 4294901760, %v10722_v42  ;;  %v14117_v42 = vand.u32 4294901760, %v10948_v13  ;;  %v14123_v13 = vld [vmem:[#allocation27_spill] sm:$0xff] }
 0x1bf   : > { %1387 = vmatprep.mubr.f32.mxu0 %v13973_v61  ;;  %3449 = vmatprep.mubr.f32.mxu1 %v13973_v61 }
 0x1c2   : > { %1390 = vmatmul.mubr.f32.gmra.mrb[58].mxu0 %v11449_v21  ;;  %3452 = vmatmul.mubr.f32.gmra.mrb[58].mxu1 %v11449_v21  ;;  %v14107_v21 = vand.u32 4294901760, %v10708_v39  ;;  %v14116_v39 = vand.u32 4294901760, %v10939_v54  ;;  %v14121_v54 = vld [vmem:[#allocation21_spill] sm:$0xff] }
 0x1c3   : > { %1395 = vmatprep.mubr.f32.mxu0 %v13973_v61  ;;  %3457 = vmatprep.mubr.f32.mxu1 %v13973_v61 }
 0x1c4   : > { %v8965_v57 = vpack.c.bf16 %v14108_v22, %v14107_v21  ;;  %v8969_v43 = vpack.c.bf16 %v14117_v42, %v14116_v39  ;;  %v14130_v22 = vld [vmem:[#allocation47_spill] sm:$0xff] }
 0x1c5   : > { %v14131_v21 = vld [vmem:[#allocation51_spill] sm:$0xff] }
 0x1c6   : > { %1398 = vmatmul.mubr.f32.gmra.mrb[60].mxu0 %v11467_v31  ;;  %3460 = vmatmul.mubr.f32.gmra.mrb[60].mxu1 %v11467_v31  ;;  %v14110_v31 = vand.u32 4294901760, %v10743_v52  ;;  %v14118_v52 = vand.u32 4294901760, %v10956_v44  ;;  %v14126_v44 = vld [vmem:[#allocation34_spill] sm:$0xff]  ;;  %v14140_v39 = vld [vmem:[#allocation79_spill] sm:$0xff] }
 0x1c7   : > { %1403 = vmatprep.mubr.f32.mxu0 %v13973_v61  ;;  %3465 = vmatprep.mubr.f32.mxu1 %v13973_v61  ;;  %v14141_v42 = vld [vmem:[#allocation83_spill] sm:$0xff] }
 0x1c8   : > { %v9013_v2 = vpack.c.bf16 %v14110_v31, %v14109_v0  ;;  %v9017_v7 = vpack.c.bf16 %v14119_v4, %v14118_v52  ;;  %v14129_v0 = vld [vmem:[#allocation45_spill] sm:$0xff]  ;;  %v14132_v31 = vld [vmem:[#allocation52_spill] sm:$0xff]  ;;  %v14143_v52 = vld [vmem:[#allocation90_spill] sm:$0xff] }
 0x1c9   : > { %v14144_v4 = vld [vmem:[#allocation94_spill] sm:$0xff] }
 0x1ca   : > { %1406 = vmatmul.mubr.f32.gmra.mrb[62].mxu0 %v11482_v56  ;;  %3468 = vmatmul.mubr.f32.gmra.mrb[62].mxu1 %v11482_v56  ;;  %v14113_v56 = vand.u32 4294901760, %v10927_v46  ;;  %v14122_v46 = vld [vmem:[#allocation22_spill] sm:$0xff] }
 0x1cb   : > { %1484 = vmatprep.mubr.f32.mxu0 %v13973_v61  ;;  %3546 = vmatprep.mubr.f32.mxu1 %v13973_v61 }
 0x1cc   : > { %v9015_v29 = vpack.c.bf16 %v14114_v19, %v14113_v56  ;;  %v14133_v56 = vld [vmem:[#allocation57_spill] sm:$0xff]  ;;  %v14135_v19 = vld [vmem:[#allocation62_spill] sm:$0xff] }
 0x1ce   : > { %1488 = vmatmul.mubr.f32.vlgmr.msra.gmra.mrb[0].mxu0 %v14115_v38  ;;  %3550 = vmatmul.mubr.f32.vlgmr.msra.gmra.mrb[0].mxu1 %v14115_v38  ;;  %v14166_v38 = vld [vmem:[#allocation97_spill] sm:$0xff] }
 0x1cf   : > { %8966 = vmatpush1.bf16.msra.mxu0 %v8965_v57  ;;  %9014 = vmatpush1.bf16.msra.mxu1 %v9013_v2  ;;  %v14128_v57 = vld [vmem:[#allocation41_spill] sm:$0xff]  ;;  %v14138_v2 = vld [vmem:[#allocation70_spill] sm:$0xff] }
 0x1d0   : > { %1493 = vmatprep.mubr.f32.mxu0 %v13973_v61  ;;  %3555 = vmatprep.mubr.f32.mxu1 %v13973_v61 }
 0x1d1   : > { %8968 = vmatprep.subr.bf16.mxu0 %v8967_v40  ;;  %9016 = vmatprep.subr.bf16.mxu1 %v9015_v29  ;;  %v14134_v29 = vld [vmem:[#allocation58_spill] sm:$0xff] }
 0x1d2   : > { %1497 = vmatmul.mubr.f32.gmra.mrb[2].mxu0 %v14120_v55  ;;  %3559 = vmatmul.mubr.f32.gmra.mrb[2].mxu1 %v14120_v55  ;;  %v14136_v40 = vld [vmem:[#allocation66_spill] sm:$0xff] }
 0x1d3   : > { %1502 = vmatprep.mubr.f32.mxu0 %v13973_v61  ;;  %3564 = vmatprep.mubr.f32.mxu1 %v13973_v61 }
 0x1d4   : > { %8970 = vmatpush1.bf16.msra.mxu0 %v8969_v43  ;;  %9018 = vmatpush1.bf16.msra.mxu1 %v9017_v7  ;;  %v14142_v43 = vld [vmem:[#allocation85_spill] sm:$0xff]  ;;  %v14145_v7 = vld [vmem:[#allocation99_spill] sm:$0xff] }
 0x1d5   : > { %8972 = vmatprep.subr.bf16.mxu0 %v10664_v16  ;;  %9020 = vmatprep.subr.bf16.mxu1 %v10672_v20  ;;  %v14124_v16 = vld [vmem:[#allocation29_spill] sm:$0xff]  ;;  %v14125_v20 = vld [vmem:[#allocation32_spill] sm:$0xff] }
 0x1d6   : > { %1506 = vmatmul.mubr.f32.gmra.mrb[4].mxu0 %v14121_v54  ;;  %3568 = vmatmul.mubr.f32.gmra.mrb[4].mxu1 %v14121_v54 }
 0x1d7   : > { %1511 = vmatprep.mubr.f32.mxu0 %v13973_v61  ;;  %3573 = vmatprep.mubr.f32.mxu1 %v13973_v61 }
 0x1da   : > { %1515 = vmatmul.mubr.f32.gmra.mrb[6].mxu0 %v14122_v46  ;;  %3577 = vmatmul.mubr.f32.gmra.mrb[6].mxu1 %v14122_v46 }
 0x1db   : > { %1520 = vmatprep.mubr.f32.mxu0 %v13973_v61  ;;  %3582 = vmatprep.mubr.f32.mxu1 %v13973_v61 }
 0x1de   : > { %1524 = vmatmul.mubr.f32.gmra.mrb[8].mxu0 %v14123_v13  ;;  %3586 = vmatmul.mubr.f32.gmra.mrb[8].mxu1 %v14123_v13 }
 0x1df   : > { %1529 = vmatprep.mubr.f32.mxu0 %v13973_v61  ;;  %3591 = vmatprep.mubr.f32.mxu1 %v13973_v61 }
 0x1e2   : > { %1533 = vmatmul.mubr.f32.gmra.mrb[10].mxu0 %v14124_v16  ;;  %3595 = vmatmul.mubr.f32.gmra.mrb[10].mxu1 %v14124_v16 }
 0x1e3   : > { %1538 = vmatprep.mubr.f32.mxu0 %v13973_v61  ;;  %3600 = vmatprep.mubr.f32.mxu1 %v13973_v61 }
 0x1e6   : > { %1542 = vmatmul.mubr.f32.gmra.mrb[12].mxu0 %v14125_v20  ;;  %3604 = vmatmul.mubr.f32.gmra.mrb[12].mxu1 %v14125_v20 }
 0x1e7   : > { %1547 = vmatprep.mubr.f32.mxu0 %v13973_v61  ;;  %3609 = vmatprep.mubr.f32.mxu1 %v13973_v61 }
 0x1ea   : > { %1551 = vmatmul.mubr.f32.gmra.mrb[14].mxu0 %v14126_v44  ;;  %3613 = vmatmul.mubr.f32.gmra.mrb[14].mxu1 %v14126_v44 }
 0x1eb   : > { %1556 = vmatprep.mubr.f32.mxu0 %v13973_v61  ;;  %3618 = vmatprep.mubr.f32.mxu1 %v13973_v61 }
 0x1ee   : > { %1560 = vmatmul.mubr.f32.gmra.mrb[16].mxu0 %v14127_v48  ;;  %3622 = vmatmul.mubr.f32.gmra.mrb[16].mxu1 %v14127_v48  ;;  %v12098_v48 = vld [vmem:[#allocation2 + $0xf0] sm:$0xff] }
 0x1ef   : > { %1565 = vmatprep.mubr.f32.mxu0 %v13973_v61  ;;  %3627 = vmatprep.mubr.f32.mxu1 %v13973_v61  ;;  %v13883_v54 = vand.u32 4294901760, %v12098_v48 }
 0x1f1   : > { %v12145_v55 = vsub.f32 %v12098_v48, %v13883_v54  ;;  %v14163_v54 = vld [vmem:[#allocation88_spill] sm:$0xff] }
 0x1f2   : > { %1569 = vmatmul.mubr.f32.gmra.mrb[18].mxu0 %v14128_v57  ;;  %3631 = vmatmul.mubr.f32.gmra.mrb[18].mxu1 %v14128_v57  ;;  %v12096_v57 = vld [vmem:[#allocation2 + $0xb0] sm:$0xff] }
 0x1f3   : > { %1574 = vmatprep.mubr.f32.mxu0 %v13973_v61  ;;  %3636 = vmatprep.mubr.f32.mxu1 %v13973_v61  ;;  %v13884_v13 = vand.u32 4294901760, %v12096_v57  ;;  %14161 = vst [vmem:[#allocation120_spill] sm:$0xff] %v12145_v55 }
 0x1f6   : > { %1578 = vmatmul.mubr.f32.gmra.mrb[20].mxu0 %v14129_v0  ;;  %3640 = vmatmul.mubr.f32.gmra.mrb[20].mxu1 %v14129_v0 }
 0x1f7   : > { %1583 = vmatprep.mubr.f32.mxu0 %v13973_v61  ;;  %3645 = vmatprep.mubr.f32.mxu1 %v13973_v61 }
 0x1fa   : > { %1587 = vmatmul.mubr.f32.gmra.mrb[22].mxu0 %v14130_v22  ;;  %3649 = vmatmul.mubr.f32.gmra.mrb[22].mxu1 %v14130_v22 }
 0x1fb   : > { %1592 = vmatprep.mubr.f32.mxu0 %v13973_v61  ;;  %3654 = vmatprep.mubr.f32.mxu1 %v13973_v61 }
 0x1fe   : > { %1596 = vmatmul.mubr.f32.gmra.mrb[24].mxu0 %v14131_v21  ;;  %3658 = vmatmul.mubr.f32.gmra.mrb[24].mxu1 %v14131_v21 }
 0x1ff   : > { %1601 = vmatprep.mubr.f32.mxu0 %v13973_v61  ;;  %3663 = vmatprep.mubr.f32.mxu1 %v13973_v61 }
 0x202   : > { %1605 = vmatmul.mubr.f32.gmra.mrb[26].mxu0 %v14132_v31  ;;  %3667 = vmatmul.mubr.f32.gmra.mrb[26].mxu1 %v14132_v31 }
 0x203   : > { %1610 = vmatprep.mubr.f32.mxu0 %v13973_v61  ;;  %3672 = vmatprep.mubr.f32.mxu1 %v13973_v61 }
 0x206   : > { %1614 = vmatmul.mubr.f32.gmra.mrb[28].mxu0 %v14133_v56  ;;  %3676 = vmatmul.mubr.f32.gmra.mrb[28].mxu1 %v14133_v56 }
 0x207   : > { %1619 = vmatprep.mubr.f32.mxu0 %v13973_v61  ;;  %3681 = vmatprep.mubr.f32.mxu1 %v13973_v61 }
 0x20a   : > { %1623 = vmatmul.mubr.f32.gmra.mrb[30].mxu0 %v14134_v29  ;;  %3685 = vmatmul.mubr.f32.gmra.mrb[30].mxu1 %v14134_v29 }
 0x20b   : > { %1628 = vmatprep.mubr.f32.mxu0 %v13973_v61  ;;  %3690 = vmatprep.mubr.f32.mxu1 %v13973_v61 }
 0x20e   : > { %1632 = vmatmul.mubr.f32.gmra.mrb[32].mxu0 %v14135_v19  ;;  %3694 = vmatmul.mubr.f32.gmra.mrb[32].mxu1 %v14135_v19 }
 0x20f   : > { %1637 = vmatprep.mubr.f32.mxu0 %v13973_v61  ;;  %3699 = vmatprep.mubr.f32.mxu1 %v13973_v61 }
 0x212   : > { %1641 = vmatmul.mubr.f32.gmra.mrb[34].mxu0 %v14136_v40  ;;  %3703 = vmatmul.mubr.f32.gmra.mrb[34].mxu1 %v14136_v40 }
 0x213   : > { %1646 = vmatprep.mubr.f32.mxu0 %v13973_v61  ;;  %3708 = vmatprep.mubr.f32.mxu1 %v13973_v61 }
 0x216   : > { %1650 = vmatmul.mubr.f32.gmra.mrb[36].mxu0 %v14137_v47  ;;  %3712 = vmatmul.mubr.f32.gmra.mrb[36].mxu1 %v14137_v47 }
 0x217   : > { %1655 = vmatprep.mubr.f32.mxu0 %v13973_v61  ;;  %3717 = vmatprep.mubr.f32.mxu1 %v13973_v61 }
 0x21a   : > { %1659 = vmatmul.mubr.f32.gmra.mrb[38].mxu0 %v14138_v2  ;;  %3721 = vmatmul.mubr.f32.gmra.mrb[38].mxu1 %v14138_v2 }
 0x21b   : > { %1664 = vmatprep.mubr.f32.mxu0 %v13973_v61  ;;  %3726 = vmatprep.mubr.f32.mxu1 %v13973_v61 }
 0x21e   : > { %1668 = vmatmul.mubr.f32.gmra.mrb[40].mxu0 %v14139_v11  ;;  %3730 = vmatmul.mubr.f32.gmra.mrb[40].mxu1 %v14139_v11  ;;  %v11965_v11 = vld [vmem:[#allocation2 + $0x60] sm:$0xff] }
 0x21f   : > { %1673 = vmatprep.mubr.f32.mxu0 %v13973_v61  ;;  %3735 = vmatprep.mubr.f32.mxu1 %v13973_v61 }
 0x222   : > { %1677 = vmatmul.mubr.f32.gmra.mrb[42].mxu0 %v14140_v39  ;;  %3739 = vmatmul.mubr.f32.gmra.mrb[42].mxu1 %v14140_v39 }
 0x223   : > { %1682 = vmatprep.mubr.f32.mxu0 %v13973_v61  ;;  %3744 = vmatprep.mubr.f32.mxu1 %v13973_v61 }
 0x226   : > { %1686 = vmatmul.mubr.f32.gmra.mrb[44].mxu0 %v14141_v42  ;;  %3748 = vmatmul.mubr.f32.gmra.mrb[44].mxu1 %v14141_v42  ;;  %v207_v42 = vld [vmem:[#allocation2 + $0x78] sm:$0xff] }
 0x227   : > { %1691 = vmatprep.mubr.f32.mxu0 %v13973_v61  ;;  %3753 = vmatprep.mubr.f32.mxu1 %v13973_v61  ;;  %v6511_v2 = vand.u32 4294901760, %v207_v42 }
 0x229   : > { %v11990_v21 = vsub.f32 %v207_v42, %v6511_v2  ;;  %v12081_v42 = vld [vmem:[#allocation2 + $0xb8] sm:$0xff] }
 0x22a   : > { %1695 = vmatmul.mubr.f32.gmra.mrb[46].mxu0 %v14142_v43  ;;  %3757 = vmatmul.mubr.f32.gmra.mrb[46].mxu1 %v14142_v43  ;;  %v14154_v20 = vand.u32 4294901760, %v12081_v42 }
 0x22b   : > { %1700 = vmatprep.mubr.f32.mxu0 %v13973_v61  ;;  %3762 = vmatprep.mubr.f32.mxu1 %v13973_v61 }
 0x22c   : > { %v12113_v22 = vsub.f32 %v12081_v42, %v14154_v20 }
 0x22e   : > { %1704 = vmatmul.mubr.f32.gmra.mrb[48].mxu0 %v14143_v52  ;;  %3766 = vmatmul.mubr.f32.gmra.mrb[48].mxu1 %v14143_v52  ;;  %v14146_v52 = vld [vmem:[#allocation103_spill] sm:$0xff] }
 0x22f   : > { %1709 = vmatprep.mubr.f32.mxu0 %v13973_v61  ;;  %3771 = vmatprep.mubr.f32.mxu1 %v13973_v61 }
 0x232   : > { %1713 = vmatmul.mubr.f32.gmra.mrb[50].mxu0 %v14144_v4  ;;  %3775 = vmatmul.mubr.f32.gmra.mrb[50].mxu1 %v14144_v4  ;;  %v14147_v4 = vld [vmem:[#allocation107_spill] sm:$0xff] }
 0x233   : > { %1718 = vmatprep.mubr.f32.mxu0 %v13973_v61  ;;  %3780 = vmatprep.mubr.f32.mxu1 %v13973_v61 }
 0x236   : > { %1722 = vmatmul.mubr.f32.gmra.mrb[52].mxu0 %v14145_v7  ;;  %3784 = vmatmul.mubr.f32.gmra.mrb[52].mxu1 %v14145_v7  ;;  %v14148_v7 = vld [vmem:[#allocation111_spill] sm:$0xff] }
 0x237   : > { %1727 = vmatprep.mubr.f32.mxu0 %v13973_v61  ;;  %3789 = vmatprep.mubr.f32.mxu1 %v13973_v61 }
 0x23a   : > { %1731 = vmatmul.mubr.f32.gmra.mrb[54].mxu0 %v14146_v52  ;;  %3793 = vmatmul.mubr.f32.gmra.mrb[54].mxu1 %v14146_v52  ;;  %v199_v52 = vld [vmem:[#allocation2 + $0x38] sm:$0xff] }
 0x23b   : > { %1736 = vmatprep.mubr.f32.mxu0 %v13973_v61  ;;  %3798 = vmatprep.mubr.f32.mxu1 %v13973_v61  ;;  %v6507_v39 = vand.u32 4294901760, %v199_v52 }
 0x23d   : > { %v11986_v40 = vpack.c.bf16 %v6511_v2, %v6507_v39  ;;  %v11988_v47 = vsub.f32 %v199_v52, %v6507_v39 }
 0x23e   : > { %1740 = vmatmul.mubr.f32.gmra.mrb[56].mxu0 %v14147_v4  ;;  %3802 = vmatmul.mubr.f32.gmra.mrb[56].mxu1 %v14147_v4  ;;  %v205_v4 = vld [vmem:[#allocation2 + $0x68] sm:$0xff] }
 0x23f   : > { %1745 = vmatprep.mubr.f32.mxu0 %v13973_v61  ;;  %3807 = vmatprep.mubr.f32.mxu1 %v13973_v61  ;;  %v4449_v43 = vand.u32 4294901760, %v205_v4  ;;  %14150 = vst [vmem:[#allocation9_spill] sm:$0xff] %v11986_v40 }
 0x241   : > { %v11981_v56 = vsub.f32 %v205_v4, %v4449_v43 }
 0x242   : > { %1749 = vmatmul.mubr.f32.gmra.mrb[58].mxu0 %v14148_v7  ;;  %3811 = vmatmul.mubr.f32.gmra.mrb[58].mxu1 %v14148_v7  ;;  %v197_v7 = vld [vmem:[#allocation2 + $0x28] sm:$0xff] }
 0x243   : > { %1754 = vmatprep.mubr.f32.mxu0 %v13973_v61  ;;  %3816 = vmatprep.mubr.f32.mxu1 %v13973_v61 }
 0x246   : > { %1758 = vmatmul.mubr.f32.gmra.mrb[60].mxu0 %v11478_v32  ;;  %3820 = vmatmul.mubr.f32.gmra.mrb[60].mxu1 %v11478_v32  ;;  %v4445_v32 = vand.u32 4294901760, %v197_v7 }
 0x247   : > { %1763 = vmatprep.mubr.f32.mxu0 %v13973_v61  ;;  %3825 = vmatprep.mubr.f32.mxu1 %v13973_v61 }
 0x248   : > { %v11977_v19 = vpack.c.bf16 %v4449_v43, %v4445_v32  ;;  %v11979_v29 = vsub.f32 %v197_v7, %v4445_v32  ;;  %v14152_v43 = vand.u32 4294901760, %v11965_v11 }
 0x24a   : > { %1767 = vmatmul.mubr.f32.gmra.mrb[62].mxu0 %v11493_v28  ;;  %3829 = vmatmul.mubr.f32.gmra.mrb[62].mxu1 %v11493_v28  ;;  %v11963_v28 = vld [vmem:[#allocation2 + $0x20] sm:$0xff]  ;;  %14149 = vst [vmem:[#allocation8_spill] sm:$0xff] %v11977_v19  ;;  %v12003_v4 = vsub.f32 %v11965_v11, %v14152_v43 }
 0x24b   : > { %1861 = vmatprep.mubr.f32.mxu0 %v13973_v61  ;;  %3923 = vmatprep.mubr.f32.mxu1 %v13973_v61  ;;  %v14151_v32 = vand.u32 4294901760, %v11963_v28  ;;  %v14170_v59 = vand.u32 4294901760, %v11963_v28 }
 0x24e   : > { %1863 = vmatmul.mubr.f32.vlgmr.msra.gmra.mrb[0].mxu0 %v10741_v51  ;;  %3925 = vmatmul.mubr.f32.vlgmr.msra.gmra.mrb[0].mxu1 %v10741_v51 }
 0x24f   : > { %8974 = vmatpush1.bf16.msra.mxu0 %v14072_v25  ;;  %9022 = vmatpush1.bf16.msra.mxu1 %v14073_v17  ;;  %v11971_v25 = vld [vmem:[#allocation2 + $0x30] sm:$0xff] }
 0x250   : > { %1868 = vmatprep.mubr.f32.mxu0 %v13973_v61  ;;  %3930 = vmatprep.mubr.f32.mxu1 %v13973_v61  ;;  %v11973_v17 = vld [vmem:[#allocation2 + $0x70] sm:$0xff]  ;;  %v13870_v31 = vand.u32 4294901760, %v11971_v25 }
 0x251   : > { %8976 = vmatprep.subr.bf16.mxu0 %v14074_v41  ;;  %9024 = vmatprep.subr.bf16.mxu1 %v14075_v5  ;;  %v13869_v5 = vand.u32 4294901760, %v11973_v17  ;;  %v11998_v41 = vsub.f32 %v11963_v28, %v14151_v32  ;;  %v12087_v32 = vld [vmem:[#allocation2 + $0xf8] sm:$0xff]  ;;  %v14174_v55 = vand.u32 4294901760, %v11973_v17 }
 0x252   : > { %1870 = vmatmul.mubr.f32.gmra.mrb[2].mxu0 %v10799_v62  ;;  %3932 = vmatmul.mubr.f32.gmra.mrb[2].mxu1 %v10799_v62  ;;  %v12010_v2 = vsub.f32 %v11971_v25, %v13870_v31  ;;  %v12092_v31 = vld [vmem:[#allocation2 + $0xe0] sm:$0xff]  ;;  %v14155_v16 = vand.u32 4294901760, %v12087_v32  ;;  %v14180_v28 = vand.u32 4294901760, %v12087_v32 }
 0x253   : > { %1875 = vmatprep.mubr.f32.mxu0 %v13973_v61  ;;  %3937 = vmatprep.mubr.f32.mxu1 %v13973_v61  ;;  %v12015_v39 = vsub.f32 %v11973_v17, %v13869_v5  ;;  %v12090_v5 = vld [vmem:[#allocation2 + $0xa0] sm:$0xff]  ;;  %v13885_v0 = vand.u32 4294901760, %v12092_v31 }
 0x254   : > { %8978 = vmatpush1.bf16.msra.mxu0 %v14081_v63  ;;  %9026 = vmatpush1.bf16.msra.mxu1 %v14082_v58  ;;  %v12077_v63 = vld [vmem:[#allocation2 + $0xa8] sm:$0xff]  ;;  %v14157_v20 = vand.u32 4294901760, %v12090_v5 }
 0x255   : > { %9028 = vmatprep.subr.bf16.mxu0 %v11977_v19  ;;  %9076 = vmatprep.subr.bf16.mxu1 %v11986_v40  ;;  %v12079_v58 = vld [vmem:[#allocation2 + $0xe8] sm:$0xff]  ;;  %v13878_v52 = vand.u32 4294901760, %v12077_v63  ;;  %v12134_v46 = vsub.f32 %v12092_v31, %v13885_v0  ;;  %v14165_v0 = vld [vmem:[#allocation96_spill] sm:$0xff]  ;;  %v14171_v40 = vand.u32 4294901760, %v11965_v11  ;;  %v14185_v11 = vand.u32 4294901760, %v12096_v57 }
 0x256   : > { %1877 = vmatmul.mubr.f32.gmra.mrb[4].mxu0 %v10802_v6  ;;  %3939 = vmatmul.mubr.f32.gmra.mrb[4].mxu1 %v10802_v6  ;;  %v14153_v44 = vand.u32 4294901760, %v12079_v58 }
 0x257   : > { %1882 = vmatprep.mubr.f32.mxu0 %v13973_v61  ;;  %3944 = vmatprep.mubr.f32.mxu1 %v13973_v61  ;;  %v12103_v7 = vsub.f32 %v12077_v63, %v13878_v52  ;;  %v12121_v52 = vsub.f32 %v12087_v32, %v14155_v16  ;;  %14159 = vst [vmem:[#allocation12_spill] sm:$0xff] %v12134_v46  ;;  %v14176_v46 = vand.u32 4294901760, %v12077_v63 }
 0x258   : > { %v12108_v43 = vsub.f32 %v12079_v58, %v14153_v44  ;;  %v12129_v44 = vsub.f32 %v12090_v5, %v14157_v20  ;;  %v12140_v16 = vsub.f32 %v12096_v57, %v13884_v13  ;;  %v14162_v20 = vld [vmem:[#allocation84_spill] sm:$0xff]  ;;  %v12207_v19 = vpack.c.bf16 %v14171_v40, %v14170_v59 }
 0x259   : > { %14156 = vst [vmem:[#allocation10_spill] sm:$0xff] %v12121_v52  ;;  %v14164_v13 = vld [vmem:[#allocation92_spill] sm:$0xff]  ;;  %v13906_v59 = vand.u32 4294901760, %v11979_v29  ;;  %v13903_v40 = vand.u32 4294901760, %v11990_v21 }
 0x25a   : > { %1884 = vmatmul.mubr.f32.gmra.mrb[6].mxu0 %v10810_v8  ;;  %3946 = vmatmul.mubr.f32.gmra.mrb[6].mxu1 %v10810_v8  ;;  %14158 = vst [vmem:[#allocation11_spill] sm:$0xff] %v12129_v44  ;;  %14160 = vst [vmem:[#allocation13_spill] sm:$0xff] %v12140_v16 }
 0x25b   : > { %1889 = vmatprep.mubr.f32.mxu0 %v13973_v61  ;;  %3951 = vmatprep.mubr.f32.mxu1 %v13973_v61  ;;  %14172 = vst [vmem:[#allocation121_spill] sm:$0xff] %v12207_v19  ;;  %v4873_v63 = vsub.f32 %v11979_v29, %v13906_v59 }
 0x25e   : > { %1891 = vmatmul.mubr.f32.gmra.mrb[8].mxu0 %v10818_v24  ;;  %3953 = vmatmul.mubr.f32.gmra.mrb[8].mxu1 %v10818_v24  ;;  %v14191_v59 = vld [vmem:[#allocation12_spill] sm:$0xff] }
 0x25f   : > { %1896 = vmatprep.mubr.f32.mxu0 %v13973_v61  ;;  %3958 = vmatprep.mubr.f32.mxu1 %v13973_v61 }
 0x262   : > { %1898 = vmatmul.mubr.f32.gmra.mrb[10].mxu0 %v10832_v37  ;;  %3960 = vmatmul.mubr.f32.gmra.mrb[10].mxu1 %v10832_v37 }
 0x263   : > { %1903 = vmatprep.mubr.f32.mxu0 %v13973_v61  ;;  %3965 = vmatprep.mubr.f32.mxu1 %v13973_v61 }
 0x266   : > { %1905 = vmatmul.mubr.f32.gmra.mrb[12].mxu0 %v10848_v9  ;;  %3967 = vmatmul.mubr.f32.gmra.mrb[12].mxu1 %v10848_v9 }
 0x267   : > { %1910 = vmatprep.mubr.f32.mxu0 %v13973_v61  ;;  %3972 = vmatprep.mubr.f32.mxu1 %v13973_v61 }
 0x26a   : > { %1912 = vmatmul.mubr.f32.gmra.mrb[14].mxu0 %v10863_v60  ;;  %3974 = vmatmul.mubr.f32.gmra.mrb[14].mxu1 %v10863_v60 }
 0x26b   : > { %1917 = vmatprep.mubr.f32.mxu0 %v13973_v61  ;;  %3979 = vmatprep.mubr.f32.mxu1 %v13973_v61 }
 0x26e   : > { %1919 = vmatmul.mubr.f32.gmra.mrb[16].mxu0 %v10884_v12  ;;  %3981 = vmatmul.mubr.f32.gmra.mrb[16].mxu1 %v10884_v12 }
 0x26f   : > { %1924 = vmatprep.mubr.f32.mxu0 %v13973_v61  ;;  %3986 = vmatprep.mubr.f32.mxu1 %v13973_v61 }
 0x272   : > { %1926 = vmatmul.mubr.f32.gmra.mrb[18].mxu0 %v10943_v18  ;;  %3988 = vmatmul.mubr.f32.gmra.mrb[18].mxu1 %v10943_v18 }
 0x273   : > { %1931 = vmatprep.mubr.f32.mxu0 %v13973_v61  ;;  %3993 = vmatprep.mubr.f32.mxu1 %v13973_v61 }
 0x276   : > { %1933 = vmatmul.mubr.f32.gmra.mrb[20].mxu0 %v10985_v36  ;;  %3995 = vmatmul.mubr.f32.gmra.mrb[20].mxu1 %v10985_v36 }
 0x277   : > { %1938 = vmatprep.mubr.f32.mxu0 %v13973_v61  ;;  %4000 = vmatprep.mubr.f32.mxu1 %v13973_v61 }
 0x27a   : > { %1940 = vmatmul.mubr.f32.gmra.mrb[22].mxu0 %v10987_v15  ;;  %4002 = vmatmul.mubr.f32.gmra.mrb[22].mxu1 %v10987_v15 }
 0x27b   : > { %1945 = vmatprep.mubr.f32.mxu0 %v13973_v61  ;;  %4007 = vmatprep.mubr.f32.mxu1 %v13973_v61 }
 0x27e   : > { %1947 = vmatmul.mubr.f32.gmra.mrb[24].mxu0 %v11058_v35  ;;  %4009 = vmatmul.mubr.f32.gmra.mrb[24].mxu1 %v11058_v35 }
 0x27f   : > { %1952 = vmatprep.mubr.f32.mxu0 %v13973_v61  ;;  %4014 = vmatprep.mubr.f32.mxu1 %v13973_v61 }
 0x282   : > { %1954 = vmatmul.mubr.f32.gmra.mrb[26].mxu0 %v11085_v45  ;;  %4016 = vmatmul.mubr.f32.gmra.mrb[26].mxu1 %v11085_v45 }
 0x283   : > { %1959 = vmatprep.mubr.f32.mxu0 %v13973_v61  ;;  %4021 = vmatprep.mubr.f32.mxu1 %v13973_v61 }
 0x286   : > { %1961 = vmatmul.mubr.f32.gmra.mrb[28].mxu0 %v11114_v1  ;;  %4023 = vmatmul.mubr.f32.gmra.mrb[28].mxu1 %v11114_v1 }
 0x287   : > { %1966 = vmatprep.mubr.f32.mxu0 %v13973_v61  ;;  %4028 = vmatprep.mubr.f32.mxu1 %v13973_v61 }
 0x28a   : > { %1968 = vmatmul.mubr.f32.gmra.mrb[30].mxu0 %v11147_v53  ;;  %4030 = vmatmul.mubr.f32.gmra.mrb[30].mxu1 %v11147_v53 }
 0x28b   : > { %1973 = vmatprep.mubr.f32.mxu0 %v13973_v61  ;;  %4035 = vmatprep.mubr.f32.mxu1 %v13973_v61 }
 0x28e   : > { %1975 = vmatmul.mubr.f32.gmra.mrb[32].mxu0 %v11172_v30  ;;  %4037 = vmatmul.mubr.f32.gmra.mrb[32].mxu1 %v11172_v30 }
 0x28f   : > { %1980 = vmatprep.mubr.f32.mxu0 %v13973_v61  ;;  %4042 = vmatprep.mubr.f32.mxu1 %v13973_v61 }
 0x292   : > { %1982 = vmatmul.mubr.f32.gmra.mrb[34].mxu0 %v11207_v14  ;;  %4044 = vmatmul.mubr.f32.gmra.mrb[34].mxu1 %v11207_v14 }
 0x293   : > { %1987 = vmatprep.mubr.f32.mxu0 %v13973_v61  ;;  %4049 = vmatprep.mubr.f32.mxu1 %v13973_v61 }
 0x296   : > { %1989 = vmatmul.mubr.f32.gmra.mrb[36].mxu0 %v11212_v34  ;;  %4051 = vmatmul.mubr.f32.gmra.mrb[36].mxu1 %v11212_v34 }
 0x297   : > { %1994 = vmatprep.mubr.f32.mxu0 %v13973_v61  ;;  %4056 = vmatprep.mubr.f32.mxu1 %v13973_v61 }
 0x29a   : > { %1996 = vmatmul.mubr.f32.gmra.mrb[38].mxu0 %v11234_v49  ;;  %4058 = vmatmul.mubr.f32.gmra.mrb[38].mxu1 %v11234_v49 }
 0x29b   : > { %2001 = vmatprep.mubr.f32.mxu0 %v13973_v61  ;;  %4063 = vmatprep.mubr.f32.mxu1 %v13973_v61 }
 0x29e   : > { %2003 = vmatmul.mubr.f32.gmra.mrb[40].mxu0 %v11255_v26  ;;  %4065 = vmatmul.mubr.f32.gmra.mrb[40].mxu1 %v11255_v26 }
 0x29f   : > { %2008 = vmatprep.mubr.f32.mxu0 %v13973_v61  ;;  %4070 = vmatprep.mubr.f32.mxu1 %v13973_v61 }
 0x2a2   : > { %2010 = vmatmul.mubr.f32.gmra.mrb[42].mxu0 %v11275_v50  ;;  %4072 = vmatmul.mubr.f32.gmra.mrb[42].mxu1 %v11275_v50 }
 0x2a3   : > { %2015 = vmatprep.mubr.f32.mxu0 %v13973_v61  ;;  %4077 = vmatprep.mubr.f32.mxu1 %v13973_v61 }
 0x2a6   : > { %2017 = vmatmul.mubr.f32.gmra.mrb[44].mxu0 %v11292_v10  ;;  %4079 = vmatmul.mubr.f32.gmra.mrb[44].mxu1 %v11292_v10 }
 0x2a7   : > { %2022 = vmatprep.mubr.f32.mxu0 %v13973_v61  ;;  %4084 = vmatprep.mubr.f32.mxu1 %v13973_v61 }
 0x2aa   : > { %2024 = vmatmul.mubr.f32.gmra.mrb[46].mxu0 %v11310_v3  ;;  %4086 = vmatmul.mubr.f32.gmra.mrb[46].mxu1 %v11310_v3 }
 0x2ab   : > { %2029 = vmatprep.mubr.f32.mxu0 %v13973_v61  ;;  %4091 = vmatprep.mubr.f32.mxu1 %v13973_v61 }
 0x2ae   : > { %2031 = vmatmul.mubr.f32.gmra.mrb[48].mxu0 %v14162_v20  ;;  %4093 = vmatmul.mubr.f32.gmra.mrb[48].mxu1 %v14162_v20 }
 0x2af   : > { %2036 = vmatprep.mubr.f32.mxu0 %v13973_v61  ;;  %4098 = vmatprep.mubr.f32.mxu1 %v13973_v61 }
 0x2b2   : > { %2038 = vmatmul.mubr.f32.gmra.mrb[50].mxu0 %v14163_v54  ;;  %4100 = vmatmul.mubr.f32.gmra.mrb[50].mxu1 %v14163_v54 }
 0x2b3   : > { %2043 = vmatprep.mubr.f32.mxu0 %v13973_v61  ;;  %4105 = vmatprep.mubr.f32.mxu1 %v13973_v61 }
 0x2b6   : > { %2045 = vmatmul.mubr.f32.gmra.mrb[52].mxu0 %v14164_v13  ;;  %4107 = vmatmul.mubr.f32.gmra.mrb[52].mxu1 %v14164_v13 }
 0x2b7   : > { %2050 = vmatprep.mubr.f32.mxu0 %v13973_v61  ;;  %4112 = vmatprep.mubr.f32.mxu1 %v13973_v61 }
 0x2ba   : > { %2052 = vmatmul.mubr.f32.gmra.mrb[54].mxu0 %v14165_v0  ;;  %4114 = vmatmul.mubr.f32.gmra.mrb[54].mxu1 %v14165_v0 }
 0x2bb   : > { %2057 = vmatprep.mubr.f32.mxu0 %v13973_v61  ;;  %4119 = vmatprep.mubr.f32.mxu1 %v13973_v61 }
 0x2be   : > { %2059 = vmatmul.mubr.f32.gmra.mrb[56].mxu0 %v14166_v38  ;;  %4121 = vmatmul.mubr.f32.gmra.mrb[56].mxu1 %v14166_v38 }
 0x2bf   : > { %2064 = vmatprep.mubr.f32.mxu0 %v13973_v61  ;;  %4126 = vmatprep.mubr.f32.mxu1 %v13973_v61 }
 0x2c2   : > { %2066 = vmatmul.mubr.f32.gmra.mrb[58].mxu0 %v14167_v33  ;;  %4128 = vmatmul.mubr.f32.gmra.mrb[58].mxu1 %v14167_v33  ;;  %v14179_v33 = vand.u32 4294901760, %v12081_v42 }
 0x2c3   : > { %2071 = vmatprep.mubr.f32.mxu0 %v13973_v61  ;;  %4133 = vmatprep.mubr.f32.mxu1 %v13973_v61 }
 0x2c4   : > { %v12225_v52 = vpack.c.bf16 %v14180_v28, %v14179_v33  ;;  %v14183_v33 = vand.u32 4294901760, %v12092_v31 }
 0x2c6   : > { %2073 = vmatmul.mubr.f32.gmra.mrb[60].mxu0 %v14168_v27  ;;  %4135 = vmatmul.mubr.f32.gmra.mrb[60].mxu1 %v14168_v27  ;;  %v14173_v27 = vand.u32 4294901760, %v11971_v25  ;;  %14181 = vst [vmem:[#allocation124_spill] sm:$0xff] %v12225_v52  ;;  %v14186_v25 = vand.u32 4294901760, %v12098_v48  ;;  %v6947_v48 = vsub.f32 %v11990_v21, %v13903_v40 }
 0x2c7   : > { %2078 = vmatprep.mubr.f32.mxu0 %v13973_v61  ;;  %4140 = vmatprep.mubr.f32.mxu1 %v13973_v61 }
 0x2c8   : > { %v12213_v16 = vpack.c.bf16 %v14174_v55, %v14173_v27  ;;  %v13905_v27 = vand.u32 4294901760, %v11981_v56  ;;  %v13904_v55 = vand.u32 4294901760, %v11988_v47  ;;  %v12245_v17 = vpack.c.bf16 %v14186_v25, %v14185_v11 }
 0x2c9   : > { %v6948_v32 = vand.u32 4294901760, %v6947_v48  ;;  %v13910_v11 = vand.u32 4294901760, %v12003_v4  ;;  %v13913_v25 = vand.u32 4294901760, %v12010_v2 }
 0x2ca   : > { %2080 = vmatmul.mubr.f32.gmra.mrb[62].mxu0 %v14169_v23  ;;  %4142 = vmatmul.mubr.f32.gmra.mrb[62].mxu1 %v14169_v23  ;;  %14175 = vst [vmem:[#allocation122_spill] sm:$0xff] %v12213_v16  ;;  %v14177_v23 = vand.u32 4294901760, %v12079_v58  ;;  %14187 = vst [vmem:[#allocation126_spill] sm:$0xff] %v12245_v17  ;;  %v4885_v31 = vsub.f32 %v11981_v56, %v13905_v27  ;;  %v6935_v57 = vsub.f32 %v11988_v47, %v13904_v55  ;;  %v14190_v55 = vld [vmem:[#allocation11_spill] sm:$0xff] }
 0x2cb   : > { %2158 = vmatprep.mubr.f32.mxu0 %v13973_v61  ;;  %4220 = vmatprep.mubr.f32.mxu1 %v13973_v61 }
 0x2cc   : > { %v12219_v44 = vpack.c.bf16 %v14177_v23, %v14176_v46  ;;  %v14182_v23 = vand.u32 4294901760, %v12090_v5  ;;  %v4874_v5 = vand.u32 4294901760, %v4873_v63  ;;  %v4886_v58 = vand.u32 4294901760, %v4885_v31 }
 0x2cd   : > { %v6936_v42 = vand.u32 4294901760, %v6935_v57  ;;  %v13916_v63 = vand.u32 4294901760, %v12015_v39  ;;  %v14193_v57 = vld [vmem:[#allocation120_spill] sm:$0xff] }
 0x2ce   : > { %14178 = vst [vmem:[#allocation123_spill] sm:$0xff] %v12219_v44  ;;  %2160 = vmatmul.mubr.f32.vlgmr.msra.gmra.mrb[0].mxu0 %v10741_v51  ;;  %4222 = vmatmul.mubr.f32.vlgmr.msra.gmra.mrb[0].mxu1 %v10741_v51  ;;  %v12239_v46 = vpack.c.bf16 %v14183_v33, %v14182_v23  ;;  %v9035_v28 = vpack.c.bf16 %v4886_v58, %v4874_v5  ;;  %v13907_v33 = vand.u32 4294901760, %v11998_v41  ;;  %v14188_v5 = vld [vmem:[#allocation10_spill] sm:$0xff]  ;;  %v14192_v58 = vld [vmem:[#allocation13_spill] sm:$0xff] }
 0x2cf   : > { %9030 = vmatpush1.bf16.msra.mxu0 %v12207_v19  ;;  %9078 = vmatpush1.bf16.msra.mxu1 %v12213_v16  ;;  %v9083_v23 = vpack.c.bf16 %v6948_v32, %v6936_v42  ;;  %v14189_v42 = vld [vmem:[#allocation101_spill] sm:$0xff]  ;;  %v6953_v40 = vsub.f32 %v12015_v39, %v13916_v63  ;;  %v14197_v27 = vand.u32 4294901760, %v14188_v5  ;;  %v14199_v16 = vand.u32 4294901760, %v14190_v55 }
 0x2d0   : > { %14184 = vst [vmem:[#allocation125_spill] sm:$0xff] %v12239_v46  ;;  %2165 = vmatprep.mubr.f32.mxu0 %v13973_v61  ;;  %4227 = vmatprep.mubr.f32.mxu1 %v13973_v61  ;;  %v4879_v32 = vsub.f32 %v11998_v41, %v13907_v33  ;;  %v14200_v19 = vand.u32 4294901760, %v14191_v59 }
 0x2d1   : > { %9032 = vmatprep.subr.bf16.mxu0 %v12219_v44  ;;  %9080 = vmatprep.subr.bf16.mxu1 %v12225_v52  ;;  %v14196_v52 = vand.u32 4294901760, %v12113_v22  ;;  %v6971_v33 = vsub.f32 %v14188_v5, %v14197_v27  ;;  %v14198_v44 = vld [vmem:[#allocation105_spill] sm:$0xff] }
 0x2d2   : > { %2167 = vmatmul.mubr.f32.gmra.mrb[2].mxu0 %v10799_v62  ;;  %4229 = vmatmul.mubr.f32.gmra.mrb[2].mxu1 %v10799_v62  ;;  %v4915_v27 = vsub.f32 %v14191_v59, %v14200_v19 }
 0x2d3   : > { %2172 = vmatprep.mubr.f32.mxu0 %v13973_v61  ;;  %4234 = vmatprep.mubr.f32.mxu1 %v13973_v61  ;;  %v6959_v63 = vsub.f32 %v12113_v22, %v14196_v52  ;;  %v4903_v52 = vsub.f32 %v14190_v55, %v14199_v16 }
 0x2d4   : > { %9034 = vmatpush1.bf16.msra.mxu0 %v12239_v46  ;;  %9082 = vmatpush1.bf16.msra.mxu1 %v12245_v17  ;;  %v14194_v17 = vand.u32 4294901760, %v12103_v7  ;;  %v14195_v46 = vand.u32 4294901760, %v12108_v43 }
 0x2d5   : > { %9036 = vmatprep.subr.bf16.mxu0 %v9035_v28  ;;  %9084 = vmatprep.subr.bf16.mxu1 %v9083_v23  ;;  %v4891_v28 = vsub.f32 %v12003_v4, %v13910_v11  ;;  %v6941_v23 = vsub.f32 %v12010_v2, %v13913_v25 }
 0x2d6   : > { %2174 = vmatmul.mubr.f32.gmra.mrb[4].mxu0 %v10802_v6  ;;  %4236 = vmatmul.mubr.f32.gmra.mrb[4].mxu1 %v10802_v6  ;;  %v4897_v11 = vsub.f32 %v12103_v7, %v14194_v17  ;;  %v4909_v25 = vsub.f32 %v12108_v43, %v14195_v46  ;;  %v4880_v17 = vand.u32 4294901760, %v4879_v32  ;;  %v6954_v46 = vand.u32 4294901760, %v6953_v40 }
 0x2d7   : > { %2179 = vmatprep.mubr.f32.mxu0 %v13973_v61  ;;  %4241 = vmatprep.mubr.f32.mxu1 %v13973_v61  ;;  %v4892_v31 = vand.u32 4294901760, %v4891_v28  ;;  %v6942_v48 = vand.u32 4294901760, %v6941_v23  ;;  %v6960_v23 = vand.u32 4294901760, %v6959_v63  ;;  %v6972_v40 = vand.u32 4294901760, %v6971_v33  ;;  %v14205_v63 = vld [vmem:[#allocation24_spill] sm:$0xff] }
 0x2d8   : > { %v4898_v32 = vand.u32 4294901760, %v4897_v11  ;;  %v4910_v28 = vand.u32 4294901760, %v4909_v25  ;;  %v14204_v11 = vld [vmem:[#allocation16_spill] sm:$0xff] }
 0x2d9   : > { %v9037_v19 = vpack.c.bf16 %v4892_v31, %v4880_v17  ;;  %v9085_v16 = vpack.c.bf16 %v6954_v46, %v6942_v48  ;;  %v14210_v31 = vld [vmem:[#allocation38_spill] sm:$0xff]  ;;  %v14211_v48 = vld [vmem:[#allocation40_spill] sm:$0xff] }
 0x2da   : > { %2181 = vmatmul.mubr.f32.gmra.mrb[6].mxu0 %v10810_v8  ;;  %4243 = vmatmul.mubr.f32.gmra.mrb[6].mxu1 %v10810_v8  ;;  %v14212_v17 = vld [vmem:[#allocation44_spill] sm:$0xff]  ;;  %v14213_v46 = vld [vmem:[#allocation46_spill] sm:$0xff] }
 0x2db   : > { %2186 = vmatprep.mubr.f32.mxu0 %v13973_v61  ;;  %4248 = vmatprep.mubr.f32.mxu1 %v13973_v61 }
 0x2de   : > { %2188 = vmatmul.mubr.f32.gmra.mrb[8].mxu0 %v10818_v24  ;;  %4250 = vmatmul.mubr.f32.gmra.mrb[8].mxu1 %v10818_v24 }
 0x2df   : > { %2193 = vmatprep.mubr.f32.mxu0 %v13973_v61  ;;  %4255 = vmatprep.mubr.f32.mxu1 %v13973_v61 }
 0x2e2   : > { %2195 = vmatmul.mubr.f32.gmra.mrb[10].mxu0 %v10832_v37  ;;  %4257 = vmatmul.mubr.f32.gmra.mrb[10].mxu1 %v10832_v37 }
 0x2e3   : > { %2200 = vmatprep.mubr.f32.mxu0 %v13973_v61  ;;  %4262 = vmatprep.mubr.f32.mxu1 %v13973_v61 }
 0x2e6   : > { %2202 = vmatmul.mubr.f32.gmra.mrb[12].mxu0 %v10848_v9  ;;  %4264 = vmatmul.mubr.f32.gmra.mrb[12].mxu1 %v10848_v9 }
 0x2e7   : > { %2207 = vmatprep.mubr.f32.mxu0 %v13973_v61  ;;  %4269 = vmatprep.mubr.f32.mxu1 %v13973_v61 }
 0x2ea   : > { %2209 = vmatmul.mubr.f32.gmra.mrb[14].mxu0 %v10863_v60  ;;  %4271 = vmatmul.mubr.f32.gmra.mrb[14].mxu1 %v10863_v60 }
 0x2eb   : > { %2214 = vmatprep.mubr.f32.mxu0 %v13973_v61  ;;  %4276 = vmatprep.mubr.f32.mxu1 %v13973_v61 }
 0x2ee   : > { %2216 = vmatmul.mubr.f32.gmra.mrb[16].mxu0 %v10884_v12  ;;  %4278 = vmatmul.mubr.f32.gmra.mrb[16].mxu1 %v10884_v12 }
 0x2ef   : > { %2221 = vmatprep.mubr.f32.mxu0 %v13973_v61  ;;  %4283 = vmatprep.mubr.f32.mxu1 %v13973_v61 }
 0x2f2   : > { %2223 = vmatmul.mubr.f32.gmra.mrb[18].mxu0 %v10943_v18  ;;  %4285 = vmatmul.mubr.f32.gmra.mrb[18].mxu1 %v10943_v18 }
 0x2f3   : > { %2228 = vmatprep.mubr.f32.mxu0 %v13973_v61  ;;  %4290 = vmatprep.mubr.f32.mxu1 %v13973_v61 }
 0x2f6   : > { %2230 = vmatmul.mubr.f32.gmra.mrb[20].mxu0 %v10985_v36  ;;  %4292 = vmatmul.mubr.f32.gmra.mrb[20].mxu1 %v10985_v36 }
 0x2f7   : > { %2235 = vmatprep.mubr.f32.mxu0 %v13973_v61  ;;  %4297 = vmatprep.mubr.f32.mxu1 %v13973_v61 }
 0x2fa   : > { %2237 = vmatmul.mubr.f32.gmra.mrb[22].mxu0 %v10987_v15  ;;  %4299 = vmatmul.mubr.f32.gmra.mrb[22].mxu1 %v10987_v15 }
 0x2fb   : > { %2242 = vmatprep.mubr.f32.mxu0 %v13973_v61  ;;  %4304 = vmatprep.mubr.f32.mxu1 %v13973_v61 }
 0x2fe   : > { %2244 = vmatmul.mubr.f32.gmra.mrb[24].mxu0 %v11058_v35  ;;  %4306 = vmatmul.mubr.f32.gmra.mrb[24].mxu1 %v11058_v35 }
 0x2ff   : > { %2249 = vmatprep.mubr.f32.mxu0 %v13973_v61  ;;  %4311 = vmatprep.mubr.f32.mxu1 %v13973_v61 }
 0x302   : > { %2251 = vmatmul.mubr.f32.gmra.mrb[26].mxu0 %v11085_v45  ;;  %4313 = vmatmul.mubr.f32.gmra.mrb[26].mxu1 %v11085_v45 }
 0x303   : > { %2256 = vmatprep.mubr.f32.mxu0 %v13973_v61  ;;  %4318 = vmatprep.mubr.f32.mxu1 %v13973_v61 }
 0x306   : > { %2258 = vmatmul.mubr.f32.gmra.mrb[28].mxu0 %v11114_v1  ;;  %4320 = vmatmul.mubr.f32.gmra.mrb[28].mxu1 %v11114_v1 }
 0x307   : > { %2263 = vmatprep.mubr.f32.mxu0 %v13973_v61  ;;  %4325 = vmatprep.mubr.f32.mxu1 %v13973_v61 }
 0x30a   : > { %2265 = vmatmul.mubr.f32.gmra.mrb[30].mxu0 %v11147_v53  ;;  %4327 = vmatmul.mubr.f32.gmra.mrb[30].mxu1 %v11147_v53 }
 0x30b   : > { %2270 = vmatprep.mubr.f32.mxu0 %v13973_v61  ;;  %4332 = vmatprep.mubr.f32.mxu1 %v13973_v61 }
 0x30e   : > { %2272 = vmatmul.mubr.f32.gmra.mrb[32].mxu0 %v11172_v30  ;;  %4334 = vmatmul.mubr.f32.gmra.mrb[32].mxu1 %v11172_v30 }
 0x30f   : > { %2277 = vmatprep.mubr.f32.mxu0 %v13973_v61  ;;  %4339 = vmatprep.mubr.f32.mxu1 %v13973_v61 }
 0x312   : > { %2279 = vmatmul.mubr.f32.gmra.mrb[34].mxu0 %v11207_v14  ;;  %4341 = vmatmul.mubr.f32.gmra.mrb[34].mxu1 %v11207_v14 }
 0x313   : > { %2284 = vmatprep.mubr.f32.mxu0 %v13973_v61  ;;  %4346 = vmatprep.mubr.f32.mxu1 %v13973_v61 }
 0x316   : > { %2286 = vmatmul.mubr.f32.gmra.mrb[36].mxu0 %v11212_v34  ;;  %4348 = vmatmul.mubr.f32.gmra.mrb[36].mxu1 %v11212_v34 }
 0x317   : > { %2291 = vmatprep.mubr.f32.mxu0 %v13973_v61  ;;  %4353 = vmatprep.mubr.f32.mxu1 %v13973_v61 }
 0x31a   : > { %2293 = vmatmul.mubr.f32.gmra.mrb[38].mxu0 %v11234_v49  ;;  %4355 = vmatmul.mubr.f32.gmra.mrb[38].mxu1 %v11234_v49 }
 0x31b   : > { %2298 = vmatprep.mubr.f32.mxu0 %v13973_v61  ;;  %4360 = vmatprep.mubr.f32.mxu1 %v13973_v61 }
 0x31e   : > { %2300 = vmatmul.mubr.f32.gmra.mrb[40].mxu0 %v11255_v26  ;;  %4362 = vmatmul.mubr.f32.gmra.mrb[40].mxu1 %v11255_v26 }
 0x31f   : > { %2305 = vmatprep.mubr.f32.mxu0 %v13973_v61  ;;  %4367 = vmatprep.mubr.f32.mxu1 %v13973_v61 }
 0x322   : > { %2307 = vmatmul.mubr.f32.gmra.mrb[42].mxu0 %v11275_v50  ;;  %4369 = vmatmul.mubr.f32.gmra.mrb[42].mxu1 %v11275_v50 }
 0x323   : > { %2312 = vmatprep.mubr.f32.mxu0 %v13973_v61  ;;  %4374 = vmatprep.mubr.f32.mxu1 %v13973_v61 }
 0x326   : > { %2314 = vmatmul.mubr.f32.gmra.mrb[44].mxu0 %v11292_v10  ;;  %4376 = vmatmul.mubr.f32.gmra.mrb[44].mxu1 %v11292_v10  ;;  %v9039_v10 = vpack.c.bf16 %v4910_v28, %v4898_v32  ;;  %v14216_v32 = vld [vmem:[#allocation56_spill] sm:$0xff]  ;;  %v14217_v28 = vld [vmem:[#allocation59_spill] sm:$0xff] }
 0x327   : > { %2319 = vmatprep.mubr.f32.mxu0 %v13973_v61  ;;  %4381 = vmatprep.mubr.f32.mxu1 %v13973_v61 }
 0x32a   : > { %2321 = vmatmul.mubr.f32.gmra.mrb[46].mxu0 %v11310_v3  ;;  %4383 = vmatmul.mubr.f32.gmra.mrb[46].mxu1 %v11310_v3 }
 0x32b   : > { %2326 = vmatprep.mubr.f32.mxu0 %v13973_v61  ;;  %4388 = vmatprep.mubr.f32.mxu1 %v13973_v61 }
 0x32e   : > { %2328 = vmatmul.mubr.f32.gmra.mrb[48].mxu0 %v14162_v20  ;;  %4390 = vmatmul.mubr.f32.gmra.mrb[48].mxu1 %v14162_v20 }
 0x32f   : > { %2333 = vmatprep.mubr.f32.mxu0 %v13973_v61  ;;  %4395 = vmatprep.mubr.f32.mxu1 %v13973_v61 }
 0x332   : > { %2335 = vmatmul.mubr.f32.gmra.mrb[50].mxu0 %v14163_v54  ;;  %4397 = vmatmul.mubr.f32.gmra.mrb[50].mxu1 %v14163_v54  ;;  %v4904_v54 = vand.u32 4294901760, %v4903_v52  ;;  %v14214_v52 = vld [vmem:[#allocation50_spill] sm:$0xff] }
 0x333   : > { %2340 = vmatprep.mubr.f32.mxu0 %v13973_v61  ;;  %4402 = vmatprep.mubr.f32.mxu1 %v13973_v61 }
 0x336   : > { %2342 = vmatmul.mubr.f32.gmra.mrb[52].mxu0 %v14164_v13  ;;  %4404 = vmatmul.mubr.f32.gmra.mrb[52].mxu1 %v14164_v13  ;;  %v14203_v13 = vld [vmem:[#allocation109_spill] sm:$0xff] }
 0x337   : > { %2347 = vmatprep.mubr.f32.mxu0 %v13973_v61  ;;  %4409 = vmatprep.mubr.f32.mxu1 %v13973_v61 }
 0x33a   : > { %2349 = vmatmul.mubr.f32.gmra.mrb[54].mxu0 %v14165_v0  ;;  %4411 = vmatmul.mubr.f32.gmra.mrb[54].mxu1 %v14165_v0 }
 0x33b   : > { %2354 = vmatprep.mubr.f32.mxu0 %v13973_v61  ;;  %4416 = vmatprep.mubr.f32.mxu1 %v13973_v61 }
 0x33e   : > { %2356 = vmatmul.mubr.f32.gmra.mrb[56].mxu0 %v14166_v38  ;;  %4418 = vmatmul.mubr.f32.gmra.mrb[56].mxu1 %v14166_v38  ;;  %v14202_v38 = vand.u32 4294901760, %v14193_v57 }
 0x33f   : > { %2361 = vmatprep.mubr.f32.mxu0 %v13973_v61  ;;  %4423 = vmatprep.mubr.f32.mxu1 %v13973_v61 }
 0x340   : > { %v6977_v0 = vsub.f32 %v14193_v57, %v14202_v38  ;;  %v9087_v38 = vpack.c.bf16 %v6972_v40, %v6960_v23  ;;  %v14218_v23 = vld [vmem:[#allocation61_spill] sm:$0xff] }
 0x341   : > { %v14219_v40 = vld [vmem:[#allocation65_spill] sm:$0xff] }
 0x342   : > { %2363 = vmatmul.mubr.f32.gmra.mrb[58].mxu0 %v14189_v42  ;;  %4425 = vmatmul.mubr.f32.gmra.mrb[58].mxu1 %v14189_v42  ;;  %v14201_v42 = vand.u32 4294901760, %v14192_v58  ;;  %v6978_v3 = vand.u32 4294901760, %v6977_v0  ;;  %v9091_v0 = vpack.c.bf16 %v11990_v21, %v11988_v47 }
 0x343   : > { %2368 = vmatprep.mubr.f32.mxu0 %v13973_v61  ;;  %4430 = vmatprep.mubr.f32.mxu1 %v13973_v61 }
 0x346   : > { %2370 = vmatmul.mubr.f32.gmra.mrb[60].mxu0 %v14198_v44  ;;  %4432 = vmatmul.mubr.f32.gmra.mrb[60].mxu1 %v14198_v44  ;;  %v6965_v44 = vsub.f32 %v14192_v58, %v14201_v42  ;;  %v4916_v42 = vand.u32 4294901760, %v4915_v27  ;;  %v14215_v27 = vld [vmem:[#allocation54_spill] sm:$0xff] }
 0x347   : > { %2375 = vmatprep.mubr.f32.mxu0 %v13973_v61  ;;  %4437 = vmatprep.mubr.f32.mxu1 %v13973_v61 }
 0x348   : > { %v6966_v20 = vand.u32 4294901760, %v6965_v44  ;;  %v9041_v33 = vpack.c.bf16 %v4916_v42, %v4904_v54  ;;  %v9043_v44 = vpack.c.bf16 %v11981_v56, %v11979_v29  ;;  %v14208_v54 = vld [vmem:[#allocation33_spill] sm:$0xff]  ;;  %v14222_v42 = vld [vmem:[#allocation74_spill] sm:$0xff] }
 0x34a   : > { %2377 = vmatmul.mubr.f32.gmra.mrb[62].mxu0 %v14203_v13  ;;  %4439 = vmatmul.mubr.f32.gmra.mrb[62].mxu1 %v14203_v13  ;;  %v9089_v25 = vpack.c.bf16 %v6978_v3, %v6966_v20  ;;  %v14207_v3 = vld [vmem:[#allocation30_spill] sm:$0xff]  ;;  %v14209_v20 = vld [vmem:[#allocation36_spill] sm:$0xff] }
 0x34b   : > { %4517 = vmatprep.mubr.f32.mxu0 %v13973_v61  ;;  %6579 = vmatprep.mubr.f32.mxu1 %v13973_v61 }
 0x34e   : > { %4523 = vmatmul.mubr.f32.vlgmr.msra.gmra.mrb[64].mxu0 %v14204_v11  ;;  %6585 = vmatmul.mubr.f32.vlgmr.msra.gmra.mrb[64].mxu1 %v14204_v11  ;;  %v14224_v11 = vld [vmem:[#allocation82_spill] sm:$0xff] }
 0x34f   : > { %9038 = vmatpush1.bf16.msra.mxu0 %v9037_v19  ;;  %9086 = vmatpush1.bf16.msra.mxu1 %v9085_v16  ;;  %v14220_v19 = vld [vmem:[#allocation69_spill] sm:$0xff]  ;;  %v14221_v16 = vld [vmem:[#allocation72_spill] sm:$0xff] }
 0x350   : > { %4528 = vmatprep.mubr.f32.mxu0 %v13973_v61  ;;  %6590 = vmatprep.mubr.f32.mxu1 %v13973_v61 }
 0x351   : > { %9040 = vmatprep.subr.bf16.mxu0 %v9039_v10  ;;  %9088 = vmatprep.subr.bf16.mxu1 %v9087_v38  ;;  %v14206_v10 = vld [vmem:[#allocation26_spill] sm:$0xff] }
 0x352   : > { %4534 = vmatmul.mubr.f32.gmra.mrb[66].mxu0 %v14205_v63  ;;  %6596 = vmatmul.mubr.f32.gmra.mrb[66].mxu1 %v14205_v63  ;;  %v14223_v38 = vld [vmem:[#allocation78_spill] sm:$0xff] }
 0x353   : > { %4539 = vmatprep.mubr.f32.mxu0 %v13973_v61  ;;  %6601 = vmatprep.mubr.f32.mxu1 %v13973_v61  ;;  %v14225_v63 = vld [vmem:[#allocation86_spill] sm:$0xff] }
 0x354   : > { %9042 = vmatpush1.bf16.msra.mxu0 %v9041_v33  ;;  %9090 = vmatpush1.bf16.msra.mxu1 %v9089_v25 }
 0x355   : > { %9044 = vmatprep.subr.bf16.mxu0 %v9043_v44  ;;  %9092 = vmatprep.subr.bf16.mxu1 %v9091_v0 }
 0x356   : > { %4545 = vmatmul.mubr.f32.gmra.mrb[68].mxu0 %v14206_v10  ;;  %6607 = vmatmul.mubr.f32.gmra.mrb[68].mxu1 %v14206_v10 }
 0x357   : > { %4550 = vmatprep.mubr.f32.mxu0 %v13973_v61  ;;  %6612 = vmatprep.mubr.f32.mxu1 %v13973_v61 }
 0x35a   : > { %4556 = vmatmul.mubr.f32.gmra.mrb[70].mxu0 %v14207_v3  ;;  %6618 = vmatmul.mubr.f32.gmra.mrb[70].mxu1 %v14207_v3 }
 0x35b   : > { %4561 = vmatprep.mubr.f32.mxu0 %v13973_v61  ;;  %6623 = vmatprep.mubr.f32.mxu1 %v13973_v61 }
 0x35e   : > { %4567 = vmatmul.mubr.f32.gmra.mrb[72].mxu0 %v14208_v54  ;;  %6629 = vmatmul.mubr.f32.gmra.mrb[72].mxu1 %v14208_v54 }
 0x35f   : > { %4572 = vmatprep.mubr.f32.mxu0 %v13973_v61  ;;  %6634 = vmatprep.mubr.f32.mxu1 %v13973_v61 }
 0x362   : > { %4578 = vmatmul.mubr.f32.gmra.mrb[74].mxu0 %v14209_v20  ;;  %6640 = vmatmul.mubr.f32.gmra.mrb[74].mxu1 %v14209_v20 }
 0x363   : > { %4583 = vmatprep.mubr.f32.mxu0 %v13973_v61  ;;  %6645 = vmatprep.mubr.f32.mxu1 %v13973_v61 }
 0x366   : > { %4589 = vmatmul.mubr.f32.gmra.mrb[76].mxu0 %v14210_v31  ;;  %6651 = vmatmul.mubr.f32.gmra.mrb[76].mxu1 %v14210_v31  ;;  %v14226_v31 = vld [vmem:[#allocation89_spill] sm:$0xff] }
 0x367   : > { %4594 = vmatprep.mubr.f32.mxu0 %v13973_v61  ;;  %6656 = vmatprep.mubr.f32.mxu1 %v13973_v61 }
 0x36a   : > { %4600 = vmatmul.mubr.f32.gmra.mrb[78].mxu0 %v14211_v48  ;;  %6662 = vmatmul.mubr.f32.gmra.mrb[78].mxu1 %v14211_v48 }
 0x36b   : > { %4605 = vmatprep.mubr.f32.mxu0 %v13973_v61  ;;  %6667 = vmatprep.mubr.f32.mxu1 %v13973_v61 }
 0x36e   : > { %4611 = vmatmul.mubr.f32.gmra.mrb[80].mxu0 %v14212_v17  ;;  %6673 = vmatmul.mubr.f32.gmra.mrb[80].mxu1 %v14212_v17 }
 0x36f   : > { %4616 = vmatprep.mubr.f32.mxu0 %v13973_v61  ;;  %6678 = vmatprep.mubr.f32.mxu1 %v13973_v61 }
 0x372   : > { %4622 = vmatmul.mubr.f32.gmra.mrb[82].mxu0 %v14213_v46  ;;  %6684 = vmatmul.mubr.f32.gmra.mrb[82].mxu1 %v14213_v46 }
 0x373   : > { %4627 = vmatprep.mubr.f32.mxu0 %v13973_v61  ;;  %6689 = vmatprep.mubr.f32.mxu1 %v13973_v61 }
 0x376   : > { %4633 = vmatmul.mubr.f32.gmra.mrb[84].mxu0 %v14214_v52  ;;  %6695 = vmatmul.mubr.f32.gmra.mrb[84].mxu1 %v14214_v52 }
 0x377   : > { %4638 = vmatprep.mubr.f32.mxu0 %v13973_v61  ;;  %6700 = vmatprep.mubr.f32.mxu1 %v13973_v61 }
 0x37a   : > { %4644 = vmatmul.mubr.f32.gmra.mrb[86].mxu0 %v14215_v27  ;;  %6706 = vmatmul.mubr.f32.gmra.mrb[86].mxu1 %v14215_v27  ;;  %v14227_v27 = vld [vmem:[#allocation93_spill] sm:$0xff] }
 0x37b   : > { %4649 = vmatprep.mubr.f32.mxu0 %v13973_v61  ;;  %6711 = vmatprep.mubr.f32.mxu1 %v13973_v61 }
 0x37e   : > { %4655 = vmatmul.mubr.f32.gmra.mrb[88].mxu0 %v14216_v32  ;;  %6717 = vmatmul.mubr.f32.gmra.mrb[88].mxu1 %v14216_v32 }
 0x37f   : > { %4660 = vmatprep.mubr.f32.mxu0 %v13973_v61  ;;  %6722 = vmatprep.mubr.f32.mxu1 %v13973_v61 }
 0x382   : > { %4666 = vmatmul.mubr.f32.gmra.mrb[90].mxu0 %v14217_v28  ;;  %6728 = vmatmul.mubr.f32.gmra.mrb[90].mxu1 %v14217_v28 }
 0x383   : > { %4671 = vmatprep.mubr.f32.mxu0 %v13973_v61  ;;  %6733 = vmatprep.mubr.f32.mxu1 %v13973_v61 }
 0x386   : > { %4677 = vmatmul.mubr.f32.gmra.mrb[92].mxu0 %v14218_v23  ;;  %6739 = vmatmul.mubr.f32.gmra.mrb[92].mxu1 %v14218_v23 }
 0x387   : > { %4682 = vmatprep.mubr.f32.mxu0 %v13973_v61  ;;  %6744 = vmatprep.mubr.f32.mxu1 %v13973_v61 }
 0x38a   : > { %4688 = vmatmul.mubr.f32.gmra.mrb[94].mxu0 %v14219_v40  ;;  %6750 = vmatmul.mubr.f32.gmra.mrb[94].mxu1 %v14219_v40 }
 0x38b   : > { %4693 = vmatprep.mubr.f32.mxu0 %v13973_v61  ;;  %6755 = vmatprep.mubr.f32.mxu1 %v13973_v61 }
 0x38e   : > { %4699 = vmatmul.mubr.f32.gmra.mrb[96].mxu0 %v14220_v19  ;;  %6761 = vmatmul.mubr.f32.gmra.mrb[96].mxu1 %v14220_v19  ;;  %v14228_v19 = vld [vmem:[#allocation98_spill] sm:$0xff] }
 0x38f   : > { %4704 = vmatprep.mubr.f32.mxu0 %v13973_v61  ;;  %6766 = vmatprep.mubr.f32.mxu1 %v13973_v61 }
 0x392   : > { %4710 = vmatmul.mubr.f32.gmra.mrb[98].mxu0 %v14221_v16  ;;  %6772 = vmatmul.mubr.f32.gmra.mrb[98].mxu1 %v14221_v16 }
 0x393   : > { %4715 = vmatprep.mubr.f32.mxu0 %v13973_v61  ;;  %6777 = vmatprep.mubr.f32.mxu1 %v13973_v61 }
 0x396   : > { %4721 = vmatmul.mubr.f32.gmra.mrb[100].mxu0 %v14222_v42  ;;  %6783 = vmatmul.mubr.f32.gmra.mrb[100].mxu1 %v14222_v42 }
 0x397   : > { %4726 = vmatprep.mubr.f32.mxu0 %v13973_v61  ;;  %6788 = vmatprep.mubr.f32.mxu1 %v13973_v61 }
 0x39a   : > { %4732 = vmatmul.mubr.f32.gmra.mrb[102].mxu0 %v14223_v38  ;;  %6794 = vmatmul.mubr.f32.gmra.mrb[102].mxu1 %v14223_v38 }
 0x39b   : > { %4737 = vmatprep.mubr.f32.mxu0 %v13973_v61  ;;  %6799 = vmatprep.mubr.f32.mxu1 %v13973_v61 }
 0x39e   : > { %4743 = vmatmul.mubr.f32.gmra.mrb[104].mxu0 %v14224_v11  ;;  %6805 = vmatmul.mubr.f32.gmra.mrb[104].mxu1 %v14224_v11 }
 0x39f   : > { %4748 = vmatprep.mubr.f32.mxu0 %v13973_v61  ;;  %6810 = vmatprep.mubr.f32.mxu1 %v13973_v61 }
 0x3a1   : > { %v2161_v33 = vpop.f32.mrb[0].mxu0  ;;  %v4223_v25 = vpop.f32.mrb[0].mxu1 }
 0x3a2   : > { %8569 = vst [vmem:[%s12528_s25] sm:$0xff] %v2161_v33  ;;  %8571 = vst [vmem:[%s12528_s25 + $0x10] sm:$0xff] %v4223_v25  ;;  %v2163_v44 = vpop.f32.mrb[1].mxu0  ;;  %v4225_v0 = vpop.f32.mrb[1].mxu1  ;;  %4754 = vmatmul.mubr.f32.gmra.mrb[106].mxu0 %v14225_v63  ;;  %6816 = vmatmul.mubr.f32.gmra.mrb[106].mxu1 %v14225_v63  ;;  %v14229_v33 = vld [vmem:[#allocation102_spill] sm:$0xff] }
 0x3a3   : > { %8570 = vst [vmem:[%s12528_s25 + $0x8] sm:$0xff] %v2163_v44  ;;  %8572 = vst [vmem:[%s12528_s25 + $0x18] sm:$0xff] %v4225_v0  ;;  %4759 = vmatprep.mubr.f32.mxu0 %v13973_v61  ;;  %6821 = vmatprep.mubr.f32.mxu1 %v13973_v61 }
 0x3a5   : > { %v2168_v10 = vpop.f32.mrb[2].mxu0  ;;  %v4230_v3 = vpop.f32.mrb[2].mxu1 }
 0x3a6   : > { %8577 = vst [vmem:[%s12528_s25 + $0x40] sm:$0xff] %v2168_v10  ;;  %8579 = vst [vmem:[%s12528_s25 + $0x50] sm:$0xff] %v4230_v3  ;;  %v2170_v54 = vpop.f32.mrb[3].mxu0  ;;  %v4232_v20 = vpop.f32.mrb[3].mxu1  ;;  %4765 = vmatmul.mubr.f32.gmra.mrb[108].mxu0 %v14226_v31  ;;  %6827 = vmatmul.mubr.f32.gmra.mrb[108].mxu1 %v14226_v31  ;;  %v14230_v10 = vld [vmem:[#allocation106_spill] sm:$0xff] }
 0x3a7   : > { %8578 = vst [vmem:[%s12528_s25 + $0x48] sm:$0xff] %v2170_v54  ;;  %8580 = vst [vmem:[%s12528_s25 + $0x58] sm:$0xff] %v4232_v20  ;;  %4770 = vmatprep.mubr.f32.mxu0 %v13973_v61  ;;  %6832 = vmatprep.mubr.f32.mxu1 %v13973_v61 }
 0x3a9   : > { %v2175_v48 = vpop.f32.mrb[4].mxu0  ;;  %v4237_v17 = vpop.f32.mrb[4].mxu1 }
 0x3aa   : > { %8585 = vst [vmem:[%s12528_s25 + $0x80] sm:$0xff] %v2175_v48  ;;  %8587 = vst [vmem:[%s12528_s25 + $0x90] sm:$0xff] %v4237_v17  ;;  %v2177_v46 = vpop.f32.mrb[5].mxu0  ;;  %v4239_v52 = vpop.f32.mrb[5].mxu1  ;;  %4776 = vmatmul.mubr.f32.gmra.mrb[110].mxu0 %v14227_v27  ;;  %6838 = vmatmul.mubr.f32.gmra.mrb[110].mxu1 %v14227_v27  ;;  %v14231_v48 = vld [vmem:[#allocation110_spill] sm:$0xff] }
 0x3ab   : > { %8586 = vst [vmem:[%s12528_s25 + $0x88] sm:$0xff] %v2177_v46  ;;  %8588 = vst [vmem:[%s12528_s25 + $0x98] sm:$0xff] %v4239_v52  ;;  %4781 = vmatprep.mubr.f32.mxu0 %v13973_v61  ;;  %6843 = vmatprep.mubr.f32.mxu1 %v13973_v61 }
 0x3ad   : > { %v2182_v32 = vpop.f32.mrb[6].mxu0  ;;  %v4244_v28 = vpop.f32.mrb[6].mxu1 }
 0x3ae   : > { %8593 = vst [vmem:[%s12528_s25 + $0xc0] sm:$0xff] %v2182_v32  ;;  %8595 = vst [vmem:[%s12528_s25 + $0xd0] sm:$0xff] %v4244_v28  ;;  %v2184_v23 = vpop.f32.mrb[7].mxu0  ;;  %v4246_v40 = vpop.f32.mrb[7].mxu1  ;;  %4787 = vmatmul.mubr.f32.gmra.mrb[112].mxu0 %v14228_v19  ;;  %6849 = vmatmul.mubr.f32.gmra.mrb[112].mxu1 %v14228_v19  ;;  %v14232_v32 = vld [vmem:[#allocation113_spill] sm:$0xff] }
 0x3af   : > { %8594 = vst [vmem:[%s12528_s25 + $0xc8] sm:$0xff] %v2184_v23  ;;  %8596 = vst [vmem:[%s12528_s25 + $0xd8] sm:$0xff] %v4246_v40  ;;  %4792 = vmatprep.mubr.f32.mxu0 %v13973_v61  ;;  %6854 = vmatprep.mubr.f32.mxu1 %v13973_v61 }
 0x3b1   : > { %v2189_v16 = vpop.f32.mrb[8].mxu0  ;;  %v4251_v42 = vpop.f32.mrb[8].mxu1 }
 0x3b2   : > { %8601 = vst [vmem:[%s12528_s25 + $0x100] sm:$0xff] %v2189_v16  ;;  %8603 = vst [vmem:[%s12528_s25 + $0x110] sm:$0xff] %v4251_v42  ;;  %v2191_v38 = vpop.f32.mrb[9].mxu0  ;;  %v4253_v11 = vpop.f32.mrb[9].mxu1  ;;  %4798 = vmatmul.mubr.f32.gmra.mrb[114].mxu0 %v14229_v33  ;;  %6860 = vmatmul.mubr.f32.gmra.mrb[114].mxu1 %v14229_v33  ;;  %v14233_v16 = vld [vmem:[#allocation116_spill] sm:$0xff] }
 0x3b3   : > { %8602 = vst [vmem:[%s12528_s25 + $0x108] sm:$0xff] %v2191_v38  ;;  %8604 = vst [vmem:[%s12528_s25 + $0x118] sm:$0xff] %v4253_v11  ;;  %4803 = vmatprep.mubr.f32.mxu0 %v13973_v61  ;;  %6865 = vmatprep.mubr.f32.mxu1 %v13973_v61 }
 0x3b5   : > { %v2196_v25 = vpop.f32.mrb[10].mxu0  ;;  %v4258_v44 = vpop.f32.mrb[10].mxu1 }
 0x3b6   : > { %8609 = vst [vmem:[%s12528_s25 + $0x140] sm:$0xff] %v2196_v25  ;;  %8611 = vst [vmem:[%s12528_s25 + $0x150] sm:$0xff] %v4258_v44  ;;  %v2198_v0 = vpop.f32.mrb[11].mxu0  ;;  %v4260_v63 = vpop.f32.mrb[11].mxu1  ;;  %4809 = vmatmul.mubr.f32.gmra.mrb[116].mxu0 %v14230_v10  ;;  %6871 = vmatmul.mubr.f32.gmra.mrb[116].mxu1 %v14230_v10  ;;  %v14234_v25 = vld [vmem:[#allocation118_spill] sm:$0xff] }
 0x3b7   : > { %8610 = vst [vmem:[%s12528_s25 + $0x148] sm:$0xff] %v2198_v0  ;;  %8612 = vst [vmem:[%s12528_s25 + $0x158] sm:$0xff] %v4260_v63  ;;  %4814 = vmatprep.mubr.f32.mxu0 %v13973_v61  ;;  %6876 = vmatprep.mubr.f32.mxu1 %v13973_v61 }
 0x3b9   : > { %v2203_v3 = vpop.f32.mrb[12].mxu0  ;;  %v4265_v54 = vpop.f32.mrb[12].mxu1 }
 0x3ba   : > { %8617 = vst [vmem:[%s12528_s25 + $0x180] sm:$0xff] %v2203_v3  ;;  %8619 = vst [vmem:[%s12528_s25 + $0x190] sm:$0xff] %v4265_v54  ;;  %v2205_v20 = vpop.f32.mrb[13].mxu0  ;;  %v4267_v31 = vpop.f32.mrb[13].mxu1  ;;  %4820 = vmatmul.mubr.f32.gmra.mrb[118].mxu0 %v14231_v48  ;;  %6882 = vmatmul.mubr.f32.gmra.mrb[118].mxu1 %v14231_v48  ;;  %v14235_v3 = vld [vmem:[#allocation119_spill] sm:$0xff]  ;;  %v9045_v54 = vpack.c.bf16 %v12003_v4, %v11998_v41 }
 0x3bb   : > { %8618 = vst [vmem:[%s12528_s25 + $0x188] sm:$0xff] %v2205_v20  ;;  %8620 = vst [vmem:[%s12528_s25 + $0x198] sm:$0xff] %v4267_v31  ;;  %4825 = vmatprep.mubr.f32.mxu0 %v13973_v61  ;;  %6887 = vmatprep.mubr.f32.mxu1 %v13973_v61  ;;  %v9093_v20 = vpack.c.bf16 %v12015_v39, %v12010_v2 }
 0x3bd   : > { %v2210_v17 = vpop.f32.mrb[14].mxu0  ;;  %v4272_v46 = vpop.f32.mrb[14].mxu1 }
 0x3be   : > { %8625 = vst [vmem:[%s12528_s25 + $0x1c0] sm:$0xff] %v2210_v17  ;;  %8627 = vst [vmem:[%s12528_s25 + $0x1d0] sm:$0xff] %v4272_v46  ;;  %v2212_v52 = vpop.f32.mrb[15].mxu0  ;;  %v4274_v27 = vpop.f32.mrb[15].mxu1  ;;  %4831 = vmatmul.mubr.f32.gmra.mrb[120].mxu0 %v14232_v32  ;;  %6893 = vmatmul.mubr.f32.gmra.mrb[120].mxu1 %v14232_v32  ;;  %v9047_v17 = vpack.c.bf16 %v12108_v43, %v12103_v7  ;;  %v9095_v46 = vpack.c.bf16 %v14188_v5, %v12113_v22 }
 0x3bf   : > { %8626 = vst [vmem:[%s12528_s25 + $0x1c8] sm:$0xff] %v2212_v52  ;;  %8628 = vst [vmem:[%s12528_s25 + $0x1d8] sm:$0xff] %v4274_v27  ;;  %4836 = vmatprep.mubr.f32.mxu0 %v13973_v61  ;;  %6898 = vmatprep.mubr.f32.mxu1 %v13973_v61  ;;  %v9049_v32 = vpack.c.bf16 %v14191_v59, %v14190_v55 }
 0x3c1   : > { %v2217_v28 = vpop.f32.mrb[16].mxu0  ;;  %v4279_v23 = vpop.f32.mrb[16].mxu1 }
 0x3c2   : > { %8633 = vst [vmem:[%s12528_s25 + $0x200] sm:$0xff] %v2217_v28  ;;  %8635 = vst [vmem:[%s12528_s25 + $0x210] sm:$0xff] %v4279_v23  ;;  %v2219_v40 = vpop.f32.mrb[17].mxu0  ;;  %v4281_v19 = vpop.f32.mrb[17].mxu1  ;;  %4842 = vmatmul.mubr.f32.gmra.mrb[122].mxu0 %v14233_v16  ;;  %6904 = vmatmul.mubr.f32.gmra.mrb[122].mxu1 %v14233_v16  ;;  %v9097_v28 = vpack.c.bf16 %v14193_v57, %v14192_v58 }
 0x3c3   : > { %8634 = vst [vmem:[%s12528_s25 + $0x208] sm:$0xff] %v2219_v40  ;;  %8636 = vst [vmem:[%s12528_s25 + $0x218] sm:$0xff] %v4281_v19  ;;  %4847 = vmatprep.mubr.f32.mxu0 %v13973_v61  ;;  %6909 = vmatprep.mubr.f32.mxu1 %v13973_v61 }
 0x3c5   : > { %v2224_v42 = vpop.f32.mrb[18].mxu0  ;;  %v4286_v38 = vpop.f32.mrb[18].mxu1 }
 0x3c6   : > { %8641 = vst [vmem:[%s12528_s25 + $0x240] sm:$0xff] %v2224_v42  ;;  %8643 = vst [vmem:[%s12528_s25 + $0x250] sm:$0xff] %v4286_v38  ;;  %v2226_v11 = vpop.f32.mrb[19].mxu0  ;;  %v4288_v33 = vpop.f32.mrb[19].mxu1  ;;  %4853 = vmatmul.mubr.f32.gmra.mrb[124].mxu0 %v14234_v25  ;;  %6915 = vmatmul.mubr.f32.gmra.mrb[124].mxu1 %v14234_v25 }
 0x3c7   : > { %8642 = vst [vmem:[%s12528_s25 + $0x248] sm:$0xff] %v2226_v11  ;;  %8644 = vst [vmem:[%s12528_s25 + $0x258] sm:$0xff] %v4288_v33  ;;  %4858 = vmatprep.mubr.f32.mxu0 %v13973_v61  ;;  %6920 = vmatprep.mubr.f32.mxu1 %v13973_v61  ;;  %v14236_v11 = vld [vmem:[#allocation8_spill] sm:$0xff]  ;;  %v14237_v33 = vld [vmem:[#allocation9_spill] sm:$0xff] }
 0x3c9   : > { %v2231_v44 = vpop.f32.mrb[20].mxu0  ;;  %v4293_v0 = vpop.f32.mrb[20].mxu1 }
 0x3ca   : > { %8649 = vst [vmem:[%s12528_s25 + $0x280] sm:$0xff] %v2231_v44  ;;  %8651 = vst [vmem:[%s12528_s25 + $0x290] sm:$0xff] %v4293_v0  ;;  %v2233_v63 = vpop.f32.mrb[21].mxu0  ;;  %v4295_v10 = vpop.f32.mrb[21].mxu1  ;;  %4864 = vmatmul.mubr.f32.gmra.mrb[126].mxu0 %v14235_v3  ;;  %6926 = vmatmul.mubr.f32.gmra.mrb[126].mxu1 %v14235_v3 }
 0x3cb   : > { %8650 = vst [vmem:[%s12528_s25 + $0x288] sm:$0xff] %v2233_v63  ;;  %8652 = vst [vmem:[%s12528_s25 + $0x298] sm:$0xff] %v4295_v10  ;;  %4974 = vmatprep.mubr.f32.mxu0 %v13973_v61  ;;  %7036 = vmatprep.mubr.f32.mxu1 %v13973_v61 }
 0x3cd   : > { %v2238_v31 = vpop.f32.mrb[22].mxu0  ;;  %v4300_v48 = vpop.f32.mrb[22].mxu1 }
 0x3ce   : > { %8657 = vst [vmem:[%s12528_s25 + $0x2c0] sm:$0xff] %v2238_v31  ;;  %8659 = vst [vmem:[%s12528_s25 + $0x2d0] sm:$0xff] %v4300_v48  ;;  %v2240_v52 = vpop.f32.mrb[23].mxu0  ;;  %v4302_v27 = vpop.f32.mrb[23].mxu1  ;;  %4976 = vmatmul.mubr.f32.vlgmr.msra.gmra.mrb[64].mxu0 %v10741_v51  ;;  %7038 = vmatmul.mubr.f32.vlgmr.msra.gmra.mrb[64].mxu1 %v10741_v51 }
 0x3cf   : > { %8658 = vst [vmem:[%s12528_s25 + $0x2c8] sm:$0xff] %v2240_v52  ;;  %8660 = vst [vmem:[%s12528_s25 + $0x2d8] sm:$0xff] %v4302_v27  ;;  %9046 = vmatpush1.bf16.msra.mxu0 %v9045_v54  ;;  %9094 = vmatpush1.bf16.msra.mxu1 %v9093_v20 }
 0x3d0   : > { %4981 = vmatprep.mubr.f32.mxu0 %v13973_v61  ;;  %7043 = vmatprep.mubr.f32.mxu1 %v13973_v61 }
 0x3d1   : > { %v2245_v23 = vpop.f32.mrb[24].mxu0  ;;  %v4307_v40 = vpop.f32.mrb[24].mxu1  ;;  %9048 = vmatprep.subr.bf16.mxu0 %v9047_v17  ;;  %9096 = vmatprep.subr.bf16.mxu1 %v9095_v46 }
 0x3d2   : > { %8665 = vst [vmem:[%s12528_s25 + $0x300] sm:$0xff] %v2245_v23  ;;  %8667 = vst [vmem:[%s12528_s25 + $0x310] sm:$0xff] %v4307_v40  ;;  %v2247_v19 = vpop.f32.mrb[25].mxu0  ;;  %v4309_v16 = vpop.f32.mrb[25].mxu1  ;;  %4983 = vmatmul.mubr.f32.gmra.mrb[66].mxu0 %v10799_v62  ;;  %7045 = vmatmul.mubr.f32.gmra.mrb[66].mxu1 %v10799_v62 }
 0x3d3   : > { %8666 = vst [vmem:[%s12528_s25 + $0x308] sm:$0xff] %v2247_v19  ;;  %8668 = vst [vmem:[%s12528_s25 + $0x318] sm:$0xff] %v4309_v16  ;;  %4988 = vmatprep.mubr.f32.mxu0 %v13973_v61  ;;  %7050 = vmatprep.mubr.f32.mxu1 %v13973_v61 }
 0x3d4   : > { %9050 = vmatpush1.bf16.msra.mxu0 %v9049_v32  ;;  %9098 = vmatpush1.bf16.msra.mxu1 %v9097_v28 }
 0x3d5   : > { %v2252_v42 = vpop.f32.mrb[26].mxu0  ;;  %v4314_v38 = vpop.f32.mrb[26].mxu1  ;;  %9052 = vmatprep.subr.bf16.mxu0 %v14236_v11  ;;  %9100 = vmatprep.subr.bf16.mxu1 %v14237_v33 }
 0x3d6   : > { %8673 = vst [vmem:[%s12528_s25 + $0x340] sm:$0xff] %v2252_v42  ;;  %8675 = vst [vmem:[%s12528_s25 + $0x350] sm:$0xff] %v4314_v38  ;;  %v2254_v25 = vpop.f32.mrb[27].mxu0  ;;  %v4316_v44 = vpop.f32.mrb[27].mxu1  ;;  %4990 = vmatmul.mubr.f32.gmra.mrb[68].mxu0 %v10802_v6  ;;  %7052 = vmatmul.mubr.f32.gmra.mrb[68].mxu1 %v10802_v6 }
 0x3d7   : > { %8674 = vst [vmem:[%s12528_s25 + $0x348] sm:$0xff] %v2254_v25  ;;  %8676 = vst [vmem:[%s12528_s25 + $0x358] sm:$0xff] %v4316_v44  ;;  %4995 = vmatprep.mubr.f32.mxu0 %v13973_v61  ;;  %7057 = vmatprep.mubr.f32.mxu1 %v13973_v61 }
 0x3d9   : > { %v2259_v0 = vpop.f32.mrb[28].mxu0  ;;  %v4321_v63 = vpop.f32.mrb[28].mxu1 }
 0x3da   : > { %8681 = vst [vmem:[%s12528_s25 + $0x380] sm:$0xff] %v2259_v0  ;;  %8683 = vst [vmem:[%s12528_s25 + $0x390] sm:$0xff] %v4321_v63  ;;  %v2261_v10 = vpop.f32.mrb[29].mxu0  ;;  %v4323_v3 = vpop.f32.mrb[29].mxu1  ;;  %4997 = vmatmul.mubr.f32.gmra.mrb[70].mxu0 %v10810_v8  ;;  %7059 = vmatmul.mubr.f32.gmra.mrb[70].mxu1 %v10810_v8 }
 0x3db   : > { %8682 = vst [vmem:[%s12528_s25 + $0x388] sm:$0xff] %v2261_v10  ;;  %8684 = vst [vmem:[%s12528_s25 + $0x398] sm:$0xff] %v4323_v3  ;;  %5002 = vmatprep.mubr.f32.mxu0 %v13973_v61  ;;  %7064 = vmatprep.mubr.f32.mxu1 %v13973_v61 }
 0x3dd   : > { %v2266_v54 = vpop.f32.mrb[30].mxu0  ;;  %v4328_v20 = vpop.f32.mrb[30].mxu1 }
 0x3de   : > { %8689 = vst [vmem:[%s12528_s25 + $0x3c0] sm:$0xff] %v2266_v54  ;;  %8691 = vst [vmem:[%s12528_s25 + $0x3d0] sm:$0xff] %v4328_v20  ;;  %v2268_v31 = vpop.f32.mrb[31].mxu0  ;;  %v4330_v48 = vpop.f32.mrb[31].mxu1  ;;  %5004 = vmatmul.mubr.f32.gmra.mrb[72].mxu0 %v10818_v24  ;;  %7066 = vmatmul.mubr.f32.gmra.mrb[72].mxu1 %v10818_v24 }
 0x3df   : > { %8690 = vst [vmem:[%s12528_s25 + $0x3c8] sm:$0xff] %v2268_v31  ;;  %8692 = vst [vmem:[%s12528_s25 + $0x3d8] sm:$0xff] %v4330_v48  ;;  %5009 = vmatprep.mubr.f32.mxu0 %v13973_v61  ;;  %7071 = vmatprep.mubr.f32.mxu1 %v13973_v61 }
 0x3e1   : > { %v2273_v17 = vpop.f32.mrb[32].mxu0  ;;  %v4335_v46 = vpop.f32.mrb[32].mxu1 }
 0x3e2   : > { %8697 = vst [vmem:[%s12528_s25 + $0x400] sm:$0xff] %v2273_v17  ;;  %8699 = vst [vmem:[%s12528_s25 + $0x410] sm:$0xff] %v4335_v46  ;;  %v2275_v52 = vpop.f32.mrb[33].mxu0  ;;  %v4337_v27 = vpop.f32.mrb[33].mxu1  ;;  %5011 = vmatmul.mubr.f32.gmra.mrb[74].mxu0 %v10832_v37  ;;  %7073 = vmatmul.mubr.f32.gmra.mrb[74].mxu1 %v10832_v37 }
 0x3e3   : > { %8698 = vst [vmem:[%s12528_s25 + $0x408] sm:$0xff] %v2275_v52  ;;  %8700 = vst [vmem:[%s12528_s25 + $0x418] sm:$0xff] %v4337_v27  ;;  %5016 = vmatprep.mubr.f32.mxu0 %v13973_v61  ;;  %7078 = vmatprep.mubr.f32.mxu1 %v13973_v61 }
 0x3e5   : > { %v2280_v32 = vpop.f32.mrb[34].mxu0  ;;  %v4342_v28 = vpop.f32.mrb[34].mxu1 }
 0x3e6   : > { %8705 = vst [vmem:[%s12528_s25 + $0x440] sm:$0xff] %v2280_v32  ;;  %8707 = vst [vmem:[%s12528_s25 + $0x450] sm:$0xff] %v4342_v28  ;;  %v2282_v23 = vpop.f32.mrb[35].mxu0  ;;  %v4344_v40 = vpop.f32.mrb[35].mxu1  ;;  %5018 = vmatmul.mubr.f32.gmra.mrb[76].mxu0 %v10848_v9  ;;  %7080 = vmatmul.mubr.f32.gmra.mrb[76].mxu1 %v10848_v9 }
 0x3e7   : > { %8706 = vst [vmem:[%s12528_s25 + $0x448] sm:$0xff] %v2282_v23  ;;  %8708 = vst [vmem:[%s12528_s25 + $0x458] sm:$0xff] %v4344_v40  ;;  %5023 = vmatprep.mubr.f32.mxu0 %v13973_v61  ;;  %7085 = vmatprep.mubr.f32.mxu1 %v13973_v61 }
 0x3e9   : > { %v2287_v19 = vpop.f32.mrb[36].mxu0  ;;  %v4349_v16 = vpop.f32.mrb[36].mxu1 }
 0x3ea   : > { %8713 = vst [vmem:[%s12528_s25 + $0x480] sm:$0xff] %v2287_v19  ;;  %8715 = vst [vmem:[%s12528_s25 + $0x490] sm:$0xff] %v4349_v16  ;;  %v2289_v42 = vpop.f32.mrb[37].mxu0  ;;  %v4351_v38 = vpop.f32.mrb[37].mxu1  ;;  %5025 = vmatmul.mubr.f32.gmra.mrb[78].mxu0 %v10863_v60  ;;  %7087 = vmatmul.mubr.f32.gmra.mrb[78].mxu1 %v10863_v60 }
 0x3eb   : > { %8714 = vst [vmem:[%s12528_s25 + $0x488] sm:$0xff] %v2289_v42  ;;  %8716 = vst [vmem:[%s12528_s25 + $0x498] sm:$0xff] %v4351_v38  ;;  %5030 = vmatprep.mubr.f32.mxu0 %v13973_v61  ;;  %7092 = vmatprep.mubr.f32.mxu1 %v13973_v61 }
 0x3ed   : > { %v2294_v25 = vpop.f32.mrb[38].mxu0  ;;  %v4356_v44 = vpop.f32.mrb[38].mxu1 }
 0x3ee   : > { %8721 = vst [vmem:[%s12528_s25 + $0x4c0] sm:$0xff] %v2294_v25  ;;  %8723 = vst [vmem:[%s12528_s25 + $0x4d0] sm:$0xff] %v4356_v44  ;;  %v2296_v0 = vpop.f32.mrb[39].mxu0  ;;  %v4358_v63 = vpop.f32.mrb[39].mxu1  ;;  %5032 = vmatmul.mubr.f32.gmra.mrb[80].mxu0 %v10884_v12  ;;  %7094 = vmatmul.mubr.f32.gmra.mrb[80].mxu1 %v10884_v12 }
 0x3ef   : > { %8722 = vst [vmem:[%s12528_s25 + $0x4c8] sm:$0xff] %v2296_v0  ;;  %8724 = vst [vmem:[%s12528_s25 + $0x4d8] sm:$0xff] %v4358_v63  ;;  %5037 = vmatprep.mubr.f32.mxu0 %v13973_v61  ;;  %7099 = vmatprep.mubr.f32.mxu1 %v13973_v61 }
 0x3f1   : > { %v2301_v10 = vpop.f32.mrb[40].mxu0  ;;  %v4363_v3 = vpop.f32.mrb[40].mxu1 }
 0x3f2   : > { %8729 = vst [vmem:[%s12528_s25 + $0x500] sm:$0xff] %v2301_v10  ;;  %8731 = vst [vmem:[%s12528_s25 + $0x510] sm:$0xff] %v4363_v3  ;;  %v2303_v54 = vpop.f32.mrb[41].mxu0  ;;  %v4365_v20 = vpop.f32.mrb[41].mxu1  ;;  %5039 = vmatmul.mubr.f32.gmra.mrb[82].mxu0 %v10943_v18  ;;  %7101 = vmatmul.mubr.f32.gmra.mrb[82].mxu1 %v10943_v18 }
 0x3f3   : > { %8730 = vst [vmem:[%s12528_s25 + $0x508] sm:$0xff] %v2303_v54  ;;  %8732 = vst [vmem:[%s12528_s25 + $0x518] sm:$0xff] %v4365_v20  ;;  %5044 = vmatprep.mubr.f32.mxu0 %v13973_v61  ;;  %7106 = vmatprep.mubr.f32.mxu1 %v13973_v61 }
 0x3f5   : > { %v2308_v31 = vpop.f32.mrb[42].mxu0  ;;  %v4370_v48 = vpop.f32.mrb[42].mxu1 }
 0x3f6   : > { %8737 = vst [vmem:[%s12528_s25 + $0x540] sm:$0xff] %v2308_v31  ;;  %8739 = vst [vmem:[%s12528_s25 + $0x550] sm:$0xff] %v4370_v48  ;;  %v2310_v17 = vpop.f32.mrb[43].mxu0  ;;  %v4372_v46 = vpop.f32.mrb[43].mxu1  ;;  %5046 = vmatmul.mubr.f32.gmra.mrb[84].mxu0 %v10985_v36  ;;  %7108 = vmatmul.mubr.f32.gmra.mrb[84].mxu1 %v10985_v36 }
 0x3f7   : > { %8738 = vst [vmem:[%s12528_s25 + $0x548] sm:$0xff] %v2310_v17  ;;  %8740 = vst [vmem:[%s12528_s25 + $0x558] sm:$0xff] %v4372_v46  ;;  %5051 = vmatprep.mubr.f32.mxu0 %v13973_v61  ;;  %7113 = vmatprep.mubr.f32.mxu1 %v13973_v61 }
 0x3f9   : > { %v2315_v52 = vpop.f32.mrb[44].mxu0  ;;  %v4377_v27 = vpop.f32.mrb[44].mxu1 }
 0x3fa   : > { %8745 = vst [vmem:[%s12528_s25 + $0x580] sm:$0xff] %v2315_v52  ;;  %8747 = vst [vmem:[%s12528_s25 + $0x590] sm:$0xff] %v4377_v27  ;;  %v2317_v32 = vpop.f32.mrb[45].mxu0  ;;  %v4379_v28 = vpop.f32.mrb[45].mxu1  ;;  %5053 = vmatmul.mubr.f32.gmra.mrb[86].mxu0 %v10987_v15  ;;  %7115 = vmatmul.mubr.f32.gmra.mrb[86].mxu1 %v10987_v15 }
 0x3fb   : > { %8746 = vst [vmem:[%s12528_s25 + $0x588] sm:$0xff] %v2317_v32  ;;  %8748 = vst [vmem:[%s12528_s25 + $0x598] sm:$0xff] %v4379_v28  ;;  %5058 = vmatprep.mubr.f32.mxu0 %v13973_v61  ;;  %7120 = vmatprep.mubr.f32.mxu1 %v13973_v61 }
 0x3fd   : > { %v2322_v23 = vpop.f32.mrb[46].mxu0  ;;  %v4384_v40 = vpop.f32.mrb[46].mxu1 }
 0x3fe   : > { %8753 = vst [vmem:[%s12528_s25 + $0x5c0] sm:$0xff] %v2322_v23  ;;  %8755 = vst [vmem:[%s12528_s25 + $0x5d0] sm:$0xff] %v4384_v40  ;;  %v2324_v19 = vpop.f32.mrb[47].mxu0  ;;  %v4386_v16 = vpop.f32.mrb[47].mxu1  ;;  %5060 = vmatmul.mubr.f32.gmra.mrb[88].mxu0 %v11058_v35  ;;  %7122 = vmatmul.mubr.f32.gmra.mrb[88].mxu1 %v11058_v35 }
 0x3ff   : > { %8754 = vst [vmem:[%s12528_s25 + $0x5c8] sm:$0xff] %v2324_v19  ;;  %8756 = vst [vmem:[%s12528_s25 + $0x5d8] sm:$0xff] %v4386_v16  ;;  %5065 = vmatprep.mubr.f32.mxu0 %v13973_v61  ;;  %7127 = vmatprep.mubr.f32.mxu1 %v13973_v61 }
 0x401   : > { %v2329_v42 = vpop.f32.mrb[48].mxu0  ;;  %v4391_v38 = vpop.f32.mrb[48].mxu1 }
 0x402   : > { %8761 = vst [vmem:[%s12528_s25 + $0x600] sm:$0xff] %v2329_v42  ;;  %8763 = vst [vmem:[%s12528_s25 + $0x610] sm:$0xff] %v4391_v38  ;;  %v2331_v25 = vpop.f32.mrb[49].mxu0  ;;  %v4393_v44 = vpop.f32.mrb[49].mxu1  ;;  %5067 = vmatmul.mubr.f32.gmra.mrb[90].mxu0 %v11085_v45  ;;  %7129 = vmatmul.mubr.f32.gmra.mrb[90].mxu1 %v11085_v45 }
 0x403   : > { %8762 = vst [vmem:[%s12528_s25 + $0x608] sm:$0xff] %v2331_v25  ;;  %8764 = vst [vmem:[%s12528_s25 + $0x618] sm:$0xff] %v4393_v44  ;;  %5072 = vmatprep.mubr.f32.mxu0 %v13973_v61  ;;  %7134 = vmatprep.mubr.f32.mxu1 %v13973_v61 }
 0x405   : > { %v2336_v0 = vpop.f32.mrb[50].mxu0  ;;  %v4398_v63 = vpop.f32.mrb[50].mxu1 }
 0x406   : > { %8769 = vst [vmem:[%s12528_s25 + $0x640] sm:$0xff] %v2336_v0  ;;  %8771 = vst [vmem:[%s12528_s25 + $0x650] sm:$0xff] %v4398_v63  ;;  %v2338_v10 = vpop.f32.mrb[51].mxu0  ;;  %v4400_v3 = vpop.f32.mrb[51].mxu1  ;;  %5074 = vmatmul.mubr.f32.gmra.mrb[92].mxu0 %v11114_v1  ;;  %7136 = vmatmul.mubr.f32.gmra.mrb[92].mxu1 %v11114_v1 }
 0x407   : > { %8770 = vst [vmem:[%s12528_s25 + $0x648] sm:$0xff] %v2338_v10  ;;  %8772 = vst [vmem:[%s12528_s25 + $0x658] sm:$0xff] %v4400_v3  ;;  %5079 = vmatprep.mubr.f32.mxu0 %v13973_v61  ;;  %7141 = vmatprep.mubr.f32.mxu1 %v13973_v61 }
 0x409   : > { %v2343_v54 = vpop.f32.mrb[52].mxu0  ;;  %v4405_v20 = vpop.f32.mrb[52].mxu1 }
 0x40a   : > { %8777 = vst [vmem:[%s12528_s25 + $0x680] sm:$0xff] %v2343_v54  ;;  %8779 = vst [vmem:[%s12528_s25 + $0x690] sm:$0xff] %v4405_v20  ;;  %v2345_v31 = vpop.f32.mrb[53].mxu0  ;;  %v4407_v48 = vpop.f32.mrb[53].mxu1  ;;  %5081 = vmatmul.mubr.f32.gmra.mrb[94].mxu0 %v11147_v53  ;;  %7143 = vmatmul.mubr.f32.gmra.mrb[94].mxu1 %v11147_v53 }
 0x40b   : > { %8778 = vst [vmem:[%s12528_s25 + $0x688] sm:$0xff] %v2345_v31  ;;  %8780 = vst [vmem:[%s12528_s25 + $0x698] sm:$0xff] %v4407_v48  ;;  %5086 = vmatprep.mubr.f32.mxu0 %v13973_v61  ;;  %7148 = vmatprep.mubr.f32.mxu1 %v13973_v61  ;;  %v14238_v31 = vld [vmem:[#allocation73_spill] sm:$0xff] }
 0x40c   : > { %v14239_v48 = vld [vmem:[#allocation77_spill] sm:$0xff] }
 0x40d   : > { %v2350_v17 = vpop.f32.mrb[54].mxu0  ;;  %v4412_v46 = vpop.f32.mrb[54].mxu1 }
 0x40e   : > { %8785 = vst [vmem:[%s12528_s25 + $0x6c0] sm:$0xff] %v2350_v17  ;;  %8787 = vst [vmem:[%s12528_s25 + $0x6d0] sm:$0xff] %v4412_v46  ;;  %v2352_v52 = vpop.f32.mrb[55].mxu0  ;;  %v4414_v27 = vpop.f32.mrb[55].mxu1  ;;  %5088 = vmatmul.mubr.f32.gmra.mrb[96].mxu0 %v11172_v30  ;;  %7150 = vmatmul.mubr.f32.gmra.mrb[96].mxu1 %v11172_v30  ;;  %v14240_v17 = vld [vmem:[#allocation84_spill] sm:$0xff] }
 0x40f   : > { %8786 = vst [vmem:[%s12528_s25 + $0x6c8] sm:$0xff] %v2352_v52  ;;  %8788 = vst [vmem:[%s12528_s25 + $0x6d8] sm:$0xff] %v4414_v27  ;;  %5093 = vmatprep.mubr.f32.mxu0 %v13973_v61  ;;  %7155 = vmatprep.mubr.f32.mxu1 %v13973_v61  ;;  %v14241_v46 = vld [vmem:[#allocation88_spill] sm:$0xff] }
 0x410   : > { %v14242_v52 = vld [vmem:[#allocation92_spill] sm:$0xff] }
 0x411   : > { %v2357_v32 = vpop.f32.mrb[56].mxu0  ;;  %v4419_v28 = vpop.f32.mrb[56].mxu1  ;;  %v14243_v27 = vld [vmem:[#allocation96_spill] sm:$0xff] }
 0x412   : > { %8793 = vst [vmem:[%s12528_s25 + $0x700] sm:$0xff] %v2357_v32  ;;  %8795 = vst [vmem:[%s12528_s25 + $0x710] sm:$0xff] %v4419_v28  ;;  %v2359_v23 = vpop.f32.mrb[57].mxu0  ;;  %v4421_v40 = vpop.f32.mrb[57].mxu1  ;;  %5095 = vmatmul.mubr.f32.gmra.mrb[98].mxu0 %v11207_v14  ;;  %7157 = vmatmul.mubr.f32.gmra.mrb[98].mxu1 %v11207_v14  ;;  %v14244_v32 = vld [vmem:[#allocation97_spill] sm:$0xff] }
 0x413   : > { %8794 = vst [vmem:[%s12528_s25 + $0x708] sm:$0xff] %v2359_v23  ;;  %8796 = vst [vmem:[%s12528_s25 + $0x718] sm:$0xff] %v4421_v40  ;;  %5100 = vmatprep.mubr.f32.mxu0 %v13973_v61  ;;  %7162 = vmatprep.mubr.f32.mxu1 %v13973_v61  ;;  %v14245_v28 = vld [vmem:[#allocation101_spill] sm:$0xff]  ;;  %v14247_v40 = vld [vmem:[#allocation14_spill] sm:$0xff] }
 0x414   : > { %v14246_v23 = vld [vmem:[#allocation105_spill] sm:$0xff] }
 0x415   : > { %v2364_v19 = vpop.f32.mrb[58].mxu0  ;;  %v4426_v16 = vpop.f32.mrb[58].mxu1 }
 0x416   : > { %8801 = vst [vmem:[%s12528_s25 + $0x740] sm:$0xff] %v2364_v19  ;;  %8803 = vst [vmem:[%s12528_s25 + $0x750] sm:$0xff] %v4426_v16  ;;  %v2366_v42 = vpop.f32.mrb[59].mxu0  ;;  %v4428_v38 = vpop.f32.mrb[59].mxu1  ;;  %5102 = vmatmul.mubr.f32.gmra.mrb[100].mxu0 %v11212_v34  ;;  %7164 = vmatmul.mubr.f32.gmra.mrb[100].mxu1 %v11212_v34  ;;  %v14248_v19 = vld [vmem:[#allocation121_spill] sm:$0xff]  ;;  %v14249_v16 = vld [vmem:[#allocation122_spill] sm:$0xff] }
 0x417   : > { %8802 = vst [vmem:[%s12528_s25 + $0x748] sm:$0xff] %v2366_v42  ;;  %8804 = vst [vmem:[%s12528_s25 + $0x758] sm:$0xff] %v4428_v38  ;;  %5107 = vmatprep.mubr.f32.mxu0 %v13973_v61  ;;  %7169 = vmatprep.mubr.f32.mxu1 %v13973_v61  ;;  %v14250_v42 = vld [vmem:[#allocation123_spill] sm:$0xff]  ;;  %v14251_v38 = vld [vmem:[#allocation124_spill] sm:$0xff] }
 0x419   : > { %v2371_v25 = vpop.f32.mrb[60].mxu0  ;;  %v4433_v44 = vpop.f32.mrb[60].mxu1 }
 0x41a   : > { %8809 = vst [vmem:[%s12528_s25 + $0x780] sm:$0xff] %v2371_v25  ;;  %8811 = vst [vmem:[%s12528_s25 + $0x790] sm:$0xff] %v4433_v44  ;;  %v2373_v0 = vpop.f32.mrb[61].mxu0  ;;  %v4435_v63 = vpop.f32.mrb[61].mxu1  ;;  %5109 = vmatmul.mubr.f32.gmra.mrb[102].mxu0 %v11234_v49  ;;  %7171 = vmatmul.mubr.f32.gmra.mrb[102].mxu1 %v11234_v49  ;;  %v14252_v25 = vand.u32 4294901760, %v11979_v29  ;;  %v14253_v44 = vand.u32 4294901760, %v11981_v56 }
 0x41b   : > { %8810 = vst [vmem:[%s12528_s25 + $0x788] sm:$0xff] %v2373_v0  ;;  %8812 = vst [vmem:[%s12528_s25 + $0x798] sm:$0xff] %v4435_v63  ;;  %5114 = vmatprep.mubr.f32.mxu0 %v13973_v61  ;;  %7176 = vmatprep.mubr.f32.mxu1 %v13973_v61  ;;  %v14254_v63 = vand.u32 4294901760, %v11988_v47  ;;  %v14259_v56 = vld [vmem:[#allocation18_spill] sm:$0xff]  ;;  %v14261_v29 = vld [vmem:[#allocation23_spill] sm:$0xff] }
 0x41c   : > { %v9059_v0 = vpack.c.bf16 %v14253_v44, %v14252_v25  ;;  %v14262_v47 = vld [vmem:[#allocation25_spill] sm:$0xff]  ;;  %v14263_v25 = vld [vmem:[#allocation28_spill] sm:$0xff]  ;;  %v14264_v44 = vld [vmem:[#allocation31_spill] sm:$0xff] }
 0x41d   : > { %v2378_v10 = vpop.f32.mrb[62].mxu0  ;;  %v4440_v3 = vpop.f32.mrb[62].mxu1 }
 0x41e   : > { %8817 = vst [vmem:[%s12528_s25 + $0x7c0] sm:$0xff] %v2378_v10  ;;  %8819 = vst [vmem:[%s12528_s25 + $0x7d0] sm:$0xff] %v4440_v3  ;;  %v2380_v54 = vpop.f32.mrb[63].mxu0  ;;  %v4442_v20 = vpop.f32.mrb[63].mxu1  ;;  %5116 = vmatmul.mubr.f32.gmra.mrb[104].mxu0 %v11255_v26  ;;  %7178 = vmatmul.mubr.f32.gmra.mrb[104].mxu1 %v11255_v26  ;;  %v14255_v10 = vand.u32 4294901760, %v11990_v21  ;;  %v14260_v21 = vld [vmem:[#allocation20_spill] sm:$0xff] }
 0x41f   : > { %8818 = vst [vmem:[%s12528_s25 + $0x7c8] sm:$0xff] %v2380_v54  ;;  %8820 = vst [vmem:[%s12528_s25 + $0x7d8] sm:$0xff] %v4442_v20  ;;  %5121 = vmatprep.mubr.f32.mxu0 %v13973_v61  ;;  %7183 = vmatprep.mubr.f32.mxu1 %v13973_v61  ;;  %v14256_v54 = vld [vmem:[#allocation17_spill] sm:$0xff] }
 0x420   : > { %v9107_v3 = vpack.c.bf16 %v14255_v10, %v14254_v63  ;;  %v14257_v20 = vld [vmem:[#allocation125_spill] sm:$0xff]  ;;  %v14266_v63 = vld [vmem:[#allocation39_spill] sm:$0xff]  ;;  %v14267_v10 = vld [vmem:[#allocation42_spill] sm:$0xff] }
 0x422   : > { %5123 = vmatmul.mubr.f32.gmra.mrb[106].mxu0 %v11275_v50  ;;  %7185 = vmatmul.mubr.f32.gmra.mrb[106].mxu1 %v11275_v50 }
 0x423   : > { %5128 = vmatprep.mubr.f32.mxu0 %v13973_v61  ;;  %7190 = vmatprep.mubr.f32.mxu1 %v13973_v61 }
 0x426   : > { %5130 = vmatmul.mubr.f32.gmra.mrb[108].mxu0 %v14238_v31  ;;  %7192 = vmatmul.mubr.f32.gmra.mrb[108].mxu1 %v14238_v31 }
 0x427   : > { %5135 = vmatprep.mubr.f32.mxu0 %v13973_v61  ;;  %7197 = vmatprep.mubr.f32.mxu1 %v13973_v61 }
 0x42a   : > { %5137 = vmatmul.mubr.f32.gmra.mrb[110].mxu0 %v14239_v48  ;;  %7199 = vmatmul.mubr.f32.gmra.mrb[110].mxu1 %v14239_v48 }
 0x42b   : > { %5142 = vmatprep.mubr.f32.mxu0 %v13973_v61  ;;  %7204 = vmatprep.mubr.f32.mxu1 %v13973_v61 }
 0x42e   : > { %5144 = vmatmul.mubr.f32.gmra.mrb[112].mxu0 %v14240_v17  ;;  %7206 = vmatmul.mubr.f32.gmra.mrb[112].mxu1 %v14240_v17 }
 0x42f   : > { %5149 = vmatprep.mubr.f32.mxu0 %v13973_v61  ;;  %7211 = vmatprep.mubr.f32.mxu1 %v13973_v61 }
 0x432   : > { %5151 = vmatmul.mubr.f32.gmra.mrb[114].mxu0 %v14241_v46  ;;  %7213 = vmatmul.mubr.f32.gmra.mrb[114].mxu1 %v14241_v46 }
 0x433   : > { %5156 = vmatprep.mubr.f32.mxu0 %v13973_v61  ;;  %7218 = vmatprep.mubr.f32.mxu1 %v13973_v61 }
 0x436   : > { %5158 = vmatmul.mubr.f32.gmra.mrb[116].mxu0 %v14242_v52  ;;  %7220 = vmatmul.mubr.f32.gmra.mrb[116].mxu1 %v14242_v52 }
 0x437   : > { %5163 = vmatprep.mubr.f32.mxu0 %v13973_v61  ;;  %7225 = vmatprep.mubr.f32.mxu1 %v13973_v61 }
 0x43a   : > { %5165 = vmatmul.mubr.f32.gmra.mrb[118].mxu0 %v14243_v27  ;;  %7227 = vmatmul.mubr.f32.gmra.mrb[118].mxu1 %v14243_v27 }
 0x43b   : > { %5170 = vmatprep.mubr.f32.mxu0 %v13973_v61  ;;  %7232 = vmatprep.mubr.f32.mxu1 %v13973_v61 }
 0x43e   : > { %5172 = vmatmul.mubr.f32.gmra.mrb[120].mxu0 %v14244_v32  ;;  %7234 = vmatmul.mubr.f32.gmra.mrb[120].mxu1 %v14244_v32 }
 0x43f   : > { %5177 = vmatprep.mubr.f32.mxu0 %v13973_v61  ;;  %7239 = vmatprep.mubr.f32.mxu1 %v13973_v61 }
 0x442   : > { %5179 = vmatmul.mubr.f32.gmra.mrb[122].mxu0 %v14245_v28  ;;  %7241 = vmatmul.mubr.f32.gmra.mrb[122].mxu1 %v14245_v28 }
 0x443   : > { %5184 = vmatprep.mubr.f32.mxu0 %v13973_v61  ;;  %7246 = vmatprep.mubr.f32.mxu1 %v13973_v61 }
 0x446   : > { %5186 = vmatmul.mubr.f32.gmra.mrb[124].mxu0 %v14246_v23  ;;  %7248 = vmatmul.mubr.f32.gmra.mrb[124].mxu1 %v14246_v23  ;;  %v14297_v23 = vld [vmem:[#allocation15_spill] sm:$0xff] }
 0x447   : > { %5191 = vmatprep.mubr.f32.mxu0 %v13973_v61  ;;  %7253 = vmatprep.mubr.f32.mxu1 %v13973_v61 }
 0x44a   : > { %5193 = vmatmul.mubr.f32.gmra.mrb[126].mxu0 %v14203_v13  ;;  %7255 = vmatmul.mubr.f32.gmra.mrb[126].mxu1 %v14203_v13 }
 0x44b   : > { %5279 = vmatprep.mubr.f32.mxu0 %v13973_v61  ;;  %7341 = vmatprep.mubr.f32.mxu1 %v13973_v61 }
 0x44e   : > { %5282 = vmatmul.mubr.f32.vlgmr.msra.gmra.mrb[64].mxu0 %v14247_v40  ;;  %7344 = vmatmul.mubr.f32.vlgmr.msra.gmra.mrb[64].mxu1 %v14247_v40  ;;  %v14258_v40 = vld [vmem:[#allocation126_spill] sm:$0xff] }
 0x44f   : > { %9054 = vmatpush1.bf16.msra.mxu0 %v14248_v19  ;;  %9102 = vmatpush1.bf16.msra.mxu1 %v14249_v16 }
 0x450   : > { %5287 = vmatprep.mubr.f32.mxu0 %v13973_v61  ;;  %7349 = vmatprep.mubr.f32.mxu1 %v13973_v61 }
 0x451   : > { %9056 = vmatprep.subr.bf16.mxu0 %v14250_v42  ;;  %9104 = vmatprep.subr.bf16.mxu1 %v14251_v38 }
 0x452   : > { %5290 = vmatmul.mubr.f32.gmra.mrb[66].mxu0 %v14256_v54  ;;  %7352 = vmatmul.mubr.f32.gmra.mrb[66].mxu1 %v14256_v54  ;;  %v14269_v54 = vld [vmem:[#allocation48_spill] sm:$0xff] }
 0x453   : > { %5295 = vmatprep.mubr.f32.mxu0 %v13973_v61  ;;  %7357 = vmatprep.mubr.f32.mxu1 %v13973_v61 }
 0x454   : > { %9058 = vmatpush1.bf16.msra.mxu0 %v14257_v20  ;;  %9106 = vmatpush1.bf16.msra.mxu1 %v14258_v40 }
 0x455   : > { %9060 = vmatprep.subr.bf16.mxu0 %v9059_v0  ;;  %9108 = vmatprep.subr.bf16.mxu1 %v9107_v3  ;;  %v14265_v0 = vld [vmem:[#allocation35_spill] sm:$0xff] }
 0x456   : > { %5298 = vmatmul.mubr.f32.gmra.mrb[68].mxu0 %v14259_v56  ;;  %7360 = vmatmul.mubr.f32.gmra.mrb[68].mxu1 %v14259_v56  ;;  %v14268_v3 = vld [vmem:[#allocation43_spill] sm:$0xff]  ;;  %v14270_v56 = vld [vmem:[#allocation49_spill] sm:$0xff] }
 0x457   : > { %5303 = vmatprep.mubr.f32.mxu0 %v13973_v61  ;;  %7365 = vmatprep.mubr.f32.mxu1 %v13973_v61 }
 0x45a   : > { %5306 = vmatmul.mubr.f32.gmra.mrb[70].mxu0 %v14260_v21  ;;  %7368 = vmatmul.mubr.f32.gmra.mrb[70].mxu1 %v14260_v21  ;;  %v14271_v21 = vld [vmem:[#allocation53_spill] sm:$0xff] }
 0x45b   : > { %5311 = vmatprep.mubr.f32.mxu0 %v13973_v61  ;;  %7373 = vmatprep.mubr.f32.mxu1 %v13973_v61 }
 0x45e   : > { %5314 = vmatmul.mubr.f32.gmra.mrb[72].mxu0 %v14261_v29  ;;  %7376 = vmatmul.mubr.f32.gmra.mrb[72].mxu1 %v14261_v29  ;;  %v14272_v29 = vld [vmem:[#allocation55_spill] sm:$0xff] }
 0x45f   : > { %5319 = vmatprep.mubr.f32.mxu0 %v13973_v61  ;;  %7381 = vmatprep.mubr.f32.mxu1 %v13973_v61 }
 0x462   : > { %5322 = vmatmul.mubr.f32.gmra.mrb[74].mxu0 %v14262_v47  ;;  %7384 = vmatmul.mubr.f32.gmra.mrb[74].mxu1 %v14262_v47  ;;  %v14273_v47 = vld [vmem:[#allocation60_spill] sm:$0xff] }
 0x463   : > { %5327 = vmatprep.mubr.f32.mxu0 %v13973_v61  ;;  %7389 = vmatprep.mubr.f32.mxu1 %v13973_v61 }
 0x466   : > { %5330 = vmatmul.mubr.f32.gmra.mrb[76].mxu0 %v14263_v25  ;;  %7392 = vmatmul.mubr.f32.gmra.mrb[76].mxu1 %v14263_v25  ;;  %v14274_v25 = vld [vmem:[#allocation63_spill] sm:$0xff] }
 0x467   : > { %5335 = vmatprep.mubr.f32.mxu0 %v13973_v61  ;;  %7397 = vmatprep.mubr.f32.mxu1 %v13973_v61 }
 0x46a   : > { %5338 = vmatmul.mubr.f32.gmra.mrb[78].mxu0 %v14264_v44  ;;  %7400 = vmatmul.mubr.f32.gmra.mrb[78].mxu1 %v14264_v44  ;;  %v14275_v44 = vld [vmem:[#allocation64_spill] sm:$0xff] }
 0x46b   : > { %5343 = vmatprep.mubr.f32.mxu0 %v13973_v61  ;;  %7405 = vmatprep.mubr.f32.mxu1 %v13973_v61 }
 0x46e   : > { %5346 = vmatmul.mubr.f32.gmra.mrb[80].mxu0 %v14265_v0  ;;  %7408 = vmatmul.mubr.f32.gmra.mrb[80].mxu1 %v14265_v0  ;;  %v14276_v0 = vld [vmem:[#allocation68_spill] sm:$0xff] }
 0x46f   : > { %5351 = vmatprep.mubr.f32.mxu0 %v13973_v61  ;;  %7413 = vmatprep.mubr.f32.mxu1 %v13973_v61 }
 0x472   : > { %5354 = vmatmul.mubr.f32.gmra.mrb[82].mxu0 %v14266_v63  ;;  %7416 = vmatmul.mubr.f32.gmra.mrb[82].mxu1 %v14266_v63  ;;  %v14277_v63 = vld [vmem:[#allocation71_spill] sm:$0xff] }
 0x473   : > { %5359 = vmatprep.mubr.f32.mxu0 %v13973_v61  ;;  %7421 = vmatprep.mubr.f32.mxu1 %v13973_v61 }
 0x476   : > { %5362 = vmatmul.mubr.f32.gmra.mrb[84].mxu0 %v14267_v10  ;;  %7424 = vmatmul.mubr.f32.gmra.mrb[84].mxu1 %v14267_v10  ;;  %v14278_v10 = vld [vmem:[#allocation76_spill] sm:$0xff] }
 0x477   : > { %5367 = vmatprep.mubr.f32.mxu0 %v13973_v61  ;;  %7429 = vmatprep.mubr.f32.mxu1 %v13973_v61 }
 0x47a   : > { %5370 = vmatmul.mubr.f32.gmra.mrb[86].mxu0 %v14268_v3  ;;  %7432 = vmatmul.mubr.f32.gmra.mrb[86].mxu1 %v14268_v3  ;;  %v14279_v3 = vld [vmem:[#allocation80_spill] sm:$0xff] }
 0x47b   : > { %5375 = vmatprep.mubr.f32.mxu0 %v13973_v61  ;;  %7437 = vmatprep.mubr.f32.mxu1 %v13973_v61 }
 0x47e   : > { %5378 = vmatmul.mubr.f32.gmra.mrb[88].mxu0 %v14269_v54  ;;  %7440 = vmatmul.mubr.f32.gmra.mrb[88].mxu1 %v14269_v54  ;;  %v14280_v54 = vld [vmem:[#allocation81_spill] sm:$0xff] }
 0x47f   : > { %5383 = vmatprep.mubr.f32.mxu0 %v13973_v61  ;;  %7445 = vmatprep.mubr.f32.mxu1 %v13973_v61 }
 0x482   : > { %5386 = vmatmul.mubr.f32.gmra.mrb[90].mxu0 %v14270_v56  ;;  %7448 = vmatmul.mubr.f32.gmra.mrb[90].mxu1 %v14270_v56  ;;  %v14281_v56 = vld [vmem:[#allocation87_spill] sm:$0xff] }
 0x483   : > { %5391 = vmatprep.mubr.f32.mxu0 %v13973_v61  ;;  %7453 = vmatprep.mubr.f32.mxu1 %v13973_v61 }
 0x486   : > { %5394 = vmatmul.mubr.f32.gmra.mrb[92].mxu0 %v14271_v21  ;;  %7456 = vmatmul.mubr.f32.gmra.mrb[92].mxu1 %v14271_v21  ;;  %v14282_v21 = vld [vmem:[#allocation91_spill] sm:$0xff] }
 0x487   : > { %5399 = vmatprep.mubr.f32.mxu0 %v13973_v61  ;;  %7461 = vmatprep.mubr.f32.mxu1 %v13973_v61 }
 0x48a   : > { %5402 = vmatmul.mubr.f32.gmra.mrb[94].mxu0 %v14272_v29  ;;  %7464 = vmatmul.mubr.f32.gmra.mrb[94].mxu1 %v14272_v29  ;;  %v14283_v29 = vld [vmem:[#allocation95_spill] sm:$0xff] }
 0x48b   : > { %5407 = vmatprep.mubr.f32.mxu0 %v13973_v61  ;;  %7469 = vmatprep.mubr.f32.mxu1 %v13973_v61 }
 0x48e   : > { %5410 = vmatmul.mubr.f32.gmra.mrb[96].mxu0 %v14273_v47  ;;  %7472 = vmatmul.mubr.f32.gmra.mrb[96].mxu1 %v14273_v47  ;;  %v14284_v47 = vld [vmem:[#allocation100_spill] sm:$0xff] }
 0x48f   : > { %5415 = vmatprep.mubr.f32.mxu0 %v13973_v61  ;;  %7477 = vmatprep.mubr.f32.mxu1 %v13973_v61 }
 0x492   : > { %5418 = vmatmul.mubr.f32.gmra.mrb[98].mxu0 %v14274_v25  ;;  %7480 = vmatmul.mubr.f32.gmra.mrb[98].mxu1 %v14274_v25  ;;  %v14285_v25 = vld [vmem:[#allocation104_spill] sm:$0xff] }
 0x493   : > { %5423 = vmatprep.mubr.f32.mxu0 %v13973_v61  ;;  %7485 = vmatprep.mubr.f32.mxu1 %v13973_v61 }
 0x496   : > { %5426 = vmatmul.mubr.f32.gmra.mrb[100].mxu0 %v14275_v44  ;;  %7488 = vmatmul.mubr.f32.gmra.mrb[100].mxu1 %v14275_v44  ;;  %v14286_v44 = vld [vmem:[#allocation108_spill] sm:$0xff] }
 0x497   : > { %5431 = vmatprep.mubr.f32.mxu0 %v13973_v61  ;;  %7493 = vmatprep.mubr.f32.mxu1 %v13973_v61 }
 0x49a   : > { %5434 = vmatmul.mubr.f32.gmra.mrb[102].mxu0 %v14276_v0  ;;  %7496 = vmatmul.mubr.f32.gmra.mrb[102].mxu1 %v14276_v0  ;;  %v14287_v0 = vld [vmem:[#allocation112_spill] sm:$0xff] }
 0x49b   : > { %5439 = vmatprep.mubr.f32.mxu0 %v13973_v61  ;;  %7501 = vmatprep.mubr.f32.mxu1 %v13973_v61 }
 0x49e   : > { %5442 = vmatmul.mubr.f32.gmra.mrb[104].mxu0 %v14277_v63  ;;  %7504 = vmatmul.mubr.f32.gmra.mrb[104].mxu1 %v14277_v63  ;;  %v14288_v63 = vld [vmem:[#allocation115_spill] sm:$0xff] }
 0x49f   : > { %5447 = vmatprep.mubr.f32.mxu0 %v13973_v61  ;;  %7509 = vmatprep.mubr.f32.mxu1 %v13973_v61 }
 0x4a2   : > { %5450 = vmatmul.mubr.f32.gmra.mrb[106].mxu0 %v14278_v10  ;;  %7512 = vmatmul.mubr.f32.gmra.mrb[106].mxu1 %v14278_v10  ;;  %v14289_v10 = vand.u32 4294901760, %v11998_v41  ;;  %v14298_v41 = vand.u32 4294901760, %v14190_v55  ;;  %v14305_v55 = vld [vmem:[#allocation27_spill] sm:$0xff] }
 0x4a3   : > { %5455 = vmatprep.mubr.f32.mxu0 %v13973_v61  ;;  %7517 = vmatprep.mubr.f32.mxu1 %v13973_v61 }
 0x4a6   : > { %5458 = vmatmul.mubr.f32.gmra.mrb[108].mxu0 %v14279_v3  ;;  %7520 = vmatmul.mubr.f32.gmra.mrb[108].mxu1 %v14279_v3  ;;  %v14290_v3 = vand.u32 4294901760, %v12003_v4  ;;  %v14299_v4 = vand.u32 4294901760, %v14191_v59  ;;  %v14303_v59 = vld [vmem:[#allocation21_spill] sm:$0xff] }
 0x4a7   : > { %5463 = vmatprep.mubr.f32.mxu0 %v13973_v61  ;;  %7525 = vmatprep.mubr.f32.mxu1 %v13973_v61 }
 0x4aa   : > { %5466 = vmatmul.mubr.f32.gmra.mrb[110].mxu0 %v14280_v54  ;;  %7528 = vmatmul.mubr.f32.gmra.mrb[110].mxu1 %v14280_v54  ;;  %v9061_v54 = vpack.c.bf16 %v14290_v3, %v14289_v10  ;;  %v14312_v10 = vld [vmem:[#allocation47_spill] sm:$0xff] }
 0x4ab   : > { %5471 = vmatprep.mubr.f32.mxu0 %v13973_v61  ;;  %7533 = vmatprep.mubr.f32.mxu1 %v13973_v61  ;;  %v14313_v3 = vld [vmem:[#allocation51_spill] sm:$0xff] }
 0x4ae   : > { %5474 = vmatmul.mubr.f32.gmra.mrb[112].mxu0 %v14281_v56  ;;  %7536 = vmatmul.mubr.f32.gmra.mrb[112].mxu1 %v14281_v56  ;;  %v14291_v56 = vand.u32 4294901760, %v12010_v2  ;;  %v9065_v2 = vpack.c.bf16 %v14299_v4, %v14298_v41  ;;  %v14323_v41 = vld [vmem:[#allocation83_spill] sm:$0xff]  ;;  %v14324_v4 = vld [vmem:[#allocation85_spill] sm:$0xff] }
 0x4af   : > { %5479 = vmatprep.mubr.f32.mxu0 %v13973_v61  ;;  %7541 = vmatprep.mubr.f32.mxu1 %v13973_v61 }
 0x4b2   : > { %5482 = vmatmul.mubr.f32.gmra.mrb[114].mxu0 %v14282_v21  ;;  %7544 = vmatmul.mubr.f32.gmra.mrb[114].mxu1 %v14282_v21  ;;  %v14292_v21 = vand.u32 4294901760, %v12015_v39  ;;  %v14301_v39 = vand.u32 4294901760, %v14193_v57  ;;  %v14306_v57 = vld [vmem:[#allocation29_spill] sm:$0xff] }
 0x4b3   : > { %5487 = vmatprep.mubr.f32.mxu0 %v13973_v61  ;;  %7549 = vmatprep.mubr.f32.mxu1 %v13973_v61 }
 0x4b6   : > { %5490 = vmatmul.mubr.f32.gmra.mrb[116].mxu0 %v14283_v29  ;;  %7552 = vmatmul.mubr.f32.gmra.mrb[116].mxu1 %v14283_v29  ;;  %v9109_v29 = vpack.c.bf16 %v14292_v21, %v14291_v56  ;;  %v14315_v56 = vld [vmem:[#allocation57_spill] sm:$0xff]  ;;  %v14316_v21 = vld [vmem:[#allocation58_spill] sm:$0xff] }
 0x4b7   : > { %5495 = vmatprep.mubr.f32.mxu0 %v13973_v61  ;;  %7557 = vmatprep.mubr.f32.mxu1 %v13973_v61 }
 0x4ba   : > { %5498 = vmatmul.mubr.f32.gmra.mrb[118].mxu0 %v14284_v47  ;;  %7560 = vmatmul.mubr.f32.gmra.mrb[118].mxu1 %v14284_v47  ;;  %v14293_v47 = vand.u32 4294901760, %v12103_v7 }
 0x4bb   : > { %5503 = vmatprep.mubr.f32.mxu0 %v13973_v61  ;;  %7565 = vmatprep.mubr.f32.mxu1 %v13973_v61 }
 0x4be   : > { %5506 = vmatmul.mubr.f32.gmra.mrb[120].mxu0 %v14285_v25  ;;  %7568 = vmatmul.mubr.f32.gmra.mrb[120].mxu1 %v14285_v25  ;;  %v14294_v25 = vand.u32 4294901760, %v12108_v43  ;;  %v14302_v43 = vld [vmem:[#allocation19_spill] sm:$0xff] }
 0x4bf   : > { %5511 = vmatprep.mubr.f32.mxu0 %v13973_v61  ;;  %7573 = vmatprep.mubr.f32.mxu1 %v13973_v61 }
 0x4c2   : > { %5514 = vmatmul.mubr.f32.gmra.mrb[122].mxu0 %v14286_v44  ;;  %7576 = vmatmul.mubr.f32.gmra.mrb[122].mxu1 %v14286_v44  ;;  %v9063_v44 = vpack.c.bf16 %v14294_v25, %v14293_v47  ;;  %v14318_v47 = vld [vmem:[#allocation66_spill] sm:$0xff]  ;;  %v14319_v25 = vld [vmem:[#allocation67_spill] sm:$0xff] }
 0x4c3   : > { %5519 = vmatprep.mubr.f32.mxu0 %v13973_v61  ;;  %7581 = vmatprep.mubr.f32.mxu1 %v13973_v61 }
 0x4c6   : > { %5522 = vmatmul.mubr.f32.gmra.mrb[124].mxu0 %v14287_v0  ;;  %7584 = vmatmul.mubr.f32.gmra.mrb[124].mxu1 %v14287_v0  ;;  %v14295_v0 = vand.u32 4294901760, %v12113_v22  ;;  %v14300_v22 = vand.u32 4294901760, %v14192_v58  ;;  %v14308_v58 = vld [vmem:[#allocation34_spill] sm:$0xff] }
 0x4c7   : > { %5527 = vmatprep.mubr.f32.mxu0 %v13973_v61  ;;  %7589 = vmatprep.mubr.f32.mxu1 %v13973_v61 }
 0x4c8   : > { %v9113_v7 = vpack.c.bf16 %v14301_v39, %v14300_v22  ;;  %v14326_v22 = vld [vmem:[#allocation94_spill] sm:$0xff]  ;;  %v14327_v39 = vld [vmem:[#allocation99_spill] sm:$0xff] }
 0x4ca   : > { %5530 = vmatmul.mubr.f32.gmra.mrb[126].mxu0 %v14288_v63  ;;  %7592 = vmatmul.mubr.f32.gmra.mrb[126].mxu1 %v14288_v63  ;;  %v14296_v63 = vand.u32 4294901760, %v14188_v5  ;;  %v14307_v5 = vld [vmem:[#allocation32_spill] sm:$0xff] }
 0x4cb   : > { %5608 = vmatprep.mubr.f32.mxu0 %v13973_v61  ;;  %7670 = vmatprep.mubr.f32.mxu1 %v13973_v61 }
 0x4cc   : > { %v9111_v13 = vpack.c.bf16 %v14296_v63, %v14295_v0  ;;  %v14321_v0 = vld [vmem:[#allocation75_spill] sm:$0xff] }
 0x4cd   : > { %v14322_v63 = vld [vmem:[#allocation79_spill] sm:$0xff] }
 0x4ce   : > { %5612 = vmatmul.mubr.f32.vlgmr.msra.gmra.mrb[64].mxu0 %v14297_v23  ;;  %7674 = vmatmul.mubr.f32.vlgmr.msra.gmra.mrb[64].mxu1 %v14297_v23  ;;  %v14311_v23 = vld [vmem:[#allocation45_spill] sm:$0xff] }
 0x4cf   : > { %9062 = vmatpush1.bf16.msra.mxu0 %v9061_v54  ;;  %9110 = vmatpush1.bf16.msra.mxu1 %v9109_v29  ;;  %v14314_v54 = vld [vmem:[#allocation52_spill] sm:$0xff]  ;;  %v14317_v29 = vld [vmem:[#allocation62_spill] sm:$0xff] }
 0x4d0   : > { %5617 = vmatprep.mubr.f32.mxu0 %v13973_v61  ;;  %7679 = vmatprep.mubr.f32.mxu1 %v13973_v61 }
 0x4d1   : > { %9064 = vmatprep.subr.bf16.mxu0 %v9063_v44  ;;  %9112 = vmatprep.subr.bf16.mxu1 %v9111_v13  ;;  %v14304_v13 = vld [vmem:[#allocation22_spill] sm:$0xff] }
 0x4d2   : > { %5621 = vmatmul.mubr.f32.gmra.mrb[66].mxu0 %v14302_v43  ;;  %7683 = vmatmul.mubr.f32.gmra.mrb[66].mxu1 %v14302_v43  ;;  %v14320_v44 = vld [vmem:[#allocation70_spill] sm:$0xff]  ;;  %v14329_v43 = vld [vmem:[#allocation107_spill] sm:$0xff] }
 0x4d3   : > { %5626 = vmatprep.mubr.f32.mxu0 %v13973_v61  ;;  %7688 = vmatprep.mubr.f32.mxu1 %v13973_v61 }
 0x4d4   : > { %9066 = vmatpush1.bf16.msra.mxu0 %v9065_v2  ;;  %9114 = vmatpush1.bf16.msra.mxu1 %v9113_v7  ;;  %v14325_v2 = vld [vmem:[#allocation90_spill] sm:$0xff]  ;;  %v14328_v7 = vld [vmem:[#allocation103_spill] sm:$0xff] }
 0x4d5   : > { %9068 = vmatprep.subr.bf16.mxu0 %v14236_v11  ;;  %9116 = vmatprep.subr.bf16.mxu1 %v14237_v33  ;;  %v14309_v11 = vld [vmem:[#allocation37_spill] sm:$0xff] }
 0x4d6   : > { %5630 = vmatmul.mubr.f32.gmra.mrb[68].mxu0 %v14303_v59  ;;  %7692 = vmatmul.mubr.f32.gmra.mrb[68].mxu1 %v14303_v59  ;;  %v14310_v33 = vld [vmem:[#allocation41_spill] sm:$0xff]  ;;  %v14330_v59 = vld [vmem:[#allocation111_spill] sm:$0xff] }
 0x4d7   : > { %5635 = vmatprep.mubr.f32.mxu0 %v13973_v61  ;;  %7697 = vmatprep.mubr.f32.mxu1 %v13973_v61 }
 0x4da   : > { %5639 = vmatmul.mubr.f32.gmra.mrb[70].mxu0 %v14304_v13  ;;  %7701 = vmatmul.mubr.f32.gmra.mrb[70].mxu1 %v14304_v13  ;;  %v14331_v13 = vld [vmem:[#allocation114_spill] sm:$0xff] }
 0x4db   : > { %5644 = vmatprep.mubr.f32.mxu0 %v13973_v61  ;;  %7706 = vmatprep.mubr.f32.mxu1 %v13973_v61 }
 0x4de   : > { %5648 = vmatmul.mubr.f32.gmra.mrb[72].mxu0 %v14305_v55  ;;  %7710 = vmatmul.mubr.f32.gmra.mrb[72].mxu1 %v14305_v55  ;;  %v14332_v55 = vld [vmem:[#allocation117_spill] sm:$0xff] }
 0x4df   : > { %5653 = vmatprep.mubr.f32.mxu0 %v13973_v61  ;;  %7715 = vmatprep.mubr.f32.mxu1 %v13973_v61 }
 0x4e2   : > { %5657 = vmatmul.mubr.f32.gmra.mrb[74].mxu0 %v14306_v57  ;;  %7719 = vmatmul.mubr.f32.gmra.mrb[74].mxu1 %v14306_v57 }
 0x4e3   : > { %5662 = vmatprep.mubr.f32.mxu0 %v13973_v61  ;;  %7724 = vmatprep.mubr.f32.mxu1 %v13973_v61 }
 0x4e6   : > { %5666 = vmatmul.mubr.f32.gmra.mrb[76].mxu0 %v14307_v5  ;;  %7728 = vmatmul.mubr.f32.gmra.mrb[76].mxu1 %v14307_v5 }
 0x4e7   : > { %5671 = vmatprep.mubr.f32.mxu0 %v13973_v61  ;;  %7733 = vmatprep.mubr.f32.mxu1 %v13973_v61 }
 0x4ea   : > { %5675 = vmatmul.mubr.f32.gmra.mrb[78].mxu0 %v14308_v58  ;;  %7737 = vmatmul.mubr.f32.gmra.mrb[78].mxu1 %v14308_v58 }
 0x4eb   : > { %5680 = vmatprep.mubr.f32.mxu0 %v13973_v61  ;;  %7742 = vmatprep.mubr.f32.mxu1 %v13973_v61 }
 0x4ee   : > { %5684 = vmatmul.mubr.f32.gmra.mrb[80].mxu0 %v14309_v11  ;;  %7746 = vmatmul.mubr.f32.gmra.mrb[80].mxu1 %v14309_v11 }
 0x4ef   : > { %5689 = vmatprep.mubr.f32.mxu0 %v13973_v61  ;;  %7751 = vmatprep.mubr.f32.mxu1 %v13973_v61 }
 0x4f2   : > { %5693 = vmatmul.mubr.f32.gmra.mrb[82].mxu0 %v14310_v33  ;;  %7755 = vmatmul.mubr.f32.gmra.mrb[82].mxu1 %v14310_v33 }
 0x4f3   : > { %5698 = vmatprep.mubr.f32.mxu0 %v13973_v61  ;;  %7760 = vmatprep.mubr.f32.mxu1 %v13973_v61 }
 0x4f6   : > { %5702 = vmatmul.mubr.f32.gmra.mrb[84].mxu0 %v14311_v23  ;;  %7764 = vmatmul.mubr.f32.gmra.mrb[84].mxu1 %v14311_v23 }
 0x4f7   : > { %5707 = vmatprep.mubr.f32.mxu0 %v13973_v61  ;;  %7769 = vmatprep.mubr.f32.mxu1 %v13973_v61 }
 0x4fa   : > { %5711 = vmatmul.mubr.f32.gmra.mrb[86].mxu0 %v14312_v10  ;;  %7773 = vmatmul.mubr.f32.gmra.mrb[86].mxu1 %v14312_v10 }
 0x4fb   : > { %5716 = vmatprep.mubr.f32.mxu0 %v13973_v61  ;;  %7778 = vmatprep.mubr.f32.mxu1 %v13973_v61 }
 0x4fe   : > { %5720 = vmatmul.mubr.f32.gmra.mrb[88].mxu0 %v14313_v3  ;;  %7782 = vmatmul.mubr.f32.gmra.mrb[88].mxu1 %v14313_v3 }
 0x4ff   : > { %5725 = vmatprep.mubr.f32.mxu0 %v13973_v61  ;;  %7787 = vmatprep.mubr.f32.mxu1 %v13973_v61 }
 0x502   : > { %5729 = vmatmul.mubr.f32.gmra.mrb[90].mxu0 %v14314_v54  ;;  %7791 = vmatmul.mubr.f32.gmra.mrb[90].mxu1 %v14314_v54 }
 0x503   : > { %5734 = vmatprep.mubr.f32.mxu0 %v13973_v61  ;;  %7796 = vmatprep.mubr.f32.mxu1 %v13973_v61 }
 0x506   : > { %5738 = vmatmul.mubr.f32.gmra.mrb[92].mxu0 %v14315_v56  ;;  %7800 = vmatmul.mubr.f32.gmra.mrb[92].mxu1 %v14315_v56 }
 0x507   : > { %5743 = vmatprep.mubr.f32.mxu0 %v13973_v61  ;;  %7805 = vmatprep.mubr.f32.mxu1 %v13973_v61 }
 0x50a   : > { %5747 = vmatmul.mubr.f32.gmra.mrb[94].mxu0 %v14316_v21  ;;  %7809 = vmatmul.mubr.f32.gmra.mrb[94].mxu1 %v14316_v21 }
 0x50b   : > { %5752 = vmatprep.mubr.f32.mxu0 %v13973_v61  ;;  %7814 = vmatprep.mubr.f32.mxu1 %v13973_v61 }
 0x50e   : > { %5756 = vmatmul.mubr.f32.gmra.mrb[96].mxu0 %v14317_v29  ;;  %7818 = vmatmul.mubr.f32.gmra.mrb[96].mxu1 %v14317_v29 }
 0x50f   : > { %5761 = vmatprep.mubr.f32.mxu0 %v13973_v61  ;;  %7823 = vmatprep.mubr.f32.mxu1 %v13973_v61 }
 0x512   : > { %5765 = vmatmul.mubr.f32.gmra.mrb[98].mxu0 %v14318_v47  ;;  %7827 = vmatmul.mubr.f32.gmra.mrb[98].mxu1 %v14318_v47 }
 0x513   : > { %5770 = vmatprep.mubr.f32.mxu0 %v13973_v61  ;;  %7832 = vmatprep.mubr.f32.mxu1 %v13973_v61 }
 0x516   : > { %5774 = vmatmul.mubr.f32.gmra.mrb[100].mxu0 %v14319_v25  ;;  %7836 = vmatmul.mubr.f32.gmra.mrb[100].mxu1 %v14319_v25 }
 0x517   : > { %5779 = vmatprep.mubr.f32.mxu0 %v13973_v61  ;;  %7841 = vmatprep.mubr.f32.mxu1 %v13973_v61 }
 0x51a   : > { %5783 = vmatmul.mubr.f32.gmra.mrb[102].mxu0 %v14320_v44  ;;  %7845 = vmatmul.mubr.f32.gmra.mrb[102].mxu1 %v14320_v44 }
 0x51b   : > { %5788 = vmatprep.mubr.f32.mxu0 %v13973_v61  ;;  %7850 = vmatprep.mubr.f32.mxu1 %v13973_v61 }
 0x51e   : > { %5792 = vmatmul.mubr.f32.gmra.mrb[104].mxu0 %v14321_v0  ;;  %7854 = vmatmul.mubr.f32.gmra.mrb[104].mxu1 %v14321_v0 }
 0x51f   : > { %5797 = vmatprep.mubr.f32.mxu0 %v13973_v61  ;;  %7859 = vmatprep.mubr.f32.mxu1 %v13973_v61 }
 0x522   : > { %5801 = vmatmul.mubr.f32.gmra.mrb[106].mxu0 %v14322_v63  ;;  %7863 = vmatmul.mubr.f32.gmra.mrb[106].mxu1 %v14322_v63 }
 0x523   : > { %5806 = vmatprep.mubr.f32.mxu0 %v13973_v61  ;;  %7868 = vmatprep.mubr.f32.mxu1 %v13973_v61 }
 0x526   : > { %5810 = vmatmul.mubr.f32.gmra.mrb[108].mxu0 %v14323_v41  ;;  %7872 = vmatmul.mubr.f32.gmra.mrb[108].mxu1 %v14323_v41 }
 0x527   : > { %5815 = vmatprep.mubr.f32.mxu0 %v13973_v61  ;;  %7877 = vmatprep.mubr.f32.mxu1 %v13973_v61 }
 0x52a   : > { %5819 = vmatmul.mubr.f32.gmra.mrb[110].mxu0 %v14324_v4  ;;  %7881 = vmatmul.mubr.f32.gmra.mrb[110].mxu1 %v14324_v4 }
 0x52b   : > { %5824 = vmatprep.mubr.f32.mxu0 %v13973_v61  ;;  %7886 = vmatprep.mubr.f32.mxu1 %v13973_v61 }
 0x52e   : > { %5828 = vmatmul.mubr.f32.gmra.mrb[112].mxu0 %v14325_v2  ;;  %7890 = vmatmul.mubr.f32.gmra.mrb[112].mxu1 %v14325_v2 }
 0x52f   : > { %5833 = vmatprep.mubr.f32.mxu0 %v13973_v61  ;;  %7895 = vmatprep.mubr.f32.mxu1 %v13973_v61 }
 0x532   : > { %5837 = vmatmul.mubr.f32.gmra.mrb[114].mxu0 %v14326_v22  ;;  %7899 = vmatmul.mubr.f32.gmra.mrb[114].mxu1 %v14326_v22 }
 0x533   : > { %5842 = vmatprep.mubr.f32.mxu0 %v13973_v61  ;;  %7904 = vmatprep.mubr.f32.mxu1 %v13973_v61 }
 0x536   : > { %5846 = vmatmul.mubr.f32.gmra.mrb[116].mxu0 %v14327_v39  ;;  %7908 = vmatmul.mubr.f32.gmra.mrb[116].mxu1 %v14327_v39 }
 0x537   : > { %5851 = vmatprep.mubr.f32.mxu0 %v13973_v61  ;;  %7913 = vmatprep.mubr.f32.mxu1 %v13973_v61 }
 0x53a   : > { %5855 = vmatmul.mubr.f32.gmra.mrb[118].mxu0 %v14328_v7  ;;  %7917 = vmatmul.mubr.f32.gmra.mrb[118].mxu1 %v14328_v7 }
 0x53b   : > { %5860 = vmatprep.mubr.f32.mxu0 %v13973_v61  ;;  %7922 = vmatprep.mubr.f32.mxu1 %v13973_v61 }
 0x53e   : > { %5864 = vmatmul.mubr.f32.gmra.mrb[120].mxu0 %v14329_v43  ;;  %7926 = vmatmul.mubr.f32.gmra.mrb[120].mxu1 %v14329_v43 }
 0x53f   : > { %5869 = vmatprep.mubr.f32.mxu0 %v13973_v61  ;;  %7931 = vmatprep.mubr.f32.mxu1 %v13973_v61 }
 0x542   : > { %5873 = vmatmul.mubr.f32.gmra.mrb[122].mxu0 %v14330_v59  ;;  %7935 = vmatmul.mubr.f32.gmra.mrb[122].mxu1 %v14330_v59 }
 0x543   : > { %5878 = vmatprep.mubr.f32.mxu0 %v13973_v61  ;;  %7940 = vmatprep.mubr.f32.mxu1 %v13973_v61 }
 0x546   : > { %5882 = vmatmul.mubr.f32.gmra.mrb[124].mxu0 %v14331_v13  ;;  %7944 = vmatmul.mubr.f32.gmra.mrb[124].mxu1 %v14331_v13 }
 0x547   : > { %5887 = vmatprep.mubr.f32.mxu0 %v13973_v61  ;;  %7949 = vmatprep.mubr.f32.mxu1 %v13973_v61 }
 0x54a   : > { %5891 = vmatmul.mubr.f32.gmra.mrb[126].mxu0 %v14332_v55  ;;  %7953 = vmatmul.mubr.f32.gmra.mrb[126].mxu1 %v14332_v55 }
 0x54b   : > { %5985 = vmatprep.mubr.f32.mxu0 %v13973_v61  ;;  %8047 = vmatprep.mubr.f32.mxu1 %v13973_v61 }
 0x54e   : > { %5987 = vmatmul.mubr.f32.vlgmr.msra.gmra.mrb[64].mxu0 %v10741_v51  ;;  %8049 = vmatmul.mubr.f32.vlgmr.msra.gmra.mrb[64].mxu1 %v10741_v51 }
 0x54f   : > { %9070 = vmatpush1.bf16.msra.mxu0 %v14248_v19  ;;  %9118 = vmatpush1.bf16.msra.mxu1 %v14249_v16  ;;  %v14333_v19 = vld [vmem:[#allocation105_spill] sm:$0xff] }
 0x550   : > { %5992 = vmatprep.mubr.f32.mxu0 %v13973_v61  ;;  %8054 = vmatprep.mubr.f32.mxu1 %v13973_v61  ;;  %v14334_v16 = vld [vmem:[#allocation109_spill] sm:$0xff] }
 0x551   : > { %9072 = vmatprep.subr.bf16.mxu0 %v14250_v42  ;;  %9120 = vmatprep.subr.bf16.mxu1 %v14251_v38 }
 0x552   : > { %5994 = vmatmul.mubr.f32.gmra.mrb[66].mxu0 %v10799_v62  ;;  %8056 = vmatmul.mubr.f32.gmra.mrb[66].mxu1 %v10799_v62 }
 0x553   : > { %5999 = vmatprep.mubr.f32.mxu0 %v13973_v61  ;;  %8061 = vmatprep.mubr.f32.mxu1 %v13973_v61 }
 0x554   : > { %9074 = vmatpush1.bf16.msra.mxu0 %v14257_v20  ;;  %9122 = vmatpush1.bf16.msra.mxu1 %v14258_v40 }
 0x556   : > { %6001 = vmatmul.mubr.f32.gmra.mrb[68].mxu0 %v10802_v6  ;;  %8063 = vmatmul.mubr.f32.gmra.mrb[68].mxu1 %v10802_v6 }
 0x557   : > { %6006 = vmatprep.mubr.f32.mxu0 %v13973_v61  ;;  %8068 = vmatprep.mubr.f32.mxu1 %v13973_v61 }
 0x55a   : > { %6008 = vmatmul.mubr.f32.gmra.mrb[70].mxu0 %v10810_v8  ;;  %8070 = vmatmul.mubr.f32.gmra.mrb[70].mxu1 %v10810_v8 }
 0x55b   : > { %6013 = vmatprep.mubr.f32.mxu0 %v13973_v61  ;;  %8075 = vmatprep.mubr.f32.mxu1 %v13973_v61 }
 0x55e   : > { %6015 = vmatmul.mubr.f32.gmra.mrb[72].mxu0 %v10818_v24  ;;  %8077 = vmatmul.mubr.f32.gmra.mrb[72].mxu1 %v10818_v24 }
 0x55f   : > { %6020 = vmatprep.mubr.f32.mxu0 %v13973_v61  ;;  %8082 = vmatprep.mubr.f32.mxu1 %v13973_v61 }
 0x562   : > { %6022 = vmatmul.mubr.f32.gmra.mrb[74].mxu0 %v10832_v37  ;;  %8084 = vmatmul.mubr.f32.gmra.mrb[74].mxu1 %v10832_v37 }
 0x563   : > { %6027 = vmatprep.mubr.f32.mxu0 %v13973_v61  ;;  %8089 = vmatprep.mubr.f32.mxu1 %v13973_v61 }
 0x566   : > { %6029 = vmatmul.mubr.f32.gmra.mrb[76].mxu0 %v10848_v9  ;;  %8091 = vmatmul.mubr.f32.gmra.mrb[76].mxu1 %v10848_v9 }
 0x567   : > { %6034 = vmatprep.mubr.f32.mxu0 %v13973_v61  ;;  %8096 = vmatprep.mubr.f32.mxu1 %v13973_v61 }
 0x56a   : > { %6036 = vmatmul.mubr.f32.gmra.mrb[78].mxu0 %v10863_v60  ;;  %8098 = vmatmul.mubr.f32.gmra.mrb[78].mxu1 %v10863_v60 }
 0x56b   : > { %6041 = vmatprep.mubr.f32.mxu0 %v13973_v61  ;;  %8103 = vmatprep.mubr.f32.mxu1 %v13973_v61 }
 0x56e   : > { %6043 = vmatmul.mubr.f32.gmra.mrb[80].mxu0 %v10884_v12  ;;  %8105 = vmatmul.mubr.f32.gmra.mrb[80].mxu1 %v10884_v12 }
 0x56f   : > { %6048 = vmatprep.mubr.f32.mxu0 %v13973_v61  ;;  %8110 = vmatprep.mubr.f32.mxu1 %v13973_v61 }
 0x572   : > { %6050 = vmatmul.mubr.f32.gmra.mrb[82].mxu0 %v10943_v18  ;;  %8112 = vmatmul.mubr.f32.gmra.mrb[82].mxu1 %v10943_v18 }
 0x573   : > { %6055 = vmatprep.mubr.f32.mxu0 %v13973_v61  ;;  %8117 = vmatprep.mubr.f32.mxu1 %v13973_v61 }
 0x576   : > { %6057 = vmatmul.mubr.f32.gmra.mrb[84].mxu0 %v10985_v36  ;;  %8119 = vmatmul.mubr.f32.gmra.mrb[84].mxu1 %v10985_v36 }
 0x577   : > { %6062 = vmatprep.mubr.f32.mxu0 %v13973_v61  ;;  %8124 = vmatprep.mubr.f32.mxu1 %v13973_v61 }
 0x57a   : > { %6064 = vmatmul.mubr.f32.gmra.mrb[86].mxu0 %v10987_v15  ;;  %8126 = vmatmul.mubr.f32.gmra.mrb[86].mxu1 %v10987_v15 }
 0x57b   : > { %6069 = vmatprep.mubr.f32.mxu0 %v13973_v61  ;;  %8131 = vmatprep.mubr.f32.mxu1 %v13973_v61 }
 0x57e   : > { %6071 = vmatmul.mubr.f32.gmra.mrb[88].mxu0 %v11058_v35  ;;  %8133 = vmatmul.mubr.f32.gmra.mrb[88].mxu1 %v11058_v35 }
 0x57f   : > { %6076 = vmatprep.mubr.f32.mxu0 %v13973_v61  ;;  %8138 = vmatprep.mubr.f32.mxu1 %v13973_v61 }
 0x582   : > { %6078 = vmatmul.mubr.f32.gmra.mrb[90].mxu0 %v11085_v45  ;;  %8140 = vmatmul.mubr.f32.gmra.mrb[90].mxu1 %v11085_v45 }
 0x583   : > { %6083 = vmatprep.mubr.f32.mxu0 %v13973_v61  ;;  %8145 = vmatprep.mubr.f32.mxu1 %v13973_v61 }
 0x586   : > { %6085 = vmatmul.mubr.f32.gmra.mrb[92].mxu0 %v11114_v1  ;;  %8147 = vmatmul.mubr.f32.gmra.mrb[92].mxu1 %v11114_v1 }
 0x587   : > { %6090 = vmatprep.mubr.f32.mxu0 %v13973_v61  ;;  %8152 = vmatprep.mubr.f32.mxu1 %v13973_v61 }
 0x58a   : > { %6092 = vmatmul.mubr.f32.gmra.mrb[94].mxu0 %v11147_v53  ;;  %8154 = vmatmul.mubr.f32.gmra.mrb[94].mxu1 %v11147_v53 }
 0x58b   : > { %6097 = vmatprep.mubr.f32.mxu0 %v13973_v61  ;;  %8159 = vmatprep.mubr.f32.mxu1 %v13973_v61 }
 0x58e   : > { %6099 = vmatmul.mubr.f32.gmra.mrb[96].mxu0 %v11172_v30  ;;  %8161 = vmatmul.mubr.f32.gmra.mrb[96].mxu1 %v11172_v30 }
 0x58f   : > { %6104 = vmatprep.mubr.f32.mxu0 %v13973_v61  ;;  %8166 = vmatprep.mubr.f32.mxu1 %v13973_v61 }
 0x592   : > { %6106 = vmatmul.mubr.f32.gmra.mrb[98].mxu0 %v11207_v14  ;;  %8168 = vmatmul.mubr.f32.gmra.mrb[98].mxu1 %v11207_v14 }
 0x593   : > { %6111 = vmatprep.mubr.f32.mxu0 %v13973_v61  ;;  %8173 = vmatprep.mubr.f32.mxu1 %v13973_v61 }
 0x596   : > { %6113 = vmatmul.mubr.f32.gmra.mrb[100].mxu0 %v11212_v34  ;;  %8175 = vmatmul.mubr.f32.gmra.mrb[100].mxu1 %v11212_v34 }
 0x597   : > { %6118 = vmatprep.mubr.f32.mxu0 %v13973_v61  ;;  %8180 = vmatprep.mubr.f32.mxu1 %v13973_v61 }
 0x59a   : > { %6120 = vmatmul.mubr.f32.gmra.mrb[102].mxu0 %v11234_v49  ;;  %8182 = vmatmul.mubr.f32.gmra.mrb[102].mxu1 %v11234_v49 }
 0x59b   : > { %6125 = vmatprep.mubr.f32.mxu0 %v13973_v61  ;;  %8187 = vmatprep.mubr.f32.mxu1 %v13973_v61 }
 0x59e   : > { %6127 = vmatmul.mubr.f32.gmra.mrb[104].mxu0 %v11255_v26  ;;  %8189 = vmatmul.mubr.f32.gmra.mrb[104].mxu1 %v11255_v26 }
 0x59f   : > { %6132 = vmatprep.mubr.f32.mxu0 %v13973_v61  ;;  %8194 = vmatprep.mubr.f32.mxu1 %v13973_v61 }
 0x5a2   : > { %6134 = vmatmul.mubr.f32.gmra.mrb[106].mxu0 %v11275_v50  ;;  %8196 = vmatmul.mubr.f32.gmra.mrb[106].mxu1 %v11275_v50 }
 0x5a3   : > { %6139 = vmatprep.mubr.f32.mxu0 %v13973_v61  ;;  %8201 = vmatprep.mubr.f32.mxu1 %v13973_v61 }
 0x5a6   : > { %6141 = vmatmul.mubr.f32.gmra.mrb[108].mxu0 %v14238_v31  ;;  %8203 = vmatmul.mubr.f32.gmra.mrb[108].mxu1 %v14238_v31 }
 0x5a7   : > { %6146 = vmatprep.mubr.f32.mxu0 %v13973_v61  ;;  %8208 = vmatprep.mubr.f32.mxu1 %v13973_v61 }
 0x5aa   : > { %6148 = vmatmul.mubr.f32.gmra.mrb[110].mxu0 %v14239_v48  ;;  %8210 = vmatmul.mubr.f32.gmra.mrb[110].mxu1 %v14239_v48 }
 0x5ab   : > { %6153 = vmatprep.mubr.f32.mxu0 %v13973_v61  ;;  %8215 = vmatprep.mubr.f32.mxu1 %v13973_v61 }
 0x5ae   : > { %6155 = vmatmul.mubr.f32.gmra.mrb[112].mxu0 %v14240_v17  ;;  %8217 = vmatmul.mubr.f32.gmra.mrb[112].mxu1 %v14240_v17 }
 0x5af   : > { %6160 = vmatprep.mubr.f32.mxu0 %v13973_v61  ;;  %8222 = vmatprep.mubr.f32.mxu1 %v13973_v61 }
 0x5b2   : > { %6162 = vmatmul.mubr.f32.gmra.mrb[114].mxu0 %v14241_v46  ;;  %8224 = vmatmul.mubr.f32.gmra.mrb[114].mxu1 %v14241_v46 }
 0x5b3   : > { %6167 = vmatprep.mubr.f32.mxu0 %v13973_v61  ;;  %8229 = vmatprep.mubr.f32.mxu1 %v13973_v61 }
 0x5b6   : > { %6169 = vmatmul.mubr.f32.gmra.mrb[116].mxu0 %v14242_v52  ;;  %8231 = vmatmul.mubr.f32.gmra.mrb[116].mxu1 %v14242_v52 }
 0x5b7   : > { %6174 = vmatprep.mubr.f32.mxu0 %v13973_v61  ;;  %8236 = vmatprep.mubr.f32.mxu1 %v13973_v61 }
 0x5ba   : > { %6176 = vmatmul.mubr.f32.gmra.mrb[118].mxu0 %v14243_v27  ;;  %8238 = vmatmul.mubr.f32.gmra.mrb[118].mxu1 %v14243_v27 }
 0x5bb   : > { %6181 = vmatprep.mubr.f32.mxu0 %v13973_v61  ;;  %8243 = vmatprep.mubr.f32.mxu1 %v13973_v61 }
 0x5be   : > { %6183 = vmatmul.mubr.f32.gmra.mrb[120].mxu0 %v14244_v32  ;;  %8245 = vmatmul.mubr.f32.gmra.mrb[120].mxu1 %v14244_v32 }
 0x5bf   : > { %6188 = vmatprep.mubr.f32.mxu0 %v13973_v61  ;;  %8250 = vmatprep.mubr.f32.mxu1 %v13973_v61 }
 0x5c2   : > { %6190 = vmatmul.mubr.f32.gmra.mrb[122].mxu0 %v14245_v28  ;;  %8252 = vmatmul.mubr.f32.gmra.mrb[122].mxu1 %v14245_v28 }
 0x5c3   : > { %6195 = vmatprep.mubr.f32.mxu0 %v13973_v61  ;;  %8257 = vmatprep.mubr.f32.mxu1 %v13973_v61 }
 0x5c6   : > { %6197 = vmatmul.mubr.f32.gmra.mrb[124].mxu0 %v14333_v19  ;;  %8259 = vmatmul.mubr.f32.gmra.mrb[124].mxu1 %v14333_v19 }
 0x5c7   : > { %6202 = vmatprep.mubr.f32.mxu0 %v13973_v61  ;;  %8264 = vmatprep.mubr.f32.mxu1 %v13973_v61 }
 0x5ca   : > { %6204 = vmatmul.mubr.f32.gmra.mrb[126].mxu0 %v14334_v16  ;;  %8266 = vmatmul.mubr.f32.gmra.mrb[126].mxu1 %v14334_v16 }
 0x5cb   : > { %6282 = vmatprep.mubr.f32.mxu0 %v13973_v61  ;;  %8344 = vmatprep.mubr.f32.mxu1 %v13973_v61 }
 0x5ce   : > { %6284 = vmatmul.mubr.f32.vlgmr.msra.gmra.mrb[64].mxu0 %v10741_v51  ;;  %8346 = vmatmul.mubr.f32.vlgmr.msra.gmra.mrb[64].mxu1 %v10741_v51 }
 0x5cf   : > { %6289 = vmatprep.mubr.f32.mxu0 %v13973_v61  ;;  %8351 = vmatprep.mubr.f32.mxu1 %v13973_v61 }
 0x5d2   : > { %6291 = vmatmul.mubr.f32.gmra.mrb[66].mxu0 %v10799_v62  ;;  %8353 = vmatmul.mubr.f32.gmra.mrb[66].mxu1 %v10799_v62 }
 0x5d3   : > { %6296 = vmatprep.mubr.f32.mxu0 %v13973_v61  ;;  %8358 = vmatprep.mubr.f32.mxu1 %v13973_v61 }
 0x5d6   : > { %6298 = vmatmul.mubr.f32.gmra.mrb[68].mxu0 %v10802_v6  ;;  %8360 = vmatmul.mubr.f32.gmra.mrb[68].mxu1 %v10802_v6 }
 0x5d7   : > { %6303 = vmatprep.mubr.f32.mxu0 %v13973_v61  ;;  %8365 = vmatprep.mubr.f32.mxu1 %v13973_v61 }
 0x5da   : > { %6305 = vmatmul.mubr.f32.gmra.mrb[70].mxu0 %v10810_v8  ;;  %8367 = vmatmul.mubr.f32.gmra.mrb[70].mxu1 %v10810_v8 }
 0x5db   : > { %6310 = vmatprep.mubr.f32.mxu0 %v13973_v61  ;;  %8372 = vmatprep.mubr.f32.mxu1 %v13973_v61 }
 0x5de   : > { %6312 = vmatmul.mubr.f32.gmra.mrb[72].mxu0 %v10818_v24  ;;  %8374 = vmatmul.mubr.f32.gmra.mrb[72].mxu1 %v10818_v24 }
 0x5df   : > { %6317 = vmatprep.mubr.f32.mxu0 %v13973_v61  ;;  %8379 = vmatprep.mubr.f32.mxu1 %v13973_v61 }
 0x5e2   : > { %6319 = vmatmul.mubr.f32.gmra.mrb[74].mxu0 %v10832_v37  ;;  %8381 = vmatmul.mubr.f32.gmra.mrb[74].mxu1 %v10832_v37 }
 0x5e3   : > { %6324 = vmatprep.mubr.f32.mxu0 %v13973_v61  ;;  %8386 = vmatprep.mubr.f32.mxu1 %v13973_v61 }
 0x5e6   : > { %6326 = vmatmul.mubr.f32.gmra.mrb[76].mxu0 %v10848_v9  ;;  %8388 = vmatmul.mubr.f32.gmra.mrb[76].mxu1 %v10848_v9 }
 0x5e7   : > { %6331 = vmatprep.mubr.f32.mxu0 %v13973_v61  ;;  %8393 = vmatprep.mubr.f32.mxu1 %v13973_v61 }
 0x5ea   : > { %6333 = vmatmul.mubr.f32.gmra.mrb[78].mxu0 %v10863_v60  ;;  %8395 = vmatmul.mubr.f32.gmra.mrb[78].mxu1 %v10863_v60 }
 0x5eb   : > { %6338 = vmatprep.mubr.f32.mxu0 %v13973_v61  ;;  %8400 = vmatprep.mubr.f32.mxu1 %v13973_v61 }
 0x5ee   : > { %6340 = vmatmul.mubr.f32.gmra.mrb[80].mxu0 %v10884_v12  ;;  %8402 = vmatmul.mubr.f32.gmra.mrb[80].mxu1 %v10884_v12 }
 0x5ef   : > { %6345 = vmatprep.mubr.f32.mxu0 %v13973_v61  ;;  %8407 = vmatprep.mubr.f32.mxu1 %v13973_v61 }
 0x5f2   : > { %6347 = vmatmul.mubr.f32.gmra.mrb[82].mxu0 %v10943_v18  ;;  %8409 = vmatmul.mubr.f32.gmra.mrb[82].mxu1 %v10943_v18 }
 0x5f3   : > { %6352 = vmatprep.mubr.f32.mxu0 %v13973_v61  ;;  %8414 = vmatprep.mubr.f32.mxu1 %v13973_v61 }
 0x5f6   : > { %6354 = vmatmul.mubr.f32.gmra.mrb[84].mxu0 %v10985_v36  ;;  %8416 = vmatmul.mubr.f32.gmra.mrb[84].mxu1 %v10985_v36 }
 0x5f7   : > { %6359 = vmatprep.mubr.f32.mxu0 %v13973_v61  ;;  %8421 = vmatprep.mubr.f32.mxu1 %v13973_v61 }
 0x5fa   : > { %6361 = vmatmul.mubr.f32.gmra.mrb[86].mxu0 %v10987_v15  ;;  %8423 = vmatmul.mubr.f32.gmra.mrb[86].mxu1 %v10987_v15 }
 0x5fb   : > { %6366 = vmatprep.mubr.f32.mxu0 %v13973_v61  ;;  %8428 = vmatprep.mubr.f32.mxu1 %v13973_v61 }
 0x5fe   : > { %6368 = vmatmul.mubr.f32.gmra.mrb[88].mxu0 %v11058_v35  ;;  %8430 = vmatmul.mubr.f32.gmra.mrb[88].mxu1 %v11058_v35 }
 0x5ff   : > { %6373 = vmatprep.mubr.f32.mxu0 %v13973_v61  ;;  %8435 = vmatprep.mubr.f32.mxu1 %v13973_v61 }
 0x602   : > { %6375 = vmatmul.mubr.f32.gmra.mrb[90].mxu0 %v11085_v45  ;;  %8437 = vmatmul.mubr.f32.gmra.mrb[90].mxu1 %v11085_v45 }
 0x603   : > { %6380 = vmatprep.mubr.f32.mxu0 %v13973_v61  ;;  %8442 = vmatprep.mubr.f32.mxu1 %v13973_v61 }
 0x606   : > { %6382 = vmatmul.mubr.f32.gmra.mrb[92].mxu0 %v11114_v1  ;;  %8444 = vmatmul.mubr.f32.gmra.mrb[92].mxu1 %v11114_v1 }
 0x607   : > { %6387 = vmatprep.mubr.f32.mxu0 %v13973_v61  ;;  %8449 = vmatprep.mubr.f32.mxu1 %v13973_v61 }
 0x60a   : > { %6389 = vmatmul.mubr.f32.gmra.mrb[94].mxu0 %v11147_v53  ;;  %8451 = vmatmul.mubr.f32.gmra.mrb[94].mxu1 %v11147_v53 }
 0x60b   : > { %6394 = vmatprep.mubr.f32.mxu0 %v13973_v61  ;;  %8456 = vmatprep.mubr.f32.mxu1 %v13973_v61 }
 0x60e   : > { %6396 = vmatmul.mubr.f32.gmra.mrb[96].mxu0 %v11172_v30  ;;  %8458 = vmatmul.mubr.f32.gmra.mrb[96].mxu1 %v11172_v30 }
 0x60f   : > { %6401 = vmatprep.mubr.f32.mxu0 %v13973_v61  ;;  %8463 = vmatprep.mubr.f32.mxu1 %v13973_v61 }
 0x612   : > { %6403 = vmatmul.mubr.f32.gmra.mrb[98].mxu0 %v11207_v14  ;;  %8465 = vmatmul.mubr.f32.gmra.mrb[98].mxu1 %v11207_v14 }
 0x613   : > { %6408 = vmatprep.mubr.f32.mxu0 %v13973_v61  ;;  %8470 = vmatprep.mubr.f32.mxu1 %v13973_v61 }
 0x616   : > { %6410 = vmatmul.mubr.f32.gmra.mrb[100].mxu0 %v11212_v34  ;;  %8472 = vmatmul.mubr.f32.gmra.mrb[100].mxu1 %v11212_v34 }
 0x617   : > { %6415 = vmatprep.mubr.f32.mxu0 %v13973_v61  ;;  %8477 = vmatprep.mubr.f32.mxu1 %v13973_v61 }
 0x61a   : > { %6417 = vmatmul.mubr.f32.gmra.mrb[102].mxu0 %v11234_v49  ;;  %8479 = vmatmul.mubr.f32.gmra.mrb[102].mxu1 %v11234_v49 }
 0x61b   : > { %6422 = vmatprep.mubr.f32.mxu0 %v13973_v61  ;;  %8484 = vmatprep.mubr.f32.mxu1 %v13973_v61 }
 0x61e   : > { %6424 = vmatmul.mubr.f32.gmra.mrb[104].mxu0 %v11255_v26  ;;  %8486 = vmatmul.mubr.f32.gmra.mrb[104].mxu1 %v11255_v26 }
 0x61f   : > { %6429 = vmatprep.mubr.f32.mxu0 %v13973_v61  ;;  %8491 = vmatprep.mubr.f32.mxu1 %v13973_v61 }
 0x622   : > { %6431 = vmatmul.mubr.f32.gmra.mrb[106].mxu0 %v11275_v50  ;;  %8493 = vmatmul.mubr.f32.gmra.mrb[106].mxu1 %v11275_v50 }
 0x623   : > { %6436 = vmatprep.mubr.f32.mxu0 %v13973_v61  ;;  %8498 = vmatprep.mubr.f32.mxu1 %v13973_v61 }
 0x626   : > { %6438 = vmatmul.mubr.f32.gmra.mrb[108].mxu0 %v14238_v31  ;;  %8500 = vmatmul.mubr.f32.gmra.mrb[108].mxu1 %v14238_v31 }
 0x627   : > { %6443 = vmatprep.mubr.f32.mxu0 %v13973_v61  ;;  %8505 = vmatprep.mubr.f32.mxu1 %v13973_v61 }
 0x62a   : > { %6445 = vmatmul.mubr.f32.gmra.mrb[110].mxu0 %v14239_v48  ;;  %8507 = vmatmul.mubr.f32.gmra.mrb[110].mxu1 %v14239_v48 }
 0x62b   : > { %6450 = vmatprep.mubr.f32.mxu0 %v13973_v61  ;;  %8512 = vmatprep.mubr.f32.mxu1 %v13973_v61 }
 0x62e   : > { %6452 = vmatmul.mubr.f32.gmra.mrb[112].mxu0 %v14240_v17  ;;  %8514 = vmatmul.mubr.f32.gmra.mrb[112].mxu1 %v14240_v17 }
 0x62f   : > { %6457 = vmatprep.mubr.f32.mxu0 %v13973_v61  ;;  %8519 = vmatprep.mubr.f32.mxu1 %v13973_v61 }
 0x632   : > { %6459 = vmatmul.mubr.f32.gmra.mrb[114].mxu0 %v14241_v46  ;;  %8521 = vmatmul.mubr.f32.gmra.mrb[114].mxu1 %v14241_v46 }
 0x633   : > { %6464 = vmatprep.mubr.f32.mxu0 %v13973_v61  ;;  %8526 = vmatprep.mubr.f32.mxu1 %v13973_v61 }
 0x636   : > { %6466 = vmatmul.mubr.f32.gmra.mrb[116].mxu0 %v14242_v52  ;;  %8528 = vmatmul.mubr.f32.gmra.mrb[116].mxu1 %v14242_v52 }
 0x637   : > { %6471 = vmatprep.mubr.f32.mxu0 %v13973_v61  ;;  %8533 = vmatprep.mubr.f32.mxu1 %v13973_v61 }
 0x63a   : > { %6473 = vmatmul.mubr.f32.gmra.mrb[118].mxu0 %v14243_v27  ;;  %8535 = vmatmul.mubr.f32.gmra.mrb[118].mxu1 %v14243_v27 }
 0x63b   : > { %6478 = vmatprep.mubr.f32.mxu0 %v13973_v61  ;;  %8540 = vmatprep.mubr.f32.mxu1 %v13973_v61 }
 0x63e   : > { %6480 = vmatmul.mubr.f32.gmra.mrb[120].mxu0 %v14244_v32  ;;  %8542 = vmatmul.mubr.f32.gmra.mrb[120].mxu1 %v14244_v32 }
 0x63f   : > { %6485 = vmatprep.mubr.f32.mxu0 %v13973_v61  ;;  %8547 = vmatprep.mubr.f32.mxu1 %v13973_v61 }
 0x642   : > { %6487 = vmatmul.mubr.f32.gmra.mrb[122].mxu0 %v14245_v28  ;;  %8549 = vmatmul.mubr.f32.gmra.mrb[122].mxu1 %v14245_v28 }
 0x643   : > { %6492 = vmatprep.mubr.f32.mxu0 %v13973_v61  ;;  %8554 = vmatprep.mubr.f32.mxu1 %v13973_v61 }
 0x646   : > { %6494 = vmatmul.mubr.f32.gmra.mrb[124].mxu0 %v14333_v19  ;;  %8556 = vmatmul.mubr.f32.gmra.mrb[124].mxu1 %v14333_v19 }
 0x647   : > { %6499 = vmatprep.mubr.f32.mxu0 %v13973_v61  ;;  %8561 = vmatprep.mubr.f32.mxu1 %v13973_v61 }
 0x64a   : > { %6501 = vmatmul.mubr.f32.gmra.mrb[126].mxu0 %v14334_v16  ;;  %8563 = vmatmul.mubr.f32.gmra.mrb[126].mxu1 %v14334_v16 }
 0x6a1   : > { %v6285_v51 = vpop.f32.mrb[64].mxu0  ;;  %v8347_v62 = vpop.f32.mrb[64].mxu1 }
 0x6a2   : > { %8573 = vst [vmem:[%s12528_s25 + $0x20] sm:$0xff] %v6285_v51  ;;  %8575 = vst [vmem:[%s12528_s25 + $0x30] sm:$0xff] %v8347_v62  ;;  %v6287_v9 = vpop.f32.mrb[65].mxu0  ;;  %v8349_v6 = vpop.f32.mrb[65].mxu1 }
 0x6a3   : > { %8574 = vst [vmem:[%s12528_s25 + $0x28] sm:$0xff] %v6287_v9  ;;  %8576 = vst [vmem:[%s12528_s25 + $0x38] sm:$0xff] %v8349_v6 }
 0x6a5   : > { %v6292_v8 = vpop.f32.mrb[66].mxu0  ;;  %v8354_v61 = vpop.f32.mrb[66].mxu1 }
 0x6a6   : > { %8581 = vst [vmem:[%s12528_s25 + $0x60] sm:$0xff] %v6292_v8  ;;  %8583 = vst [vmem:[%s12528_s25 + $0x70] sm:$0xff] %v8354_v61  ;;  %v6294_v24 = vpop.f32.mrb[67].mxu0  ;;  %v8356_v37 = vpop.f32.mrb[67].mxu1 }
 0x6a7   : > { %8582 = vst [vmem:[%s12528_s25 + $0x68] sm:$0xff] %v6294_v24  ;;  %8584 = vst [vmem:[%s12528_s25 + $0x78] sm:$0xff] %v8356_v37 }
 0x6a9   : > { %v6299_v60 = vpop.f32.mrb[68].mxu0  ;;  %v8361_v12 = vpop.f32.mrb[68].mxu1 }
 0x6aa   : > { %8589 = vst [vmem:[%s12528_s25 + $0xa0] sm:$0xff] %v6299_v60  ;;  %8591 = vst [vmem:[%s12528_s25 + $0xb0] sm:$0xff] %v8361_v12  ;;  %v6301_v18 = vpop.f32.mrb[69].mxu0  ;;  %v8363_v36 = vpop.f32.mrb[69].mxu1 }
 0x6ab   : > { %8590 = vst [vmem:[%s12528_s25 + $0xa8] sm:$0xff] %v6301_v18  ;;  %8592 = vst [vmem:[%s12528_s25 + $0xb8] sm:$0xff] %v8363_v36 }
 0x6ad   : > { %v6306_v15 = vpop.f32.mrb[70].mxu0  ;;  %v8368_v35 = vpop.f32.mrb[70].mxu1 }
 0x6ae   : > { %8597 = vst [vmem:[%s12528_s25 + $0xe0] sm:$0xff] %v6306_v15  ;;  %8599 = vst [vmem:[%s12528_s25 + $0xf0] sm:$0xff] %v8368_v35  ;;  %v6308_v45 = vpop.f32.mrb[71].mxu0  ;;  %v8370_v34 = vpop.f32.mrb[71].mxu1 }
 0x6af   : > { %8598 = vst [vmem:[%s12528_s25 + $0xe8] sm:$0xff] %v6308_v45  ;;  %8600 = vst [vmem:[%s12528_s25 + $0xf8] sm:$0xff] %v8370_v34 }
 0x6b1   : > { %v6313_v1 = vpop.f32.mrb[72].mxu0  ;;  %v8375_v30 = vpop.f32.mrb[72].mxu1 }
 0x6b2   : > { %8605 = vst [vmem:[%s12528_s25 + $0x120] sm:$0xff] %v6313_v1  ;;  %8607 = vst [vmem:[%s12528_s25 + $0x130] sm:$0xff] %v8375_v30  ;;  %v6315_v53 = vpop.f32.mrb[73].mxu0  ;;  %v8377_v14 = vpop.f32.mrb[73].mxu1 }
 0x6b3   : > { %8606 = vst [vmem:[%s12528_s25 + $0x128] sm:$0xff] %v6315_v53  ;;  %8608 = vst [vmem:[%s12528_s25 + $0x138] sm:$0xff] %v8377_v14 }
 0x6b5   : > { %v6320_v49 = vpop.f32.mrb[74].mxu0  ;;  %v8382_v26 = vpop.f32.mrb[74].mxu1 }
 0x6b6   : > { %8613 = vst [vmem:[%s12528_s25 + $0x160] sm:$0xff] %v6320_v49  ;;  %8615 = vst [vmem:[%s12528_s25 + $0x170] sm:$0xff] %v8382_v26  ;;  %v6322_v50 = vpop.f32.mrb[75].mxu0  ;;  %v8384_v31 = vpop.f32.mrb[75].mxu1 }
 0x6b7   : > { %8614 = vst [vmem:[%s12528_s25 + $0x168] sm:$0xff] %v6322_v50  ;;  %8616 = vst [vmem:[%s12528_s25 + $0x178] sm:$0xff] %v8384_v31 }
 0x6b9   : > { %v6327_v48 = vpop.f32.mrb[76].mxu0  ;;  %v8389_v17 = vpop.f32.mrb[76].mxu1 }
 0x6ba   : > { %8621 = vst [vmem:[%s12528_s25 + $0x1a0] sm:$0xff] %v6327_v48  ;;  %8623 = vst [vmem:[%s12528_s25 + $0x1b0] sm:$0xff] %v8389_v17  ;;  %v6329_v46 = vpop.f32.mrb[77].mxu0  ;;  %v8391_v52 = vpop.f32.mrb[77].mxu1 }
 0x6bb   : > { %8622 = vst [vmem:[%s12528_s25 + $0x1a8] sm:$0xff] %v6329_v46  ;;  %8624 = vst [vmem:[%s12528_s25 + $0x1b8] sm:$0xff] %v8391_v52 }
 0x6bd   : > { %v6334_v27 = vpop.f32.mrb[78].mxu0  ;;  %v8396_v32 = vpop.f32.mrb[78].mxu1 }
 0x6be   : > { %8629 = vst [vmem:[%s12528_s25 + $0x1e0] sm:$0xff] %v6334_v27  ;;  %8631 = vst [vmem:[%s12528_s25 + $0x1f0] sm:$0xff] %v8396_v32  ;;  %v6336_v28 = vpop.f32.mrb[79].mxu0  ;;  %v8398_v42 = vpop.f32.mrb[79].mxu1 }
 0x6bf   : > { %8630 = vst [vmem:[%s12528_s25 + $0x1e8] sm:$0xff] %v6336_v28  ;;  %8632 = vst [vmem:[%s12528_s25 + $0x1f8] sm:$0xff] %v8398_v42 }
 0x6c1   : > { %v6341_v38 = vpop.f32.mrb[80].mxu0  ;;  %v8403_v20 = vpop.f32.mrb[80].mxu1 }
 0x6c2   : > { %8637 = vst [vmem:[%s12528_s25 + $0x220] sm:$0xff] %v6341_v38  ;;  %8639 = vst [vmem:[%s12528_s25 + $0x230] sm:$0xff] %v8403_v20  ;;  %v6343_v40 = vpop.f32.mrb[81].mxu0  ;;  %v8405_v57 = vpop.f32.mrb[81].mxu1 }
 0x6c3   : > { %8638 = vst [vmem:[%s12528_s25 + $0x228] sm:$0xff] %v6343_v40  ;;  %8640 = vst [vmem:[%s12528_s25 + $0x238] sm:$0xff] %v8405_v57 }
 0x6c5   : > { %v6348_v5 = vpop.f32.mrb[82].mxu0  ;;  %v8410_v58 = vpop.f32.mrb[82].mxu1 }
 0x6c6   : > { %8645 = vst [vmem:[%s12528_s25 + $0x260] sm:$0xff] %v6348_v5  ;;  %8647 = vst [vmem:[%s12528_s25 + $0x270] sm:$0xff] %v8410_v58  ;;  %v6350_v11 = vpop.f32.mrb[83].mxu0  ;;  %v8412_v33 = vpop.f32.mrb[83].mxu1 }
 0x6c7   : > { %8646 = vst [vmem:[%s12528_s25 + $0x268] sm:$0xff] %v6350_v11  ;;  %8648 = vst [vmem:[%s12528_s25 + $0x278] sm:$0xff] %v8412_v33 }
 0x6c9   : > { %v6355_v23 = vpop.f32.mrb[84].mxu0  ;;  %v8417_v10 = vpop.f32.mrb[84].mxu1 }
 0x6ca   : > { %8653 = vst [vmem:[%s12528_s25 + $0x2a0] sm:$0xff] %v6355_v23  ;;  %8655 = vst [vmem:[%s12528_s25 + $0x2b0] sm:$0xff] %v8417_v10  ;;  %v6357_v3 = vpop.f32.mrb[85].mxu0  ;;  %v8419_v54 = vpop.f32.mrb[85].mxu1 }
 0x6cb   : > { %8654 = vst [vmem:[%s12528_s25 + $0x2a8] sm:$0xff] %v6357_v3  ;;  %8656 = vst [vmem:[%s12528_s25 + $0x2b8] sm:$0xff] %v8419_v54 }
 0x6cd   : > { %v6362_v56 = vpop.f32.mrb[86].mxu0  ;;  %v8424_v21 = vpop.f32.mrb[86].mxu1 }
 0x6ce   : > { %8661 = vst [vmem:[%s12528_s25 + $0x2e0] sm:$0xff] %v6362_v56  ;;  %8663 = vst [vmem:[%s12528_s25 + $0x2f0] sm:$0xff] %v8424_v21  ;;  %v6364_v29 = vpop.f32.mrb[87].mxu0  ;;  %v8426_v47 = vpop.f32.mrb[87].mxu1 }
 0x6cf   : > { %8662 = vst [vmem:[%s12528_s25 + $0x2e8] sm:$0xff] %v6364_v29  ;;  %8664 = vst [vmem:[%s12528_s25 + $0x2f8] sm:$0xff] %v8426_v47 }
 0x6d1   : > { %v6369_v25 = vpop.f32.mrb[88].mxu0  ;;  %v8431_v44 = vpop.f32.mrb[88].mxu1 }
 0x6d2   : > { %8669 = vst [vmem:[%s12528_s25 + $0x320] sm:$0xff] %v6369_v25  ;;  %8671 = vst [vmem:[%s12528_s25 + $0x330] sm:$0xff] %v8431_v44  ;;  %v6371_v0 = vpop.f32.mrb[89].mxu0  ;;  %v8433_v63 = vpop.f32.mrb[89].mxu1 }
 0x6d3   : > { %8670 = vst [vmem:[%s12528_s25 + $0x328] sm:$0xff] %v6371_v0  ;;  %8672 = vst [vmem:[%s12528_s25 + $0x338] sm:$0xff] %v8433_v63 }
 0x6d5   : > { %v6376_v41 = vpop.f32.mrb[90].mxu0  ;;  %v8438_v4 = vpop.f32.mrb[90].mxu1 }
 0x6d6   : > { %8677 = vst [vmem:[%s12528_s25 + $0x360] sm:$0xff] %v6376_v41  ;;  %8679 = vst [vmem:[%s12528_s25 + $0x370] sm:$0xff] %v8438_v4  ;;  %v6378_v2 = vpop.f32.mrb[91].mxu0  ;;  %v8440_v22 = vpop.f32.mrb[91].mxu1 }
 0x6d7   : > { %8678 = vst [vmem:[%s12528_s25 + $0x368] sm:$0xff] %v6378_v2  ;;  %8680 = vst [vmem:[%s12528_s25 + $0x378] sm:$0xff] %v8440_v22 }
 0x6d9   : > { %v6383_v39 = vpop.f32.mrb[92].mxu0  ;;  %v8445_v7 = vpop.f32.mrb[92].mxu1 }
 0x6da   : > { %8685 = vst [vmem:[%s12528_s25 + $0x3a0] sm:$0xff] %v6383_v39  ;;  %8687 = vst [vmem:[%s12528_s25 + $0x3b0] sm:$0xff] %v8445_v7  ;;  %v6385_v43 = vpop.f32.mrb[93].mxu0  ;;  %v8447_v59 = vpop.f32.mrb[93].mxu1 }
 0x6db   : > { %8686 = vst [vmem:[%s12528_s25 + $0x3a8] sm:$0xff] %v6385_v43  ;;  %8688 = vst [vmem:[%s12528_s25 + $0x3b8] sm:$0xff] %v8447_v59 }
 0x6dd   : > { %v6390_v13 = vpop.f32.mrb[94].mxu0  ;;  %v8452_v55 = vpop.f32.mrb[94].mxu1 }
 0x6de   : > { %8693 = vst [vmem:[%s12528_s25 + $0x3e0] sm:$0xff] %v6390_v13  ;;  %8695 = vst [vmem:[%s12528_s25 + $0x3f0] sm:$0xff] %v8452_v55  ;;  %v6392_v19 = vpop.f32.mrb[95].mxu0  ;;  %v8454_v16 = vpop.f32.mrb[95].mxu1 }
 0x6df   : > { %8694 = vst [vmem:[%s12528_s25 + $0x3e8] sm:$0xff] %v6392_v19  ;;  %8696 = vst [vmem:[%s12528_s25 + $0x3f8] sm:$0xff] %v8454_v16 }
 0x6e1   : > { %v6397_v51 = vpop.f32.mrb[96].mxu0  ;;  %v8459_v62 = vpop.f32.mrb[96].mxu1 }
 0x6e2   : > { %8701 = vst [vmem:[%s12528_s25 + $0x420] sm:$0xff] %v6397_v51  ;;  %8703 = vst [vmem:[%s12528_s25 + $0x430] sm:$0xff] %v8459_v62  ;;  %v6399_v9 = vpop.f32.mrb[97].mxu0  ;;  %v8461_v6 = vpop.f32.mrb[97].mxu1 }
 0x6e3   : > { %8702 = vst [vmem:[%s12528_s25 + $0x428] sm:$0xff] %v6399_v9  ;;  %8704 = vst [vmem:[%s12528_s25 + $0x438] sm:$0xff] %v8461_v6 }
 0x6e5   : > { %v6404_v8 = vpop.f32.mrb[98].mxu0  ;;  %v8466_v61 = vpop.f32.mrb[98].mxu1 }
 0x6e6   : > { %8709 = vst [vmem:[%s12528_s25 + $0x460] sm:$0xff] %v6404_v8  ;;  %8711 = vst [vmem:[%s12528_s25 + $0x470] sm:$0xff] %v8466_v61  ;;  %v6406_v24 = vpop.f32.mrb[99].mxu0  ;;  %v8468_v37 = vpop.f32.mrb[99].mxu1 }
 0x6e7   : > { %8710 = vst [vmem:[%s12528_s25 + $0x468] sm:$0xff] %v6406_v24  ;;  %8712 = vst [vmem:[%s12528_s25 + $0x478] sm:$0xff] %v8468_v37 }
 0x6e9   : > { %v6411_v60 = vpop.f32.mrb[100].mxu0  ;;  %v8473_v12 = vpop.f32.mrb[100].mxu1 }
 0x6ea   : > { %8717 = vst [vmem:[%s12528_s25 + $0x4a0] sm:$0xff] %v6411_v60  ;;  %8719 = vst [vmem:[%s12528_s25 + $0x4b0] sm:$0xff] %v8473_v12  ;;  %v6413_v18 = vpop.f32.mrb[101].mxu0  ;;  %v8475_v36 = vpop.f32.mrb[101].mxu1 }
 0x6eb   : > { %8718 = vst [vmem:[%s12528_s25 + $0x4a8] sm:$0xff] %v6413_v18  ;;  %8720 = vst [vmem:[%s12528_s25 + $0x4b8] sm:$0xff] %v8475_v36 }
 0x6ed   : > { %v6418_v15 = vpop.f32.mrb[102].mxu0  ;;  %v8480_v35 = vpop.f32.mrb[102].mxu1 }
 0x6ee   : > { %8725 = vst [vmem:[%s12528_s25 + $0x4e0] sm:$0xff] %v6418_v15  ;;  %8727 = vst [vmem:[%s12528_s25 + $0x4f0] sm:$0xff] %v8480_v35  ;;  %v6420_v45 = vpop.f32.mrb[103].mxu0  ;;  %v8482_v34 = vpop.f32.mrb[103].mxu1 }
 0x6ef   : > { %8726 = vst [vmem:[%s12528_s25 + $0x4e8] sm:$0xff] %v6420_v45  ;;  %8728 = vst [vmem:[%s12528_s25 + $0x4f8] sm:$0xff] %v8482_v34 }
 0x6f1   : > { %v6425_v1 = vpop.f32.mrb[104].mxu0  ;;  %v8487_v30 = vpop.f32.mrb[104].mxu1 }
 0x6f2   : > { %8733 = vst [vmem:[%s12528_s25 + $0x520] sm:$0xff] %v6425_v1  ;;  %8735 = vst [vmem:[%s12528_s25 + $0x530] sm:$0xff] %v8487_v30  ;;  %v6427_v53 = vpop.f32.mrb[105].mxu0  ;;  %v8489_v14 = vpop.f32.mrb[105].mxu1 }
 0x6f3   : > { %8734 = vst [vmem:[%s12528_s25 + $0x528] sm:$0xff] %v6427_v53  ;;  %8736 = vst [vmem:[%s12528_s25 + $0x538] sm:$0xff] %v8489_v14 }
 0x6f5   : > { %v6432_v49 = vpop.f32.mrb[106].mxu0  ;;  %v8494_v26 = vpop.f32.mrb[106].mxu1 }
 0x6f6   : > { %8741 = vst [vmem:[%s12528_s25 + $0x560] sm:$0xff] %v6432_v49  ;;  %8743 = vst [vmem:[%s12528_s25 + $0x570] sm:$0xff] %v8494_v26  ;;  %v6434_v50 = vpop.f32.mrb[107].mxu0  ;;  %v8496_v31 = vpop.f32.mrb[107].mxu1 }
 0x6f7   : > { %8742 = vst [vmem:[%s12528_s25 + $0x568] sm:$0xff] %v6434_v50  ;;  %8744 = vst [vmem:[%s12528_s25 + $0x578] sm:$0xff] %v8496_v31 }
 0x6f9   : > { %v6439_v48 = vpop.f32.mrb[108].mxu0  ;;  %v8501_v17 = vpop.f32.mrb[108].mxu1 }
 0x6fa   : > { %8749 = vst [vmem:[%s12528_s25 + $0x5a0] sm:$0xff] %v6439_v48  ;;  %8751 = vst [vmem:[%s12528_s25 + $0x5b0] sm:$0xff] %v8501_v17  ;;  %v6441_v46 = vpop.f32.mrb[109].mxu0  ;;  %v8503_v52 = vpop.f32.mrb[109].mxu1 }
 0x6fb   : > { %8750 = vst [vmem:[%s12528_s25 + $0x5a8] sm:$0xff] %v6441_v46  ;;  %8752 = vst [vmem:[%s12528_s25 + $0x5b8] sm:$0xff] %v8503_v52 }
 0x6fd   : > { %v6446_v27 = vpop.f32.mrb[110].mxu0  ;;  %v8508_v32 = vpop.f32.mrb[110].mxu1 }
 0x6fe   : > { %8757 = vst [vmem:[%s12528_s25 + $0x5e0] sm:$0xff] %v6446_v27  ;;  %8759 = vst [vmem:[%s12528_s25 + $0x5f0] sm:$0xff] %v8508_v32  ;;  %v6448_v28 = vpop.f32.mrb[111].mxu0  ;;  %v8510_v42 = vpop.f32.mrb[111].mxu1 }
 0x6ff   : > { %8758 = vst [vmem:[%s12528_s25 + $0x5e8] sm:$0xff] %v6448_v28  ;;  %8760 = vst [vmem:[%s12528_s25 + $0x5f8] sm:$0xff] %v8510_v42 }
 0x701   : > { %v6453_v38 = vpop.f32.mrb[112].mxu0  ;;  %v8515_v20 = vpop.f32.mrb[112].mxu1 }
 0x702   : > { %8765 = vst [vmem:[%s12528_s25 + $0x620] sm:$0xff] %v6453_v38  ;;  %8767 = vst [vmem:[%s12528_s25 + $0x630] sm:$0xff] %v8515_v20  ;;  %v6455_v40 = vpop.f32.mrb[113].mxu0  ;;  %v8517_v57 = vpop.f32.mrb[113].mxu1 }
 0x703   : > { %8766 = vst [vmem:[%s12528_s25 + $0x628] sm:$0xff] %v6455_v40  ;;  %8768 = vst [vmem:[%s12528_s25 + $0x638] sm:$0xff] %v8517_v57 }
 0x705   : > { %v6460_v5 = vpop.f32.mrb[114].mxu0  ;;  %v8522_v58 = vpop.f32.mrb[114].mxu1 }
 0x706   : > { %8773 = vst [vmem:[%s12528_s25 + $0x660] sm:$0xff] %v6460_v5  ;;  %8775 = vst [vmem:[%s12528_s25 + $0x670] sm:$0xff] %v8522_v58  ;;  %v6462_v11 = vpop.f32.mrb[115].mxu0  ;;  %v8524_v33 = vpop.f32.mrb[115].mxu1 }
 0x707   : > { %8774 = vst [vmem:[%s12528_s25 + $0x668] sm:$0xff] %v6462_v11  ;;  %8776 = vst [vmem:[%s12528_s25 + $0x678] sm:$0xff] %v8524_v33 }
 0x709   : > { %v6467_v23 = vpop.f32.mrb[116].mxu0  ;;  %v8529_v10 = vpop.f32.mrb[116].mxu1 }
 0x70a   : > { %8781 = vst [vmem:[%s12528_s25 + $0x6a0] sm:$0xff] %v6467_v23  ;;  %8783 = vst [vmem:[%s12528_s25 + $0x6b0] sm:$0xff] %v8529_v10  ;;  %v6469_v3 = vpop.f32.mrb[117].mxu0  ;;  %v8531_v54 = vpop.f32.mrb[117].mxu1 }
 0x70b   : > { %8782 = vst [vmem:[%s12528_s25 + $0x6a8] sm:$0xff] %v6469_v3  ;;  %8784 = vst [vmem:[%s12528_s25 + $0x6b8] sm:$0xff] %v8531_v54 }
 0x70d   : > { %v6474_v56 = vpop.f32.mrb[118].mxu0  ;;  %v8536_v21 = vpop.f32.mrb[118].mxu1 }
 0x70e   : > { %8789 = vst [vmem:[%s12528_s25 + $0x6e0] sm:$0xff] %v6474_v56  ;;  %8791 = vst [vmem:[%s12528_s25 + $0x6f0] sm:$0xff] %v8536_v21  ;;  %v6476_v29 = vpop.f32.mrb[119].mxu0  ;;  %v8538_v47 = vpop.f32.mrb[119].mxu1 }
 0x70f   : > { %8790 = vst [vmem:[%s12528_s25 + $0x6e8] sm:$0xff] %v6476_v29  ;;  %8792 = vst [vmem:[%s12528_s25 + $0x6f8] sm:$0xff] %v8538_v47 }
 0x711   : > { %v6481_v25 = vpop.f32.mrb[120].mxu0  ;;  %v8543_v44 = vpop.f32.mrb[120].mxu1 }
 0x712   : > { %8797 = vst [vmem:[%s12528_s25 + $0x720] sm:$0xff] %v6481_v25  ;;  %8799 = vst [vmem:[%s12528_s25 + $0x730] sm:$0xff] %v8543_v44  ;;  %v6483_v0 = vpop.f32.mrb[121].mxu0  ;;  %v8545_v63 = vpop.f32.mrb[121].mxu1 }
 0x713   : > { %8798 = vst [vmem:[%s12528_s25 + $0x728] sm:$0xff] %v6483_v0  ;;  %8800 = vst [vmem:[%s12528_s25 + $0x738] sm:$0xff] %v8545_v63 }
 0x715   : > { %v6488_v41 = vpop.f32.mrb[122].mxu0  ;;  %v8550_v4 = vpop.f32.mrb[122].mxu1 }
 0x716   : > { %8805 = vst [vmem:[%s12528_s25 + $0x760] sm:$0xff] %v6488_v41  ;;  %8807 = vst [vmem:[%s12528_s25 + $0x770] sm:$0xff] %v8550_v4  ;;  %v6490_v2 = vpop.f32.mrb[123].mxu0  ;;  %v8552_v22 = vpop.f32.mrb[123].mxu1 }
 0x717   : > { %8806 = vst [vmem:[%s12528_s25 + $0x768] sm:$0xff] %v6490_v2  ;;  %8808 = vst [vmem:[%s12528_s25 + $0x778] sm:$0xff] %v8552_v22 }
 0x719   : > { %v6495_v39 = vpop.f32.mrb[124].mxu0  ;;  %v8557_v7 = vpop.f32.mrb[124].mxu1 }
 0x71a   : > { %8813 = vst [vmem:[%s12528_s25 + $0x7a0] sm:$0xff] %v6495_v39  ;;  %8815 = vst [vmem:[%s12528_s25 + $0x7b0] sm:$0xff] %v8557_v7  ;;  %v6497_v43 = vpop.f32.mrb[125].mxu0  ;;  %v8559_v59 = vpop.f32.mrb[125].mxu1 }
 0x71b   : > { %8814 = vst [vmem:[%s12528_s25 + $0x7a8] sm:$0xff] %v6497_v43  ;;  %8816 = vst [vmem:[%s12528_s25 + $0x7b8] sm:$0xff] %v8559_v59 }
 0x71d   : > { %v6502_v13 = vpop.f32.mrb[126].mxu0  ;;  %v8564_v55 = vpop.f32.mrb[126].mxu1 }
 0x71e   : > { %8821 = vst [vmem:[%s12528_s25 + $0x7e0] sm:$0xff] %v6502_v13  ;;  %8823 = vst [vmem:[%s12528_s25 + $0x7f0] sm:$0xff] %v8564_v55  ;;  %v6504_v19 = vpop.f32.mrb[127].mxu0  ;;  %v8566_v16 = vpop.f32.mrb[127].mxu1 }
 0x71f   : > { %8822 = vst [vmem:[%s12528_s25 + $0x7e8] sm:$0xff] %v6504_v19  ;;  %8824 = vst [vmem:[%s12528_s25 + $0x7f8] sm:$0xff] %v8566_v16 }
 0x720   : > { %10499 = shalt.err (!%p10496_p7)
}
 0x721   : > { %s10500_s7 = scalar_lea.hbm %s13529_s30, 32768  ;;  %s10504_s16 = scalar_lea.hbm %s13582_s2, 65536 }
 0x722   : > { %p10501_p8 = scmp.ne.s32.totalorder %s13529_s30, %s10500_s7  ;;  %p10505_p1 = scmp.lt.u32.totalorder %s13529_s30, %s13582_s2 }
 0x723   : > { %p10506_p0 = scmp.lt.u32.totalorder %s10504_s16, %s10500_s7  ;;  %p10508_p6 = scmp.lt.u32.totalorder %s10500_s7, %s13529_s30 }
 0x724   : > { %p10502_p11 = pnand %p10501_p8, %p14335_p9 }
 0x725   : > { %p10507_p5 = por %p10506_p0, %p10505_p1 }
 0x726   : > { %p10503_p13 = pneg %p10502_p11 }
 0x727   : > { %p10509_p10 = por %p10508_p6, %p10507_p5 }
 0x729   : > { %p10510_p12 = pnand %p10509_p10, %p10503_p13 }
 0x72b   : > { %10513 = shalt.err (!%p10510_p12)
}
 0x72c   : > { %s10559_s22 = smov 1024   ;;  %s10560_s23 = smov 64  }
 0x72d   : > { %10407 = dma.vmem_to_hbm [thread:$0]  (%p14335_p9), %s13531_s27, 32768, %s13529_s30, %s13539_s13, %s10559_s22, %s10559_s22, %s10560_s23  }
 0x72e PF: > { %p10419_p2 = scmp.ge.s32.totalorder %s10552_s12, 2  ;;  %s8855_s24 = sand.u32 1, %s10540_s9  }
 0x72f   : > { %p14336_p3 = scmp.ne.s32.totalorder %s13937_s20, 0  ;;  %s8856_s25 = scalar_lea.sflag [#allocation4], %s8855_s24 }
 0x731   : > { %p10414_p4 = pnand %p10419_p2, %p14336_p3 }
 0x733   : > { %10535 = dma.done.wait (!%p10414_p4), %s8856_s25, 32768  }
 0x734   : > { %10537 = vsyncadd (!%p10414_p4), %s8856_s25, 4294934528  ;;  %p13_p7 = scmp.ge.s32.totalorder %s10601_s15, 4   ;;  %s14337_s9 = smov %s10544_s10 }
 0x735   : > { %s14338_s10 = smov %s10548_s11  ;;  %s14339_s11 = smov %s10612_s18 }
 0x736   : > { %s14340_s12 = smov %s10601_s15  ;;  %15 = sbr.rel (!%p13_p7) target bundleno = 4 (0x4), region = 68 }
 0x73d   :  { %8861 = vsyncpa [#allocation3], 1 }
 0x73e   :  { %8863 = vsyncpa [#allocation3 + $0x1], 1 }
 0x73f   :  { %8864 = vsyncpa [#allocation4], 1 }
 0x740   :  { %8866 = vsyncpa [#allocation4 + $0x1], 1 }

</bundles_post_ra>
